<compile_context>
chip_gen: v7x
topology: tpu7x:2x2x1
jax: 0.10.0
libtpu: 0.0.40
codegen_flags: <defaults>
</compile_context>

<pallas_src>
import jax
import jax.numpy as jnp
from jax.experimental import pallas as pl
from jax.experimental.pallas import tpu as pltpu


# ----------------------------------------------------------------------------
# Generation-aware VMEM budget / tile pickers
# ----------------------------------------------------------------------------
def _vmem_limit_bytes():
    """~3/4 of physical VMEM, capped at 96 MiB (v5e/v6e: 128 MiB, v7x: 64 MiB/TC)."""
    try:
        cap = int(pltpu.get_tpu_info().vmem_capacity_bytes)
    except Exception:  # conservative fallback sized for v7x
        cap = 64 * 1024 * 1024
    return max(32 * 1024 * 1024, min(3 * cap // 4, 96 * 1024 * 1024))


def _pick_tile(M, cap=512):
    """Largest divisor of M <= cap that is a multiple of 16 (else 8, else full M)."""
    for align in (16, 8):
        for t in range(min(cap, M), align - 1, -1):
            if M % t == 0 and t % align == 0:
                return t
    return M  # full-extent block is always legal


def _pick_row_tile(H, W, target_m=1024):
    """Largest even divisor TH of H with matmul rows TH*W <= target_m; pooled
    output block stays a multiple of 8 rows unless it is the full extent."""
    cands = [th for th in range(2, H + 1, 2)
             if H % th == 0 and (th == H or (th * W) % 32 == 0)]
    if not cands:
        return H
    fitting = [th for th in cands if th * W <= target_m]
    return max(fitting) if fitting else min(cands)


# ----------------------------------------------------------------------------
# Pallas kernels
# ----------------------------------------------------------------------------
def _conv_relu_kernel(p_ref, w_ref, b_ref, o_ref):
    # p_ref: (1, TM, K) bf16 im2col rows; w_ref: (K, Cout) bf16 (VMEM-resident)
    # b_ref: (1, Cout) f32; o_ref: (1, TM, Cout)
    acc = jnp.dot(p_ref[0], w_ref[...], preferred_element_type=jnp.float32)
    o_ref[0] = jnp.maximum(acc + b_ref[...], 0.0).astype(o_ref.dtype)


def _make_conv_relu_pool_kernel(TH, W, Cin, Cout):
    """3x3 conv + ReLU + 2x2/2 max-pool over one halo'd row tile.

    In-kernel im2col: 9 shifted (TH*W, Cin) x (Cin, Cout) MXU dots, f32 acc.
    All in-kernel reshapes keep the minor (lane) dim unchanged.
    """
    THo, Wo = TH // 2, W // 2

    def kernel(x_ref, w_ref, b_ref, o_ref):
        # x_ref: (1, 1, TH+2, W+2, Cin) bf16  zero-padded halo'd row tile
        # w_ref: (9, Cin, Cout) bf16          w[dy*3+dx, ci, co]
        # b_ref: (1, Cout) f32
        # o_ref: (1, THo*Wo, Cout)
        xt = x_ref[0, 0]                                   # (TH+2, W+2, Cin)
        acc = None
        for dy in range(3):
            xr = xt[dy:dy + TH]                            # (TH, W+2, Cin)
            for dx in range(3):
                lhs = xr[:, dx:dx + W, :].reshape(TH * W, Cin)
                d = jnp.dot(lhs, w_ref[dy * 3 + dx],
                            preferred_element_type=jnp.float32)
                acc = d if acc is None else acc + d
        # Fused 2x2/2 max-pool: max over the window commutes with the
        # (monotone) bias-add + ReLU, so pool the raw accumulator first.
        a = acc.reshape(THo, 2, W, Cout)
        a = jnp.maximum(a[:, 0, :, :], a[:, 1, :, :])      # rows 2p vs 2p+1
        a = a.reshape(THo, Wo, 2, Cout)
        a = jnp.maximum(a[:, :, 0, :], a[:, :, 1, :])      # cols 2q vs 2q+1
        a = a.reshape(THo * Wo, Cout)
        o_ref[0] = jnp.maximum(a + b_ref[...], 0.0).astype(o_ref.dtype)

    return kernel


# ----------------------------------------------------------------------------
# Wrappers (layout plumbing only; compute stays in the kernels)
# ----------------------------------------------------------------------------
def _im2col_3x3(x_nhwc):
    """(N,H,W,Cin) -> (N,H,W,9*Cin); K index = (dy*3+dx)*Cin + ci."""
    N, H, W, Cin = x_nhwc.shape
    xp = jnp.pad(x_nhwc, ((0, 0), (1, 1), (1, 1), (0, 0)))
    return jnp.concatenate(
        [xp[:, dy:dy + H, dx:dx + W, :] for dy in range(3) for dx in range(3)],
        axis=-1)


def conv3x3_relu(x_nhwc, w_oihw, b, out_dtype=jnp.bfloat16):
    """3x3 conv (stride 1, pad 1) + ReLU via a tiled im2col MXU matmul (conv1 only)."""
    N, H, W, Cin = x_nhwc.shape
    Cout = w_oihw.shape[0]
    M, K = H * W, 9 * Cin
    TM = _pick_tile(M)

    patches = _im2col_3x3(x_nhwc).reshape(N, M, K).astype(jnp.bfloat16)
    w_mat = jnp.transpose(w_oihw, (2, 3, 1, 0)).reshape(K, Cout).astype(jnp.bfloat16)
    b2 = b.reshape(1, Cout).astype(jnp.float32)

    cost = pl.CostEstimate(
        flops=2 * N * M * K * Cout, transcendentals=0,
        bytes_accessed=patches.size * 2 + w_mat.size * 2 + b2.size * 4
        + N * M * Cout * jnp.dtype(out_dtype).itemsize)

    out = pl.pallas_call(
        _conv_relu_kernel,
        out_shape=jax.ShapeDtypeStruct((N, M, Cout), out_dtype),
        grid=(N, M // TM),
        in_specs=[
            pl.BlockSpec((1, TM, K), lambda n, m: (n, m, 0)),
            pl.BlockSpec((K, Cout), lambda n, m: (0, 0)),   # VMEM-resident weight
            pl.BlockSpec((1, Cout), lambda n, m: (0, 0)),   # VMEM-resident bias
        ],
        out_specs=pl.BlockSpec((1, TM, Cout), lambda n, m: (n, m, 0)),
        compiler_params=pltpu.CompilerParams(
            dimension_semantics=("parallel", "parallel"),
            vmem_limit_bytes=_vmem_limit_bytes()),
        cost_estimate=cost,
    )(patches, w_mat, b2)
    return out.reshape(N, H, W, Cout)


def conv3x3_relu_pool2x2(x_nhwc, w_oihw, b, out_dtype=jnp.bfloat16):
    """Fused 3x3 conv (stride 1, pad 1) + ReLU + 2x2/2 max-pool.

    im2col happens inside the kernel (9 shifted dots over a halo'd row tile);
    HBM only carries the padded activation (~1.1x) instead of 9x patches plus
    a window-position-major transpose.
    """
    N, H, W, Cin = x_nhwc.shape
    Cout = w_oihw.shape[0]
    Ho, Wo = H // 2, W // 2
    TH = _pick_row_tile(H, W)
    n_h = H // TH
    THo = TH // 2

    xp = jnp.pad(x_nhwc.astype(jnp.bfloat16),
                 ((0, 0), (1, 1), (1, 1), (0, 0)))           # (N, H+2, W+2, Cin)
    # Halo'd row tiles so a plain blocked BlockSpec can pipeline overlapping
    # input windows: tiles[n, t] = padded rows [t*TH, t*TH + TH + 2).
    if n_h == 1:
        tiles = xp[:, None]
    else:
        tiles = jnp.stack([xp[:, t * TH:t * TH + TH + 2] for t in range(n_h)],
                          axis=1)                             # (N, n_h, TH+2, W+2, Cin)
    w9 = jnp.transpose(w_oihw, (2, 3, 1, 0)).reshape(9, Cin, Cout).astype(jnp.bfloat16)
    b2 = b.reshape(1, Cout).astype(jnp.float32)

    cost = pl.CostEstimate(
        flops=2 * N * H * W * 9 * Cin * Cout, transcendentals=0,
        bytes_accessed=tiles.size * 2 + w9.size * 2 + b2.size * 4
        + N * Ho * Wo * Cout * jnp.dtype(out_dtype).itemsize)

    kernel = _make_conv_relu_pool_kernel(TH, W, Cin, Cout)

    out = pl.pallas_call(
        kernel,
        out_shape=jax.ShapeDtypeStruct((N, Ho * Wo, Cout), out_dtype),
        grid=(N, n_h),
        in_specs=[
            pl.BlockSpec((1, 1, TH + 2, W + 2, Cin),
                         lambda n, t: (n, t, 0, 0, 0)),
            # Constant index maps -> Pallas keeps these blocks resident; the
            # duplicated second buffer (<=576 KiB) is immaterial vs the budget,
            # so pl.Buffered(1) is not forced here.
            pl.BlockSpec((9, Cin, Cout), lambda n, t: (0, 0, 0)),
            pl.BlockSpec((1, Cout), lambda n, t: (0, 0)),
        ],
        out_specs=pl.BlockSpec((1, THo * Wo, Cout), lambda n, t: (n, t, 0)),
        compiler_params=pltpu.CompilerParams(
            dimension_semantics=("parallel", "parallel"),
            vmem_limit_bytes=_vmem_limit_bytes()),
        cost_estimate=cost,
    )(tiles, w9, b2)
    return out.reshape(N, Ho, Wo, Cout)


# ----------------------------------------------------------------------------
# Model: parameters + forward
# ----------------------------------------------------------------------------
def init_params(key):
    def conv_params(k, cout, cin):
        kw, kb = jax.random.split(k)
        fan_in = cin * 9
        w = jax.random.normal(kw, (cout, cin, 3, 3), jnp.float32) * (fan_in ** -0.5)
        b = jax.random.normal(kb, (cout,), jnp.float32) * 0.01
        return w, b

    k1, k2, k3 = jax.random.split(key, 3)
    w1, b1 = conv_params(k1, 64, 4)
    w2, b2 = conv_params(k2, 128, 64)
    w3, b3 = conv_params(k3, 256, 128)
    return dict(w1=w1, b1=b1, w2=w2, b2=b2, w3=w3, b3=b3)


@jax.jit
def lidar_backbone_forward(x_nchw, params):
    # PyTorch NCHW -> NHWC for the kernels
    x = jnp.transpose(x_nchw, (0, 2, 3, 1)).astype(jnp.float32)
    x = conv3x3_relu(x, params["w1"], params["b1"])                 # relu(conv1)
    x = conv3x3_relu_pool2x2(x, params["w2"], params["b2"])         # pool(relu(conv2))
    x = conv3x3_relu_pool2x2(x, params["w3"], params["b3"],
                             out_dtype=jnp.float32)                 # pool(relu(conv3))
    return jnp.transpose(x, (0, 3, 1, 2))                           # back to NCHW


# Pure-JAX f32 reference (NCHW, mirrors the PyTorch module) for a sanity check.
def reference_forward(x_nchw, params):
    def conv(x, w, b):
        y = jax.lax.conv_general_dilated(
            x, w, window_strides=(1, 1), padding=((1, 1), (1, 1)),
            dimension_numbers=("NCHW", "OIHW", "NCHW"),
            precision=jax.lax.Precision.HIGHEST,
        )
        return jax.nn.relu(y + b.reshape(1, -1, 1, 1))

    def pool(x):
        return jax.lax.reduce_window(
            x, -jnp.inf, jax.lax.max,
            window_dimensions=(1, 1, 2, 2), window_strides=(1, 1, 2, 2),
            padding="VALID",
        )

    x = conv(x_nchw, params["w1"], params["b1"])
    x = pool(conv(x, params["w2"], params["b2"]))
    x = pool(conv(x, params["w3"], params["b3"]))
    return x


if __name__ == "__main__":
    key = jax.random.PRNGKey(0)
    kx, kp = jax.random.split(key)

    x = jax.random.normal(kx, (2, 4, 16, 16), jnp.float32)   # NCHW, like PyTorch
    params = init_params(kp)

    out = lidar_backbone_forward(x, params)
    out = jax.block_until_ready(out)

    assert out.shape == (2, 256, 4, 4), out.shape
    ref = reference_forward(x, params)
    max_err = float(jnp.max(jnp.abs(out - ref)))
    # bf16 MXU inputs + bf16 intermediate activations vs an f32 HIGHEST reference.
    assert jnp.allclose(out, ref, rtol=5e-2, atol=5e-2), max_err

    print("KERNEL_OK")
</pallas_src>

<mosaic_0001>
module attributes {stable_mosaic.version = 11 : i64} {
  func.func @_conv_relu_kernel(%arg0: i32, %arg1: i32, %arg2: memref<1x256x36xbf16, #tpu.memory_space<vmem>>, %arg3: memref<36x64xbf16, #tpu.memory_space<vmem>>, %arg4: memref<1x64xf32, #tpu.memory_space<vmem>>, %arg5: memref<1x256x64xbf16, #tpu.memory_space<vmem>>) attributes {dimension_semantics = [#tpu.dimension_semantics<parallel>, #tpu.dimension_semantics<parallel>], iteration_bounds = array<i64: 2, 1>, scalar_prefetch = 0 : i64, scratch_operands = 0 : i64, tpu.core_type = #tpu.core_type<tc>, window_params = [{transform_indices = @transform_0, window_bounds = array<i64: 1, 256, 36>}, {pipeline_mode = #tpu.pipeline_mode<synchronous>, transform_indices = @transform_1, window_bounds = array<i64: 36, 64>}, {pipeline_mode = #tpu.pipeline_mode<synchronous>, transform_indices = @transform_2, window_bounds = array<i64: 1, 64>}, {transform_indices = @transform_3, window_bounds = array<i64: 1, 256, 64>}]} {
    %c0 = arith.constant 0 : index
    %c0_0 = arith.constant 0 : index
    %c0_1 = arith.constant 0 : index
    %0 = vector.load %arg2[%c0, %c0_0, %c0_1] : memref<1x256x36xbf16, #tpu.memory_space<vmem>>, vector<1x256x36xbf16>
    %1 = vector.shape_cast %0 : vector<1x256x36xbf16> to vector<256x36xbf16>
    %c0_2 = arith.constant 0 : index
    %c0_3 = arith.constant 0 : index
    %2 = vector.load %arg3[%c0_2, %c0_3] : memref<36x64xbf16, #tpu.memory_space<vmem>>, vector<36x64xbf16>
    %cst = arith.constant dense<0.000000e+00> : vector<256x64xf32>
    %3 = tpu.matmul %1, %2, %cst {dimension_numbers = #tpu.dot_dimension_numbers<[1], [0], [0], [1], [0, 0, 1, 1], [], []>} : vector<256x36xbf16>, vector<36x64xbf16>, vector<256x64xf32> -> vector<256x64xf32>
    %c0_4 = arith.constant 0 : index
    %c0_5 = arith.constant 0 : index
    %4 = vector.load %arg4[%c0_4, %c0_5] : memref<1x64xf32, #tpu.memory_space<vmem>>, vector<1x64xf32>
    %5 = vector.broadcast %4 : vector<1x64xf32> to vector<256x64xf32>
    %6 = arith.addf %3, %5 : vector<256x64xf32>
    %cst_6 = arith.constant 0.000000e+00 : f32
    %7 = vector.broadcast %cst_6 : f32 to vector<256x64xf32>
    %8 = arith.maximumf %6, %7 : vector<256x64xf32>
    %9 = arith.truncf %8 : vector<256x64xf32> to vector<256x64xbf16>
    %c0_7 = arith.constant 0 : index
    %c0_8 = arith.constant 0 : index
    %c0_9 = arith.constant 0 : index
    %10 = vector.load %arg5[%c0_7, %c0_8, %c0_9] : memref<1x256x64xbf16, #tpu.memory_space<vmem>>, vector<1x256x64xbf16>
    %11 = vector.shape_cast %10 : vector<1x256x64xbf16> to vector<256x64xbf16>
    %12 = vector.shape_cast %9 : vector<256x64xbf16> to vector<1x256x64xbf16>
    tpu.vector_store %arg5[%c0_7, %c0_8, %c0_9], %12 {strides = array<i32>} : memref<1x256x64xbf16, #tpu.memory_space<vmem>>, vector<1x256x64xbf16>,
    return
  }
  func.func @transform_0(%arg0: i32, %arg1: i32) -> (i32, i32, i32) {
    %c0_i32 = arith.constant 0 : i32
    %c0_i32_0 = arith.constant 0 : i32
    return %arg0, %arg1, %c0_i32 : i32, i32, i32
  }
  func.func @transform_1(%arg0: i32, %arg1: i32) -> (i32, i32) {
    %c0_i32 = arith.constant 0 : i32
    %c0_i32_0 = arith.constant 0 : i32
    %c0_i32_1 = arith.constant 0 : i32
    return %c0_i32, %c0_i32_0 : i32, i32
  }
  func.func @transform_2(%arg0: i32, %arg1: i32) -> (i32, i32) {
    %c0_i32 = arith.constant 0 : i32
    %c0_i32_0 = arith.constant 0 : i32
    %c0_i32_1 = arith.constant 0 : i32
    return %c0_i32, %c0_i32_0 : i32, i32
  }
  func.func @transform_3(%arg0: i32, %arg1: i32) -> (i32, i32, i32) {
    %c0_i32 = arith.constant 0 : i32
    %c0_i32_0 = arith.constant 0 : i32
    return %arg0, %arg1, %c0_i32 : i32, i32, i32
  }
}

module attributes {stable_mosaic.version = 11 : i64} {
  func.func @kernel(%arg0: i32, %arg1: i32, %arg2: memref<1x1x18x18x64xbf16, #tpu.memory_space<vmem>>, %arg3: memref<9x64x128xbf16, #tpu.memory_space<vmem>>, %arg4: memref<1x128xf32, #tpu.memory_space<vmem>>, %arg5: memref<1x64x128xbf16, #tpu.memory_space<vmem>>) attributes {dimension_semantics = [#tpu.dimension_semantics<parallel>, #tpu.dimension_semantics<parallel>], iteration_bounds = array<i64: 2, 1>, scalar_prefetch = 0 : i64, scratch_operands = 0 : i64, tpu.core_type = #tpu.core_type<tc>, window_params = [{transform_indices = @transform_0, window_bounds = array<i64: 1, 1, 18, 18, 64>}, {pipeline_mode = #tpu.pipeline_mode<synchronous>, transform_indices = @transform_1, window_bounds = array<i64: 9, 64, 128>}, {pipeline_mode = #tpu.pipeline_mode<synchronous>, transform_indices = @transform_2, window_bounds = array<i64: 1, 128>}, {transform_indices = @transform_3, window_bounds = array<i64: 1, 64, 128>}]} {
    %c0 = arith.constant 0 : index
    %c0_0 = arith.constant 0 : index
    %c0_1 = arith.constant 0 : index
    %c0_2 = arith.constant 0 : index
    %c0_3 = arith.constant 0 : index
    %0 = vector.load %arg2[%c0, %c0_0, %c0_1, %c0_2, %c0_3] : memref<1x1x18x18x64xbf16, #tpu.memory_space<vmem>>, vector<1x1x18x18x64xbf16>
    %1 = vector.shape_cast %0 : vector<1x1x18x18x64xbf16> to vector<18x18x64xbf16>
    %2 = vector.extract_strided_slice %1 {offsets = [0, 0, 0], sizes = [16, 18, 64], strides = [1, 1, 1]} : vector<18x18x64xbf16> to vector<16x18x64xbf16>
    %3 = vector.extract_strided_slice %2 {offsets = [0, 0, 0], sizes = [16, 16, 64], strides = [1, 1, 1]} : vector<16x18x64xbf16> to vector<16x16x64xbf16>
    %4 = vector.shape_cast %3 : vector<16x16x64xbf16> to vector<256x64xbf16>
    %c0_4 = arith.constant 0 : index
    %c0_5 = arith.constant 0 : index
    %c0_6 = arith.constant 0 : index
    %5 = vector.load %arg3[%c0_4, %c0_5, %c0_6] : memref<9x64x128xbf16, #tpu.memory_space<vmem>>, vector<1x64x128xbf16>
    %6 = vector.shape_cast %5 : vector<1x64x128xbf16> to vector<64x128xbf16>
    %cst = arith.constant dense<0.000000e+00> : vector<256x128xf32>
    %7 = tpu.matmul %4, %6, %cst {dimension_numbers = #tpu.dot_dimension_numbers<[1], [0], [0], [1], [0, 0, 1, 1], [], []>} : vector<256x64xbf16>, vector<64x128xbf16>, vector<256x128xf32> -> vector<256x128xf32>
    %8 = vector.extract_strided_slice %2 {offsets = [0, 1, 0], sizes = [16, 16, 64], strides = [1, 1, 1]} : vector<16x18x64xbf16> to vector<16x16x64xbf16>
    %9 = vector.shape_cast %8 : vector<16x16x64xbf16> to vector<256x64xbf16>
    %c1 = arith.constant 1 : index
    %c0_7 = arith.constant 0 : index
    %c0_8 = arith.constant 0 : index
    %10 = vector.load %arg3[%c1, %c0_7, %c0_8] : memref<9x64x128xbf16, #tpu.memory_space<vmem>>, vector<1x64x128xbf16>
    %11 = vector.shape_cast %10 : vector<1x64x128xbf16> to vector<64x128xbf16>
    %cst_9 = arith.constant dense<0.000000e+00> : vector<256x128xf32>
    %12 = tpu.matmul %9, %11, %cst_9 {dimension_numbers = #tpu.dot_dimension_numbers<[1], [0], [0], [1], [0, 0, 1, 1], [], []>} : vector<256x64xbf16>, vector<64x128xbf16>, vector<256x128xf32> -> vector<256x128xf32>
    %13 = arith.addf %7, %12 : vector<256x128xf32>
    %14 = vector.extract_strided_slice %2 {offsets = [0, 2, 0], sizes = [16, 16, 64], strides = [1, 1, 1]} : vector<16x18x64xbf16> to vector<16x16x64xbf16>
    %15 = vector.shape_cast %14 : vector<16x16x64xbf16> to vector<256x64xbf16>
    %c2 = arith.constant 2 : index
    %c0_10 = arith.constant 0 : index
    %c0_11 = arith.constant 0 : index
    %16 = vector.load %arg3[%c2, %c0_10, %c0_11] : memref<9x64x128xbf16, #tpu.memory_space<vmem>>, vector<1x64x128xbf16>
    %17 = vector.shape_cast %16 : vector<1x64x128xbf16> to vector<64x128xbf16>
    %cst_12 = arith.constant dense<0.000000e+00> : vector<256x128xf32>
    %18 = tpu.matmul %15, %17, %cst_12 {dimension_numbers = #tpu.dot_dimension_numbers<[1], [0], [0], [1], [0, 0, 1, 1], [], []>} : vector<256x64xbf16>, vector<64x128xbf16>, vector<256x128xf32> -> vector<256x128xf32>
    %19 = arith.addf %13, %18 : vector<256x128xf32>
    %20 = vector.extract_strided_slice %1 {offsets = [1, 0, 0], sizes = [16, 18, 64], strides = [1, 1, 1]} : vector<18x18x64xbf16> to vector<16x18x64xbf16>
    %21 = vector.extract_strided_slice %20 {offsets = [0, 0, 0], sizes = [16, 16, 64], strides = [1, 1, 1]} : vector<16x18x64xbf16> to vector<16x16x64xbf16>
    %22 = vector.shape_cast %21 : vector<16x16x64xbf16> to vector<256x64xbf16>
    %c3 = arith.constant 3 : index
    %c0_13 = arith.constant 0 : index
    %c0_14 = arith.constant 0 : index
    %23 = vector.load %arg3[%c3, %c0_13, %c0_14] : memref<9x64x128xbf16, #tpu.memory_space<vmem>>, vector<1x64x128xbf16>
    %24 = vector.shape_cast %23 : vector<1x64x128xbf16> to vector<64x128xbf16>
    %cst_15 = arith.constant dense<0.000000e+00> : vector<256x128xf32>
    %25 = tpu.matmul %22, %24, %cst_15 {dimension_numbers = #tpu.dot_dimension_numbers<[1], [0], [0], [1], [0, 0, 1, 1], [], []>} : vector<256x64xbf16>, vector<64x128xbf16>, vector<256x128xf32> -> vector<256x128xf32>
    %26 = arith.addf %19, %25 : vector<256x128xf32>
    %27 = vector.extract_strided_slice %20 {offsets = [0, 1, 0], sizes = [16, 16, 64], strides = [1, 1, 1]} : vector<16x18x64xbf16> to vector<16x16x64xbf16>
    %28 = vector.shape_cast %27 : vector<16x16x64xbf16> to vector<256x64xbf16>
    %c4 = arith.constant 4 : index
    %c0_16 = arith.constant 0 : index
    %c0_17 = arith.constant 0 : index
    %29 = vector.load %arg3[%c4, %c0_16, %c0_17] : memref<9x64x128xbf16, #tpu.memory_space<vmem>>, vector<1x64x128xbf16>
    %30 = vector.shape_cast %29 : vector<1x64x128xbf16> to vector<64x128xbf16>
    %cst_18 = arith.constant dense<0.000000e+00> : vector<256x128xf32>
    %31 = tpu.matmul %28, %30, %cst_18 {dimension_numbers = #tpu.dot_dimension_numbers<[1], [0], [0], [1], [0, 0, 1, 1], [], []>} : vector<256x64xbf16>, vector<64x128xbf16>, vector<256x128xf32> -> vector<256x128xf32>
    %32 = arith.addf %26, %31 : vector<256x128xf32>
    %33 = vector.extract_strided_slice %20 {offsets = [0, 2, 0], sizes = [16, 16, 64], strides = [1, 1, 1]} : vector<16x18x64xbf16> to vector<16x16x64xbf16>
    %34 = vector.shape_cast %33 : vector<16x16x64xbf16> to vector<256x64xbf16>
    %c5 = arith.constant 5 : index
    %c0_19 = arith.constant 0 : index
    %c0_20 = arith.constant 0 : index
    %35 = vector.load %arg3[%c5, %c0_19, %c0_20] : memref<9x64x128xbf16, #tpu.memory_space<vmem>>, vector<1x64x128xbf16>
    %36 = vector.shape_cast %35 : vector<1x64x128xbf16> to vector<64x128xbf16>
    %cst_21 = arith.constant dense<0.000000e+00> : vector<256x128xf32>
    %37 = tpu.matmul %34, %36, %cst_21 {dimension_numbers = #tpu.dot_dimension_numbers<[1], [0], [0], [1], [0, 0, 1, 1], [], []>} : vector<256x64xbf16>, vector<64x128xbf16>, vector<256x128xf32> -> vector<256x128xf32>
    %38 = arith.addf %32, %37 : vector<256x128xf32>
    %39 = vector.extract_strided_slice %1 {offsets = [2, 0, 0], sizes = [16, 18, 64], strides = [1, 1, 1]} : vector<18x18x64xbf16> to vector<16x18x64xbf16>
    %40 = vector.extract_strided_slice %39 {offsets = [0, 0, 0], sizes = [16, 16, 64], strides = [1, 1, 1]} : vector<16x18x64xbf16> to vector<16x16x64xbf16>
    %41 = vector.shape_cast %40 : vector<16x16x64xbf16> to vector<256x64xbf16>
    %c6 = arith.constant 6 : index
    %c0_22 = arith.constant 0 : index
    %c0_23 = arith.constant 0 : index
    %42 = vector.load %arg3[%c6, %c0_22, %c0_23] : memref<9x64x128xbf16, #tpu.memory_space<vmem>>, vector<1x64x128xbf16>
    %43 = vector.shape_cast %42 : vector<1x64x128xbf16> to vector<64x128xbf16>
    %cst_24 = arith.constant dense<0.000000e+00> : vector<256x128xf32>
    %44 = tpu.matmul %41, %43, %cst_24 {dimension_numbers = #tpu.dot_dimension_numbers<[1], [0], [0], [1], [0, 0, 1, 1], [], []>} : vector<256x64xbf16>, vector<64x128xbf16>, vector<256x128xf32> -> vector<256x128xf32>
    %45 = arith.addf %38, %44 : vector<256x128xf32>
    %46 = vector.extract_strided_slice %39 {offsets = [0, 1, 0], sizes = [16, 16, 64], strides = [1, 1, 1]} : vector<16x18x64xbf16> to vector<16x16x64xbf16>
    %47 = vector.shape_cast %46 : vector<16x16x64xbf16> to vector<256x64xbf16>
    %c7 = arith.constant 7 : index
    %c0_25 = arith.constant 0 : index
    %c0_26 = arith.constant 0 : index
    %48 = vector.load %arg3[%c7, %c0_25, %c0_26] : memref<9x64x128xbf16, #tpu.memory_space<vmem>>, vector<1x64x128xbf16>
    %49 = vector.shape_cast %48 : vector<1x64x128xbf16> to vector<64x128xbf16>
    %cst_27 = arith.constant dense<0.000000e+00> : vector<256x128xf32>
    %50 = tpu.matmul %47, %49, %cst_27 {dimension_numbers = #tpu.dot_dimension_numbers<[1], [0], [0], [1], [0, 0, 1, 1], [], []>} : vector<256x64xbf16>, vector<64x128xbf16>, vector<256x128xf32> -> vector<256x128xf32>
    %51 = arith.addf %45, %50 : vector<256x128xf32>
    %52 = vector.extract_strided_slice %39 {offsets = [0, 2, 0], sizes = [16, 16, 64], strides = [1, 1, 1]} : vector<16x18x64xbf16> to vector<16x16x64xbf16>
    %53 = vector.shape_cast %52 : vector<16x16x64xbf16> to vector<256x64xbf16>
    %c8 = arith.constant 8 : index
    %c0_28 = arith.constant 0 : index
    %c0_29 = arith.constant 0 : index
    %54 = vector.load %arg3[%c8, %c0_28, %c0_29] : memref<9x64x128xbf16, #tpu.memory_space<vmem>>, vector<1x64x128xbf16>
    %55 = vector.shape_cast %54 : vector<1x64x128xbf16> to vector<64x128xbf16>
    %cst_30 = arith.constant dense<0.000000e+00> : vector<256x128xf32>
    %56 = tpu.matmul %53, %55, %cst_30 {dimension_numbers = #tpu.dot_dimension_numbers<[1], [0], [0], [1], [0, 0, 1, 1], [], []>} : vector<256x64xbf16>, vector<64x128xbf16>, vector<256x128xf32> -> vector<256x128xf32>
    %57 = arith.addf %51, %56 : vector<256x128xf32>
    %58 = vector.shape_cast %57 : vector<256x128xf32> to vector<8x2x16x128xf32>
    %59 = vector.extract_strided_slice %58 {offsets = [0, 0, 0, 0], sizes = [8, 1, 16, 128], strides = [1, 1, 1, 1]} : vector<8x2x16x128xf32> to vector<8x1x16x128xf32>
    %60 = vector.shape_cast %59 : vector<8x1x16x128xf32> to vector<8x16x128xf32>
    %61 = vector.extract_strided_slice %58 {offsets = [0, 1, 0, 0], sizes = [8, 1, 16, 128], strides = [1, 1, 1, 1]} : vector<8x2x16x128xf32> to vector<8x1x16x128xf32>
    %62 = vector.shape_cast %61 : vector<8x1x16x128xf32> to vector<8x16x128xf32>
    %63 = arith.maximumf %60, %62 : vector<8x16x128xf32>
    %64 = vector.shape_cast %63 : vector<8x16x128xf32> to vector<8x8x2x128xf32>
    %65 = vector.extract_strided_slice %64 {offsets = [0, 0, 0, 0], sizes = [8, 8, 1, 128], strides = [1, 1, 1, 1]} : vector<8x8x2x128xf32> to vector<8x8x1x128xf32>
    %66 = vector.shape_cast %65 : vector<8x8x1x128xf32> to vector<8x8x128xf32>
    %67 = vector.extract_strided_slice %64 {offsets = [0, 0, 1, 0], sizes = [8, 8, 1, 128], strides = [1, 1, 1, 1]} : vector<8x8x2x128xf32> to vector<8x8x1x128xf32>
    %68 = vector.shape_cast %67 : vector<8x8x1x128xf32> to vector<8x8x128xf32>
    %69 = arith.maximumf %66, %68 : vector<8x8x128xf32>
    %70 = vector.shape_cast %69 : vector<8x8x128xf32> to vector<64x128xf32>
    %c0_31 = arith.constant 0 : index
    %c0_32 = arith.constant 0 : index
    %71 = vector.load %arg4[%c0_31, %c0_32] : memref<1x128xf32, #tpu.memory_space<vmem>>, vector<1x128xf32>
    %72 = vector.broadcast %71 : vector<1x128xf32> to vector<64x128xf32>
    %73 = arith.addf %70, %72 : vector<64x128xf32>
    %cst_33 = arith.constant 0.000000e+00 : f32
    %74 = vector.broadcast %cst_33 : f32 to vector<64x128xf32>
    %75 = arith.maximumf %73, %74 : vector<64x128xf32>
    %76 = arith.truncf %75 : vector<64x128xf32> to vector<64x128xbf16>
    %c0_34 = arith.constant 0 : index
    %c0_35 = arith.constant 0 : index
    %c0_36 = arith.constant 0 : index
    %77 = vector.load %arg5[%c0_34, %c0_35, %c0_36] : memref<1x64x128xbf16, #tpu.memory_space<vmem>>, vector<1x64x128xbf16>
    %78 = vector.shape_cast %77 : vector<1x64x128xbf16> to vector<64x128xbf16>
    %79 = vector.shape_cast %76 : vector<64x128xbf16> to vector<1x64x128xbf16>
    tpu.vector_store %arg5[%c0_34, %c0_35, %c0_36], %79 {strides = array<i32>} : memref<1x64x128xbf16, #tpu.memory_space<vmem>>, vector<1x64x128xbf16>,
    return
  }
  func.func @transform_0(%arg0: i32, %arg1: i32) -> (i32, i32, i32, i32, i32) {
    %c0_i32 = arith.constant 0 : i32
    %c0_i32_0 = arith.constant 0 : i32
    %c0_i32_1 = arith.constant 0 : i32
    %c0_i32_2 = arith.constant 0 : i32
    return %arg0, %arg1, %c0_i32, %c0_i32_0, %c0_i32_1 : i32, i32, i32, i32, i32
  }
  func.func @transform_1(%arg0: i32, %arg1: i32) -> (i32, i32, i32) {
    %c0_i32 = arith.constant 0 : i32
    %c0_i32_0 = arith.constant 0 : i32
    %c0_i32_1 = arith.constant 0 : i32
    %c0_i32_2 = arith.constant 0 : i32
    return %c0_i32, %c0_i32_0, %c0_i32_1 : i32, i32, i32
  }
  func.func @transform_2(%arg0: i32, %arg1: i32) -> (i32, i32) {
    %c0_i32 = arith.constant 0 : i32
    %c0_i32_0 = arith.constant 0 : i32
    %c0_i32_1 = arith.constant 0 : i32
    return %c0_i32, %c0_i32_0 : i32, i32
  }
  func.func @transform_3(%arg0: i32, %arg1: i32) -> (i32, i32, i32) {
    %c0_i32 = arith.constant 0 : i32
    %c0_i32_0 = arith.constant 0 : i32
    return %arg0, %arg1, %c0_i32 : i32, i32, i32
  }
}

module attributes {stable_mosaic.version = 11 : i64} {
  func.func @kernel(%arg0: i32, %arg1: i32, %arg2: memref<1x1x10x10x128xbf16, #tpu.memory_space<vmem>>, %arg3: memref<9x128x256xbf16, #tpu.memory_space<vmem>>, %arg4: memref<1x256xf32, #tpu.memory_space<vmem>>, %arg5: memref<1x16x256xf32, #tpu.memory_space<vmem>>) attributes {dimension_semantics = [#tpu.dimension_semantics<parallel>, #tpu.dimension_semantics<parallel>], iteration_bounds = array<i64: 2, 1>, scalar_prefetch = 0 : i64, scratch_operands = 0 : i64, tpu.core_type = #tpu.core_type<tc>, window_params = [{transform_indices = @transform_0, window_bounds = array<i64: 1, 1, 10, 10, 128>}, {pipeline_mode = #tpu.pipeline_mode<synchronous>, transform_indices = @transform_1, window_bounds = array<i64: 9, 128, 256>}, {pipeline_mode = #tpu.pipeline_mode<synchronous>, transform_indices = @transform_2, window_bounds = array<i64: 1, 256>}, {transform_indices = @transform_3, window_bounds = array<i64: 1, 16, 256>}]} {
    %c0 = arith.constant 0 : index
    %c0_0 = arith.constant 0 : index
    %c0_1 = arith.constant 0 : index
    %c0_2 = arith.constant 0 : index
    %c0_3 = arith.constant 0 : index
    %0 = vector.load %arg2[%c0, %c0_0, %c0_1, %c0_2, %c0_3] : memref<1x1x10x10x128xbf16, #tpu.memory_space<vmem>>, vector<1x1x10x10x128xbf16>
    %1 = vector.shape_cast %0 : vector<1x1x10x10x128xbf16> to vector<10x10x128xbf16>
    %2 = vector.extract_strided_slice %1 {offsets = [0, 0, 0], sizes = [8, 10, 128], strides = [1, 1, 1]} : vector<10x10x128xbf16> to vector<8x10x128xbf16>
    %3 = vector.extract_strided_slice %2 {offsets = [0, 0, 0], sizes = [8, 8, 128], strides = [1, 1, 1]} : vector<8x10x128xbf16> to vector<8x8x128xbf16>
    %4 = vector.shape_cast %3 : vector<8x8x128xbf16> to vector<64x128xbf16>
    %c0_4 = arith.constant 0 : index
    %c0_5 = arith.constant 0 : index
    %c0_6 = arith.constant 0 : index
    %5 = vector.load %arg3[%c0_4, %c0_5, %c0_6] : memref<9x128x256xbf16, #tpu.memory_space<vmem>>, vector<1x128x256xbf16>
    %6 = vector.shape_cast %5 : vector<1x128x256xbf16> to vector<128x256xbf16>
    %cst = arith.constant dense<0.000000e+00> : vector<64x256xf32>
    %7 = tpu.matmul %4, %6, %cst {dimension_numbers = #tpu.dot_dimension_numbers<[1], [0], [0], [1], [0, 0, 1, 1], [], []>} : vector<64x128xbf16>, vector<128x256xbf16>, vector<64x256xf32> -> vector<64x256xf32>
    %8 = vector.extract_strided_slice %2 {offsets = [0, 1, 0], sizes = [8, 8, 128], strides = [1, 1, 1]} : vector<8x10x128xbf16> to vector<8x8x128xbf16>
    %9 = vector.shape_cast %8 : vector<8x8x128xbf16> to vector<64x128xbf16>
    %c1 = arith.constant 1 : index
    %c0_7 = arith.constant 0 : index
    %c0_8 = arith.constant 0 : index
    %10 = vector.load %arg3[%c1, %c0_7, %c0_8] : memref<9x128x256xbf16, #tpu.memory_space<vmem>>, vector<1x128x256xbf16>
    %11 = vector.shape_cast %10 : vector<1x128x256xbf16> to vector<128x256xbf16>
    %cst_9 = arith.constant dense<0.000000e+00> : vector<64x256xf32>
    %12 = tpu.matmul %9, %11, %cst_9 {dimension_numbers = #tpu.dot_dimension_numbers<[1], [0], [0], [1], [0, 0, 1, 1], [], []>} : vector<64x128xbf16>, vector<128x256xbf16>, vector<64x256xf32> -> vector<64x256xf32>
    %13 = arith.addf %7, %12 : vector<64x256xf32>
    %14 = vector.extract_strided_slice %2 {offsets = [0, 2, 0], sizes = [8, 8, 128], strides = [1, 1, 1]} : vector<8x10x128xbf16> to vector<8x8x128xbf16>
    %15 = vector.shape_cast %14 : vector<8x8x128xbf16> to vector<64x128xbf16>
    %c2 = arith.constant 2 : index
    %c0_10 = arith.constant 0 : index
    %c0_11 = arith.constant 0 : index
    %16 = vector.load %arg3[%c2, %c0_10, %c0_11] : memref<9x128x256xbf16, #tpu.memory_space<vmem>>, vector<1x128x256xbf16>
    %17 = vector.shape_cast %16 : vector<1x128x256xbf16> to vector<128x256xbf16>
    %cst_12 = arith.constant dense<0.000000e+00> : vector<64x256xf32>
    %18 = tpu.matmul %15, %17, %cst_12 {dimension_numbers = #tpu.dot_dimension_numbers<[1], [0], [0], [1], [0, 0, 1, 1], [], []>} : vector<64x128xbf16>, vector<128x256xbf16>, vector<64x256xf32> -> vector<64x256xf32>
    %19 = arith.addf %13, %18 : vector<64x256xf32>
    %20 = vector.extract_strided_slice %1 {offsets = [1, 0, 0], sizes = [8, 10, 128], strides = [1, 1, 1]} : vector<10x10x128xbf16> to vector<8x10x128xbf16>
    %21 = vector.extract_strided_slice %20 {offsets = [0, 0, 0], sizes = [8, 8, 128], strides = [1, 1, 1]} : vector<8x10x128xbf16> to vector<8x8x128xbf16>
    %22 = vector.shape_cast %21 : vector<8x8x128xbf16> to vector<64x128xbf16>
    %c3 = arith.constant 3 : index
    %c0_13 = arith.constant 0 : index
    %c0_14 = arith.constant 0 : index
    %23 = vector.load %arg3[%c3, %c0_13, %c0_14] : memref<9x128x256xbf16, #tpu.memory_space<vmem>>, vector<1x128x256xbf16>
    %24 = vector.shape_cast %23 : vector<1x128x256xbf16> to vector<128x256xbf16>
    %cst_15 = arith.constant dense<0.000000e+00> : vector<64x256xf32>
    %25 = tpu.matmul %22, %24, %cst_15 {dimension_numbers = #tpu.dot_dimension_numbers<[1], [0], [0], [1], [0, 0, 1, 1], [], []>} : vector<64x128xbf16>, vector<128x256xbf16>, vector<64x256xf32> -> vector<64x256xf32>
    %26 = arith.addf %19, %25 : vector<64x256xf32>
    %27 = vector.extract_strided_slice %20 {offsets = [0, 1, 0], sizes = [8, 8, 128], strides = [1, 1, 1]} : vector<8x10x128xbf16> to vector<8x8x128xbf16>
    %28 = vector.shape_cast %27 : vector<8x8x128xbf16> to vector<64x128xbf16>
    %c4 = arith.constant 4 : index
    %c0_16 = arith.constant 0 : index
    %c0_17 = arith.constant 0 : index
    %29 = vector.load %arg3[%c4, %c0_16, %c0_17] : memref<9x128x256xbf16, #tpu.memory_space<vmem>>, vector<1x128x256xbf16>
    %30 = vector.shape_cast %29 : vector<1x128x256xbf16> to vector<128x256xbf16>
    %cst_18 = arith.constant dense<0.000000e+00> : vector<64x256xf32>
    %31 = tpu.matmul %28, %30, %cst_18 {dimension_numbers = #tpu.dot_dimension_numbers<[1], [0], [0], [1], [0, 0, 1, 1], [], []>} : vector<64x128xbf16>, vector<128x256xbf16>, vector<64x256xf32> -> vector<64x256xf32>
    %32 = arith.addf %26, %31 : vector<64x256xf32>
    %33 = vector.extract_strided_slice %20 {offsets = [0, 2, 0], sizes = [8, 8, 128], strides = [1, 1, 1]} : vector<8x10x128xbf16> to vector<8x8x128xbf16>
    %34 = vector.shape_cast %33 : vector<8x8x128xbf16> to vector<64x128xbf16>
    %c5 = arith.constant 5 : index
    %c0_19 = arith.constant 0 : index
    %c0_20 = arith.constant 0 : index
    %35 = vector.load %arg3[%c5, %c0_19, %c0_20] : memref<9x128x256xbf16, #tpu.memory_space<vmem>>, vector<1x128x256xbf16>
    %36 = vector.shape_cast %35 : vector<1x128x256xbf16> to vector<128x256xbf16>
    %cst_21 = arith.constant dense<0.000000e+00> : vector<64x256xf32>
    %37 = tpu.matmul %34, %36, %cst_21 {dimension_numbers = #tpu.dot_dimension_numbers<[1], [0], [0], [1], [0, 0, 1, 1], [], []>} : vector<64x128xbf16>, vector<128x256xbf16>, vector<64x256xf32> -> vector<64x256xf32>
    %38 = arith.addf %32, %37 : vector<64x256xf32>
    %39 = vector.extract_strided_slice %1 {offsets = [2, 0, 0], sizes = [8, 10, 128], strides = [1, 1, 1]} : vector<10x10x128xbf16> to vector<8x10x128xbf16>
    %40 = vector.extract_strided_slice %39 {offsets = [0, 0, 0], sizes = [8, 8, 128], strides = [1, 1, 1]} : vector<8x10x128xbf16> to vector<8x8x128xbf16>
    %41 = vector.shape_cast %40 : vector<8x8x128xbf16> to vector<64x128xbf16>
    %c6 = arith.constant 6 : index
    %c0_22 = arith.constant 0 : index
    %c0_23 = arith.constant 0 : index
    %42 = vector.load %arg3[%c6, %c0_22, %c0_23] : memref<9x128x256xbf16, #tpu.memory_space<vmem>>, vector<1x128x256xbf16>
    %43 = vector.shape_cast %42 : vector<1x128x256xbf16> to vector<128x256xbf16>
    %cst_24 = arith.constant dense<0.000000e+00> : vector<64x256xf32>
    %44 = tpu.matmul %41, %43, %cst_24 {dimension_numbers = #tpu.dot_dimension_numbers<[1], [0], [0], [1], [0, 0, 1, 1], [], []>} : vector<64x128xbf16>, vector<128x256xbf16>, vector<64x256xf32> -> vector<64x256xf32>
    %45 = arith.addf %38, %44 : vector<64x256xf32>
    %46 = vector.extract_strided_slice %39 {offsets = [0, 1, 0], sizes = [8, 8, 128], strides = [1, 1, 1]} : vector<8x10x128xbf16> to vector<8x8x128xbf16>
    %47 = vector.shape_cast %46 : vector<8x8x128xbf16> to vector<64x128xbf16>
    %c7 = arith.constant 7 : index
    %c0_25 = arith.constant 0 : index
    %c0_26 = arith.constant 0 : index
    %48 = vector.load %arg3[%c7, %c0_25, %c0_26] : memref<9x128x256xbf16, #tpu.memory_space<vmem>>, vector<1x128x256xbf16>
    %49 = vector.shape_cast %48 : vector<1x128x256xbf16> to vector<128x256xbf16>
    %cst_27 = arith.constant dense<0.000000e+00> : vector<64x256xf32>
    %50 = tpu.matmul %47, %49, %cst_27 {dimension_numbers = #tpu.dot_dimension_numbers<[1], [0], [0], [1], [0, 0, 1, 1], [], []>} : vector<64x128xbf16>, vector<128x256xbf16>, vector<64x256xf32> -> vector<64x256xf32>
    %51 = arith.addf %45, %50 : vector<64x256xf32>
    %52 = vector.extract_strided_slice %39 {offsets = [0, 2, 0], sizes = [8, 8, 128], strides = [1, 1, 1]} : vector<8x10x128xbf16> to vector<8x8x128xbf16>
    %53 = vector.shape_cast %52 : vector<8x8x128xbf16> to vector<64x128xbf16>
    %c8 = arith.constant 8 : index
    %c0_28 = arith.constant 0 : index
    %c0_29 = arith.constant 0 : index
    %54 = vector.load %arg3[%c8, %c0_28, %c0_29] : memref<9x128x256xbf16, #tpu.memory_space<vmem>>, vector<1x128x256xbf16>
    %55 = vector.shape_cast %54 : vector<1x128x256xbf16> to vector<128x256xbf16>
    %cst_30 = arith.constant dense<0.000000e+00> : vector<64x256xf32>
    %56 = tpu.matmul %53, %55, %cst_30 {dimension_numbers = #tpu.dot_dimension_numbers<[1], [0], [0], [1], [0, 0, 1, 1], [], []>} : vector<64x128xbf16>, vector<128x256xbf16>, vector<64x256xf32> -> vector<64x256xf32>
    %57 = arith.addf %51, %56 : vector<64x256xf32>
    %58 = vector.shape_cast %57 : vector<64x256xf32> to vector<4x2x8x256xf32>
    %59 = vector.extract_strided_slice %58 {offsets = [0, 0, 0, 0], sizes = [4, 1, 8, 256], strides = [1, 1, 1, 1]} : vector<4x2x8x256xf32> to vector<4x1x8x256xf32>
    %60 = vector.shape_cast %59 : vector<4x1x8x256xf32> to vector<4x8x256xf32>
    %61 = vector.extract_strided_slice %58 {offsets = [0, 1, 0, 0], sizes = [4, 1, 8, 256], strides = [1, 1, 1, 1]} : vector<4x2x8x256xf32> to vector<4x1x8x256xf32>
    %62 = vector.shape_cast %61 : vector<4x1x8x256xf32> to vector<4x8x256xf32>
    %63 = arith.maximumf %60, %62 : vector<4x8x256xf32>
    %64 = vector.shape_cast %63 : vector<4x8x256xf32> to vector<4x4x2x256xf32>
    %65 = vector.extract_strided_slice %64 {offsets = [0, 0, 0, 0], sizes = [4, 4, 1, 256], strides = [1, 1, 1, 1]} : vector<4x4x2x256xf32> to vector<4x4x1x256xf32>
    %66 = vector.shape_cast %65 : vector<4x4x1x256xf32> to vector<4x4x256xf32>
    %67 = vector.extract_strided_slice %64 {offsets = [0, 0, 1, 0], sizes = [4, 4, 1, 256], strides = [1, 1, 1, 1]} : vector<4x4x2x256xf32> to vector<4x4x1x256xf32>
    %68 = vector.shape_cast %67 : vector<4x4x1x256xf32> to vector<4x4x256xf32>
    %69 = arith.maximumf %66, %68 : vector<4x4x256xf32>
    %70 = vector.shape_cast %69 : vector<4x4x256xf32> to vector<16x256xf32>
    %c0_31 = arith.constant 0 : index
    %c0_32 = arith.constant 0 : index
    %71 = vector.load %arg4[%c0_31, %c0_32] : memref<1x256xf32, #tpu.memory_space<vmem>>, vector<1x256xf32>
    %72 = vector.broadcast %71 : vector<1x256xf32> to vector<16x256xf32>
    %73 = arith.addf %70, %72 : vector<16x256xf32>
    %cst_33 = arith.constant 0.000000e+00 : f32
    %74 = vector.broadcast %cst_33 : f32 to vector<16x256xf32>
    %75 = arith.maximumf %73, %74 : vector<16x256xf32>
    %c0_34 = arith.constant 0 : index
    %c0_35 = arith.constant 0 : index
    %c0_36 = arith.constant 0 : index
    %76 = vector.load %arg5[%c0_34, %c0_35, %c0_36] : memref<1x16x256xf32, #tpu.memory_space<vmem>>, vector<1x16x256xf32>
    %77 = vector.shape_cast %76 : vector<1x16x256xf32> to vector<16x256xf32>
    %78 = vector.shape_cast %75 : vector<16x256xf32> to vector<1x16x256xf32>
    tpu.vector_store %arg5[%c0_34, %c0_35, %c0_36], %78 {strides = array<i32>} : memref<1x16x256xf32, #tpu.memory_space<vmem>>, vector<1x16x256xf32>,
    return
  }
  func.func @transform_0(%arg0: i32, %arg1: i32) -> (i32, i32, i32, i32, i32) {
    %c0_i32 = arith.constant 0 : i32
    %c0_i32_0 = arith.constant 0 : i32
    %c0_i32_1 = arith.constant 0 : i32
    %c0_i32_2 = arith.constant 0 : i32
    return %arg0, %arg1, %c0_i32, %c0_i32_0, %c0_i32_1 : i32, i32, i32, i32, i32
  }
  func.func @transform_1(%arg0: i32, %arg1: i32) -> (i32, i32, i32) {
    %c0_i32 = arith.constant 0 : i32
    %c0_i32_0 = arith.constant 0 : i32
    %c0_i32_1 = arith.constant 0 : i32
    %c0_i32_2 = arith.constant 0 : i32
    return %c0_i32, %c0_i32_0, %c0_i32_1 : i32, i32, i32
  }
  func.func @transform_2(%arg0: i32, %arg1: i32) -> (i32, i32) {
    %c0_i32 = arith.constant 0 : i32
    %c0_i32_0 = arith.constant 0 : i32
    %c0_i32_1 = arith.constant 0 : i32
    return %c0_i32, %c0_i32_0 : i32, i32
  }
  func.func @transform_3(%arg0: i32, %arg1: i32) -> (i32, i32, i32) {
    %c0_i32 = arith.constant 0 : i32
    %c0_i32_0 = arith.constant 0 : i32
    return %arg0, %arg1, %c0_i32 : i32, i32, i32
  }
}

</mosaic_0001>

<bundles_post_ra>
// kernel: lidar_backbone_forward.3
= control target key start
LH: loop header
LB: loop body
LE: loop exit
PB: predicated region body
PF: predicated region fallthrough
CT: control target
= control target key end

     0   :  { %s1109_s12 = smov 0   ;;  %s1111_s13 = smov 0   ;;  %s1295_s0 = inlined_call_operand.vmem [shape: bf16[2,256,36], index: 0, kind: input, shape index: {}]   ;;  %s1296_s1 = inlined_call_operand.vmem [shape: bf16[36,64], index: 1, kind: input, shape index: {}]   ;;  %s1297_s2 = inlined_call_operand.vmem [shape: f32[1,64], index: 2, kind: input, shape index: {}]   ;;  %s1298_s3 = inlined_call_operand.vmem [shape: bf16[2,256,64], index: 3, kind: output, shape index: {}]  }
   0x1   :  { %s1113_s14 = smov 0  }
   0x2 LB: > { %s25_s15 = sadd.s32 1, %s1083_s13  ;;  %p848_p0 = scmp.ge.s32.totalorder %s1087_s14, 1  ;;  %s1087_s14 = sphi %s1113_s14, %s13_s14   ;;  %s1083_s13 = sphi %s1111_s13, %s1300_s13   ;;  %s1079_s12 = sphi %s1109_s12, %s1299_s12  }
   0x3   : > { %p27_p1 = scmp.ge.s32.totalorder %s25_s15, 2  ;;  %p158_p2 = scmp.lt.s32.totalorder %s1087_s14, 3 }
   0x5   : > { %s1302_s15 = smov (%p27_p1, %s25_s15), 0  ;;  %p159_p3 = pnand %p848_p0, %p158_p2 }
   0x6   : > { %v1046_v0 = vld [vmem:[%s1296_s1] sm:$0xff] (!%p159_p3)   ;;  %v1047_v1 = vld [vmem:[%s1296_s1 + $0x8] sm:$0xff] (!%p159_p3)   ;;  %p191_p4 = scmp.lt.s32.totalorder (!%p159_p3), %s1079_s12, 1  ;;  %v1048_v2 = vld [vmem:[%s1296_s1 + $0x10] ss:$0 sps:$4 sm:$0x33] (!%p159_p3)  }
   0x7   : > { %162 = sbr.rel (%p159_p3) target bundleno = 266 (0x10a), region = 32  ;;  %976 = vmatprep.subr.bf16.mxu0 (!%p159_p3), %v1046_v0  ;;  %1014 = vmatprep.subr.bf16.mxu1 (!%p159_p3), %v1046_v0  ;;  %vm399_vm0 = vcmask (!%p159_p3), 1041408   ;;  %vm350_vm1 = vcmask (!%p159_p3), 293888   ;;  %v1181_v20 = vld [vmem:[%s1297_s2] ss:$0 sm:$0xff] (!%p159_p3)  ;;  %vm724_vm2 = vcmask (!%p159_p3), 519168  }
   0x8   : > { %977 = vmatpush3.bf16.msra.mxu0 (!%p159_p3), %v1046_v0  ;;  %1017 = vmatpush3.bf16.msra.mxu1 (!%p159_p3), %v1046_v0  ;;  %v401_v4 = vsel (!%p159_p3), %vm399_vm0, %v1048_v2, 0 }
   0x9   : > { %978 = vmatprep.subr.bf16.mxu0 (!%p159_p3), %v1047_v1  ;;  %1015 = vmatprep.subr.bf16.mxu1 (!%p159_p3), %v1047_v1 }
   0xc   : > { %979 = vmatpush3.bf16.msra.mxu0 (!%p159_p3), %v1047_v1  ;;  %1018 = vmatpush3.bf16.msra.mxu1 (!%p159_p3), %v1047_v1 }
   0xd   : > { %1020 = vmatprep.subr.msk.bf16.mxu0 (!%p159_p3), %vm399_vm0, %v1048_v2  ;;  %1021 = vmatprep.subr.msk.bf16.mxu1 (!%p159_p3), %vm399_vm0, %v1048_v2 }
   0xe   : > { %s1304_s12 = smov (!%p191_p4, %s1079_s12), 1 }
   0xf   : > { %s923_s22 = sshll.u32 %s1304_s12, 7 }
  0x10   : > { %s1144_s25 = scalar_lea.vmem %s1295_s0, %s923_s22  ;;  %981 = vmatpush3.bf16.msra.mxu0 %v401_v4  ;;  %1019 = vmatpush3.bf16.msra.mxu1 %v401_v4  ;;  %s1194_s30 = scalar_lea.vmem %s1298_s3, %s923_s22 }
  0x11   : > { %v1049_v3 = vld [vmem:[%s1144_s25] sm:$0xff]   ;;  %v1051_v6 = vld [vmem:[%s1144_s25 + $0x8] sm:$0xff]   ;;  %v1053_v8 = vld [vmem:[%s1144_s25 + $0x10] sm:$0xff]  }
  0x12   : > { %v1050_v5 = vld [vmem:[%s1144_s25 + $0x40] sm:$0xff]   ;;  %982 = vmatprep.mubr.msk.bf16.mxu0 %vm350_vm1, %v1049_v3  ;;  %v1052_v7 = vld [vmem:[%s1144_s25 + $0x48] sm:$0xff]   ;;  %v1054_v9 = vld [vmem:[%s1144_s25 + $0x50] sm:$0xff]  }
  0x13   : > { %998 = vmatprep.mubr.msk.bf16.mxu1 %vm350_vm1, %v1050_v5  ;;  %983 = vmatmul.mubr.msk.bf16.vlgmr.msra.gmra.mrb[0].mxu0 %vm350_vm1, %v1051_v6  ;;  %v1055_v10 = vld [vmem:[%s1144_s25 + $0x18] sm:$0xff]   ;;  %v1057_v12 = vld [vmem:[%s1144_s25 + $0x20] sm:$0xff]   ;;  %v1059_v14 = vld [vmem:[%s1144_s25 + $0x28] sm:$0xff]  }
  0x14   : > { %999 = vmatmul.mubr.msk.bf16.vlgmr.msra.gmra.mrb[0].mxu1 %vm350_vm1, %v1052_v7  ;;  %986 = vmatprep.mubr.msk.bf16.mxu0 %vm350_vm1, %v1053_v8  ;;  %v1056_v11 = vld [vmem:[%s1144_s25 + $0x58] sm:$0xff]   ;;  %v1058_v13 = vld [vmem:[%s1144_s25 + $0x60] sm:$0xff]   ;;  %v1060_v15 = vld [vmem:[%s1144_s25 + $0x68] sm:$0xff]  }
  0x15   : > { %1002 = vmatprep.mubr.msk.bf16.mxu1 %vm350_vm1, %v1054_v9  ;;  %v1061_v16 = vld [vmem:[%s1144_s25 + $0x30] sm:$0xff]   ;;  %v1063_v18 = vld [vmem:[%s1144_s25 + $0x38] sm:$0xff]  }
  0x16   : > { %v1062_v17 = vld [vmem:[%s1144_s25 + $0x70] sm:$0xff]   ;;  %v1064_v19 = vld [vmem:[%s1144_s25 + $0x78] sm:$0xff]  }
  0x1b   : > { %987 = vmatmul.mubr.msk.bf16.gmra.mrb[4].mxu0 %vm350_vm1, %v1055_v10 }
  0x1c   : > { %1003 = vmatmul.mubr.msk.bf16.gmra.mrb[4].mxu1 %vm350_vm1, %v1056_v11  ;;  %990 = vmatprep.mubr.msk.bf16.mxu0 %vm350_vm1, %v1057_v12 }
  0x1d   : > { %1006 = vmatprep.mubr.msk.bf16.mxu1 %vm350_vm1, %v1058_v13 }
  0x23   : > { %991 = vmatmul.mubr.msk.bf16.gmra.mrb[8].mxu0 %vm350_vm1, %v1059_v14 }
  0x24   : > { %1007 = vmatmul.mubr.msk.bf16.gmra.mrb[8].mxu1 %vm350_vm1, %v1060_v15  ;;  %994 = vmatprep.mubr.msk.bf16.mxu0 %vm350_vm1, %v1061_v16 }
  0x25   : > { %1010 = vmatprep.mubr.msk.bf16.mxu1 %vm350_vm1, %v1062_v17 }
  0x2b   : > { %995 = vmatmul.mubr.msk.bf16.gmra.mrb[12].mxu0 %vm350_vm1, %v1063_v18 }
  0x2c   : > { %1011 = vmatmul.mubr.msk.bf16.gmra.mrb[12].mxu1 %vm350_vm1, %v1064_v19 }
  0xe6   : > { %v984_v21 = vpop.f32.mrb[0].mxu0 }
  0xe7   : > { %v1000_v22 = vpop.f32.mrb[0].mxu1  ;;  %v446_v23 = vadd.f32 %v984_v21, %v1181_v20  ;;  %v437_v25 = vpop.f32.mrb[1].mxu0 }
  0xe8   : > { %v510_v24 = vadd.f32 %v1000_v22, %v1181_v20  ;;  %v501_v26 = vpop.f32.mrb[1].mxu1  ;;  %v438_v27 = vadd.f32 %v1181_v20, %v437_v25  ;;  %v985_v29 = vpop.f32.mrb[2].mxu0 }
  0xe9   : > { %v502_v28 = vadd.f32 %v1181_v20, %v501_v26  ;;  %v1001_v30 = vpop.f32.mrb[2].mxu1  ;;  %v566_v31 = vmax.f32 %v446_v23, 0.0  ;;  %v449_v33 = vadd.f32 %v985_v29, %v1181_v20  ;;  %v440_v35 = vpop.f32.mrb[3].mxu0 }
  0xea   : > { %v582_v32 = vmax.f32 %v510_v24, 0.0  ;;  %v513_v34 = vadd.f32 %v1001_v30, %v1181_v20  ;;  %v504_v36 = vpop.f32.mrb[3].mxu1  ;;  %v564_v37 = vmax.f32 %v438_v27, 0.0  ;;  %v441_v39 = vadd.f32 %v1181_v20, %v440_v35 }
  0xeb   : > { %v580_v38 = vmax.f32 %v502_v28, 0.0  ;;  %v505_v40 = vadd.f32 %v1181_v20, %v504_v36  ;;  %v927_v41 = vpack.c.bf16 %v566_v31, %v566_v31  ;;  %v567_v43 = vmax.f32 %v449_v33, 0.0 }
  0xec   : > { %v943_v42 = vpack.c.bf16 %v582_v32, %v582_v32  ;;  %v583_v44 = vmax.f32 %v513_v34, 0.0  ;;  %v925_v45 = vpack.c.bf16 %v564_v37, %v564_v37  ;;  %v565_v47 = vmax.f32 %v441_v39, 0.0 }
  0xed   : > { %v941_v46 = vpack.c.bf16 %v580_v38, %v580_v38  ;;  %v581_v48 = vmax.f32 %v505_v40, 0.0  ;;  %727 = vst.msk [vmem:[%s1194_s30 + $0x8] sm:$0xf] %vm724_vm2, %v927_v41  ;;  %v928_v49 = vpack.c.bf16 %v567_v43, %v567_v43 }
  0xee   : > { %743 = vst.msk [vmem:[%s1194_s30 + $0x48] sm:$0xf] %vm724_vm2, %v943_v42  ;;  %v944_v50 = vpack.c.bf16 %v583_v44, %v583_v44  ;;  %725 = vst.msk [vmem:[%s1194_s30] sm:$0xf] %vm724_vm2, %v925_v45  ;;  %v926_v51 = vpack.c.bf16 %v565_v47, %v565_v47  ;;  %v988_v53 = vpop.f32.mrb[4].mxu0 }
  0xef   : > { %741 = vst.msk [vmem:[%s1194_s30 + $0x40] sm:$0xf] %vm724_vm2, %v941_v46  ;;  %v942_v52 = vpack.c.bf16 %v581_v48, %v581_v48  ;;  %v1004_v54 = vpop.f32.mrb[4].mxu1  ;;  %728 = vst.msk [vmem:[%s1194_s30 + $0xc] sm:$0xf] %vm724_vm2, %v928_v49  ;;  %v462_v55 = vadd.f32 %v988_v53, %v1181_v20  ;;  %v453_v57 = vpop.f32.mrb[5].mxu0 }
  0xf0   : > { %744 = vst.msk [vmem:[%s1194_s30 + $0x4c] sm:$0xf] %vm724_vm2, %v944_v50  ;;  %v526_v56 = vadd.f32 %v1004_v54, %v1181_v20  ;;  %v517_v58 = vpop.f32.mrb[5].mxu1  ;;  %726 = vst.msk [vmem:[%s1194_s30 + $0x4] sm:$0xf] %vm724_vm2, %v926_v51  ;;  %v454_v59 = vadd.f32 %v1181_v20, %v453_v57  ;;  %v989_v61 = vpop.f32.mrb[6].mxu0 }
  0xf1   : > { %742 = vst.msk [vmem:[%s1194_s30 + $0x44] sm:$0xf] %vm724_vm2, %v942_v52  ;;  %v518_v60 = vadd.f32 %v1181_v20, %v517_v58  ;;  %v1005_v62 = vpop.f32.mrb[6].mxu1  ;;  %v570_v63 = vmax.f32 %v462_v55, 0.0  ;;  %v465_v1 = vadd.f32 %v989_v61, %v1181_v20  ;;  %v456_v3 = vpop.f32.mrb[7].mxu0 }
  0xf2   : > { %v586_v0 = vmax.f32 %v526_v56, 0.0  ;;  %v529_v2 = vadd.f32 %v1005_v62, %v1181_v20  ;;  %v520_v4 = vpop.f32.mrb[7].mxu1  ;;  %v568_v5 = vmax.f32 %v454_v59, 0.0  ;;  %v457_v7 = vadd.f32 %v1181_v20, %v456_v3 }
  0xf3   : > { %v584_v6 = vmax.f32 %v518_v60, 0.0  ;;  %v521_v8 = vadd.f32 %v1181_v20, %v520_v4  ;;  %v931_v9 = vpack.c.bf16 %v570_v63, %v570_v63  ;;  %v571_v11 = vmax.f32 %v465_v1, 0.0 }
  0xf4   : > { %v947_v10 = vpack.c.bf16 %v586_v0, %v586_v0  ;;  %v587_v12 = vmax.f32 %v529_v2, 0.0  ;;  %v929_v13 = vpack.c.bf16 %v568_v5, %v568_v5  ;;  %v569_v15 = vmax.f32 %v457_v7, 0.0 }
  0xf5   : > { %v945_v14 = vpack.c.bf16 %v584_v6, %v584_v6  ;;  %v585_v16 = vmax.f32 %v521_v8, 0.0  ;;  %731 = vst.msk [vmem:[%s1194_s30 + $0x18] sm:$0xf] %vm724_vm2, %v931_v9  ;;  %v932_v17 = vpack.c.bf16 %v571_v11, %v571_v11 }
  0xf6   : > { %747 = vst.msk [vmem:[%s1194_s30 + $0x58] sm:$0xf] %vm724_vm2, %v947_v10  ;;  %v948_v18 = vpack.c.bf16 %v587_v12, %v587_v12  ;;  %729 = vst.msk [vmem:[%s1194_s30 + $0x10] sm:$0xf] %vm724_vm2, %v929_v13  ;;  %v930_v19 = vpack.c.bf16 %v569_v15, %v569_v15  ;;  %v992_v22 = vpop.f32.mrb[8].mxu0 }
  0xf7   : > { %745 = vst.msk [vmem:[%s1194_s30 + $0x50] sm:$0xf] %vm724_vm2, %v945_v14  ;;  %v946_v21 = vpack.c.bf16 %v585_v16, %v585_v16  ;;  %v1008_v23 = vpop.f32.mrb[8].mxu1  ;;  %732 = vst.msk [vmem:[%s1194_s30 + $0x1c] sm:$0xf] %vm724_vm2, %v932_v17  ;;  %v478_v24 = vadd.f32 %v992_v22, %v1181_v20  ;;  %v469_v26 = vpop.f32.mrb[9].mxu0 }
  0xf8   : > { %748 = vst.msk [vmem:[%s1194_s30 + $0x5c] sm:$0xf] %vm724_vm2, %v948_v18  ;;  %v542_v25 = vadd.f32 %v1008_v23, %v1181_v20  ;;  %v533_v27 = vpop.f32.mrb[9].mxu1  ;;  %730 = vst.msk [vmem:[%s1194_s30 + $0x14] sm:$0xf] %vm724_vm2, %v930_v19  ;;  %v470_v28 = vadd.f32 %v1181_v20, %v469_v26  ;;  %v993_v30 = vpop.f32.mrb[10].mxu0 }
  0xf9   : > { %746 = vst.msk [vmem:[%s1194_s30 + $0x54] sm:$0xf] %vm724_vm2, %v946_v21  ;;  %v534_v29 = vadd.f32 %v1181_v20, %v533_v27  ;;  %v1009_v31 = vpop.f32.mrb[10].mxu1  ;;  %v574_v32 = vmax.f32 %v478_v24, 0.0  ;;  %v481_v34 = vadd.f32 %v993_v30, %v1181_v20  ;;  %v472_v36 = vpop.f32.mrb[11].mxu0 }
  0xfa   : > { %v590_v33 = vmax.f32 %v542_v25, 0.0  ;;  %v545_v35 = vadd.f32 %v1009_v31, %v1181_v20  ;;  %v536_v37 = vpop.f32.mrb[11].mxu1  ;;  %v572_v38 = vmax.f32 %v470_v28, 0.0  ;;  %v473_v40 = vadd.f32 %v1181_v20, %v472_v36 }
  0xfb   : > { %v588_v39 = vmax.f32 %v534_v29, 0.0  ;;  %v537_v41 = vadd.f32 %v1181_v20, %v536_v37  ;;  %v935_v42 = vpack.c.bf16 %v574_v32, %v574_v32  ;;  %v575_v44 = vmax.f32 %v481_v34, 0.0 }
  0xfc   : > { %v951_v43 = vpack.c.bf16 %v590_v33, %v590_v33  ;;  %v591_v45 = vmax.f32 %v545_v35, 0.0  ;;  %v933_v46 = vpack.c.bf16 %v572_v38, %v572_v38  ;;  %v573_v48 = vmax.f32 %v473_v40, 0.0 }
  0xfd   : > { %v949_v47 = vpack.c.bf16 %v588_v39, %v588_v39  ;;  %v589_v49 = vmax.f32 %v537_v41, 0.0  ;;  %735 = vst.msk [vmem:[%s1194_s30 + $0x28] sm:$0xf] %vm724_vm2, %v935_v42  ;;  %v936_v50 = vpack.c.bf16 %v575_v44, %v575_v44 }
  0xfe   : > { %751 = vst.msk [vmem:[%s1194_s30 + $0x68] sm:$0xf] %vm724_vm2, %v951_v43  ;;  %v952_v51 = vpack.c.bf16 %v591_v45, %v591_v45  ;;  %733 = vst.msk [vmem:[%s1194_s30 + $0x20] sm:$0xf] %vm724_vm2, %v933_v46  ;;  %v934_v52 = vpack.c.bf16 %v573_v48, %v573_v48  ;;  %v996_v54 = vpop.f32.mrb[12].mxu0 }
  0xff   : > { %749 = vst.msk [vmem:[%s1194_s30 + $0x60] sm:$0xf] %vm724_vm2, %v949_v47  ;;  %v950_v53 = vpack.c.bf16 %v589_v49, %v589_v49  ;;  %v1012_v55 = vpop.f32.mrb[12].mxu1  ;;  %736 = vst.msk [vmem:[%s1194_s30 + $0x2c] sm:$0xf] %vm724_vm2, %v936_v50  ;;  %v494_v56 = vadd.f32 %v996_v54, %v1181_v20  ;;  %v485_v58 = vpop.f32.mrb[13].mxu0 }
 0x100   : > { %752 = vst.msk [vmem:[%s1194_s30 + $0x6c] sm:$0xf] %vm724_vm2, %v952_v51  ;;  %v558_v57 = vadd.f32 %v1012_v55, %v1181_v20  ;;  %v549_v59 = vpop.f32.mrb[13].mxu1  ;;  %734 = vst.msk [vmem:[%s1194_s30 + $0x24] sm:$0xf] %vm724_vm2, %v934_v52  ;;  %v486_v60 = vadd.f32 %v1181_v20, %v485_v58  ;;  %v997_v62 = vpop.f32.mrb[14].mxu0 }
 0x101   : > { %750 = vst.msk [vmem:[%s1194_s30 + $0x64] sm:$0xf] %vm724_vm2, %v950_v53  ;;  %v550_v61 = vadd.f32 %v1181_v20, %v549_v59  ;;  %v1013_v63 = vpop.f32.mrb[14].mxu1  ;;  %v578_v0 = vmax.f32 %v494_v56, 0.0  ;;  %v497_v2 = vadd.f32 %v997_v62, %v1181_v20  ;;  %v488_v4 = vpop.f32.mrb[15].mxu0 }
 0x102   : > { %v594_v1 = vmax.f32 %v558_v57, 0.0  ;;  %v561_v3 = vadd.f32 %v1013_v63, %v1181_v20  ;;  %v552_v5 = vpop.f32.mrb[15].mxu1  ;;  %v576_v6 = vmax.f32 %v486_v60, 0.0  ;;  %v489_v8 = vadd.f32 %v1181_v20, %v488_v4 }
 0x103   : > { %v592_v7 = vmax.f32 %v550_v61, 0.0  ;;  %v553_v9 = vadd.f32 %v1181_v20, %v552_v5  ;;  %v939_v10 = vpack.c.bf16 %v578_v0, %v578_v0  ;;  %v579_v12 = vmax.f32 %v497_v2, 0.0 }
 0x104   : > { %v955_v11 = vpack.c.bf16 %v594_v1, %v594_v1  ;;  %v595_v13 = vmax.f32 %v561_v3, 0.0  ;;  %v937_v14 = vpack.c.bf16 %v576_v6, %v576_v6  ;;  %v577_v16 = vmax.f32 %v489_v8, 0.0 }
 0x105   : > { %v953_v15 = vpack.c.bf16 %v592_v7, %v592_v7  ;;  %v593_v17 = vmax.f32 %v553_v9, 0.0  ;;  %739 = vst.msk [vmem:[%s1194_s30 + $0x38] sm:$0xf] %vm724_vm2, %v939_v10  ;;  %v940_v18 = vpack.c.bf16 %v579_v12, %v579_v12 }
 0x106   : > { %755 = vst.msk [vmem:[%s1194_s30 + $0x78] sm:$0xf] %vm724_vm2, %v955_v11  ;;  %v956_v19 = vpack.c.bf16 %v595_v13, %v595_v13  ;;  %737 = vst.msk [vmem:[%s1194_s30 + $0x30] sm:$0xf] %vm724_vm2, %v937_v14  ;;  %v938_v20 = vpack.c.bf16 %v577_v16, %v577_v16 }
 0x107   : > { %753 = vst.msk [vmem:[%s1194_s30 + $0x70] sm:$0xf] %vm724_vm2, %v953_v15  ;;  %v954_v21 = vpack.c.bf16 %v593_v17, %v593_v17  ;;  %740 = vst.msk [vmem:[%s1194_s30 + $0x3c] sm:$0xf] %vm724_vm2, %v940_v18 }
 0x108   : > { %756 = vst.msk [vmem:[%s1194_s30 + $0x7c] sm:$0xf] %vm724_vm2, %v956_v19  ;;  %738 = vst.msk [vmem:[%s1194_s30 + $0x34] sm:$0xf] %vm724_vm2, %v938_v20 }
 0x109   : > { %754 = vst.msk [vmem:[%s1194_s30 + $0x74] sm:$0xf] %vm724_vm2, %v954_v21 }
 0x10a PF: > { %s13_s14 = sadd.s32 1, %s1087_s14   ;;  %s1299_s12 = smov %s1083_s13 }
 0x10b   : > { %p10_p5 = scmp.ge.s32.totalorder %s13_s14, 4   ;;  %s1300_s13 = smov %s1302_s15 }
 0x10d   :  { %12 = sbr.rel (!%p10_p5) target bundleno = 2 (0x2), region = 62 }

// kernel: lidar_backbone_forward.4
= control target key start
LH: loop header
LB: loop body
LE: loop exit
PB: predicated region body
PF: predicated region fallthrough
CT: control target
= control target key end

     0   :  { %s5971_s12 = smov 0   ;;  %s5973_s13 = smov 0   ;;  %s7385_s0 = inlined_call_operand.vmem [shape: bf16[2,1,18,18,64], index: 0, kind: input, shape index: {}]   ;;  %s7386_s1 = inlined_call_operand.vmem [shape: bf16[9,64,128], index: 1, kind: input, shape index: {}]   ;;  %s7387_s2 = inlined_call_operand.vmem [shape: f32[1,128], index: 2, kind: input, shape index: {}]   ;;  %s7388_s3 = inlined_call_operand.vmem [shape: bf16[2,64,128], index: 3, kind: output, shape index: {}]  }
   0x1   :  { %s5975_s14 = smov 0  }
   0x2 LB: > { %s25_s15 = sadd.s32 1, %s5944_s13  ;;  %p4519_p0 = scmp.ge.s32.totalorder %s5948_s14, 1  ;;  %s5948_s14 = sphi %s5975_s14, %s13_s14   ;;  %s5944_s13 = sphi %s5973_s13, %s7478_s13   ;;  %s5940_s12 = sphi %s5971_s12, %s7477_s12  }
   0x3   : > { %p27_p1 = scmp.ge.s32.totalorder %s25_s15, 2  ;;  %p157_p2 = scmp.lt.s32.totalorder %s5948_s14, 3 }
   0x5   : > { %s7480_s15 = smov (%p27_p1, %s25_s15), 0  ;;  %p158_p3 = pnand %p4519_p0, %p157_p2 }
   0x7   : > { %161 = sbr.rel (%p158_p3) target bundleno = 662 (0x296), region = 32 }
   0xe   : > { %v5865_v0 = vld [vmem:[%s7386_s1 + $0x20] sm:$0xff]   ;;  %p189_p4 = scmp.lt.s32.totalorder %s5940_s12, 1  ;;  %v5867_v2 = vld [vmem:[%s7386_s1 + $0x28] sm:$0xff]   ;;  %v5869_v4 = vld [vmem:[%s7386_s1 + $0x30] sm:$0xff]   ;;  %vm271_vm0 = vsmask.f32 3328 }
   0xf   : > { %v5866_v1 = vld [vmem:[%s7386_s1 + $0x80] sm:$0xff]   ;;  %5215 = vmatprep.subr.bf16.mxu1 %v5865_v0  ;;  %v5868_v3 = vld [vmem:[%s7386_s1 + $0x88] sm:$0xff]   ;;  %v5870_v5 = vld [vmem:[%s7386_s1 + $0x90] sm:$0xff]   ;;  %vm272_vm1 = vsmask.f32 7440  ;;  %vm739_vm2 = vcmask 523264  }
  0x10   : > { %s7482_s12 = smov (!%p189_p4, %s5940_s12), 1  ;;  %5375 = vmatprep.subr.bf16.mxu0 %v5866_v1  ;;  %5216 = vmatpush3.bf16.msra.mxu1 %v5865_v0  ;;  %v5871_v6 = vld [vmem:[%s7386_s1 + $0x38] sm:$0xff]   ;;  %v6035_v18 = vld [vmem:[%s7386_s1] sm:$0xff]   ;;  %vm6055_vm3 = vmor %vm271_vm0, %vm272_vm1  ;;  %vm1278_vm4 = vcmask 1042432   ;;  %vm1279_vm5 = vcmask 1046532   ;;  %vm4283_vm7 = vcmask 1041409  }
  0x11   : > { %5376 = vmatpush3.bf16.msra.mxu0 %v5866_v1  ;;  %5217 = vmatprep.subr.bf16.mxu1 %v5867_v2  ;;  %s5839_s26 = smul.u32 216, %s7482_s12  ;;  %v5872_v7 = vld [vmem:[%s7386_s1 + $0x98] sm:$0xff]   ;;  %v6043_v23 = vld [vmem:[%s7386_s1 + $0xa0] sm:$0xff]   ;;  %vm6262_vm6 = vmor %vm1278_vm4, %vm1279_vm5  ;;  %vm4286_vm8 = vcmask 1042434   ;;  %vm4289_vm9 = vcmask 1043459   ;;  %vm4292_vm10 = vcmask 1044484  }
  0x12   : > { %5377 = vmatprep.subr.bf16.mxu0 %v5868_v3  ;;  %vm4295_vm11 = vcmask 1045509   ;;  %vm4298_vm12 = vcmask 1046534   ;;  %vm4301_vm13 = vcmask 1047559   ;;  %s4970_s8 = sshll.u32 %s7482_s12, 5 }
  0x13   : > { %s6016_s6 = scalar_lea.vmem %s7385_s0, %s5839_s26  ;;  %s7115_s10 = scalar_lea.vmem %s7388_s3, %s4970_s8 }
  0x14   : > { %5218 = vmatpush3.bf16.msra.mxu1 %v5867_v2  ;;  %v6022_v8 = vld [vmem:[%s6016_s6] sm:$0xf]  ;;  %v6025_v9 = vld [vmem:[%s6016_s6 + $0x4] sm:$0xf]  ;;  %v211_v10 = vld [vmem:[%s6016_s6 + $0x8] sm:$0x1] }
  0x15   : > { %5378 = vmatpush3.bf16.msra.mxu0 %v5868_v3  ;;  %5219 = vmatprep.subr.bf16.mxu1 %v5869_v4  ;;  %v275_v11 = vshrl.u32 %v6022_v8, 16  ;;  %v278_v12 = vshll.u32 %v6022_v8, 16  ;;  %v284_v13 = vshll.u32 %v6025_v9, 16  ;;  %v288_v14 = vshrl.u32 %v6025_v9, 16  ;;  %v6038_v22 = vld [vmem:[%s6016_s6 + $0xc] sm:$0xf] }
  0x16   : > { %5379 = vmatprep.subr.bf16.mxu0 %v5870_v5  ;;  %v294_v15 = vshll.u32 %v211_v10, 16  ;;  %v6046_v25 = vld [vmem:[%s6016_s6 + $0x10] sm:$0xf]  ;;  %v6049_v26 = vld [vmem:[%s6016_s6 + $0x14] sm:$0x1]  ;;  %v299_v27 = vshrl.u32 %v6038_v22, 16 }
  0x17   : > { %v277_v16 = vrot.slane %v275_v11, 4  ;;  %v280_v17 = vrot.slane %v278_v12, 5  ;;  %v286_v19 = vrot.slane %v284_v13, 5  ;;  %v290_v20 = vrot.slane %v288_v14, 4  ;;  %v6068_v42 = vld [vmem:[%s6016_s6 + $0x18] sm:$0xf] }
  0x18   : > { %5220 = vmatpush3.bf16.msra.mxu1 %v5869_v4  ;;  %v296_v21 = vrot.slane %v294_v15, 5  ;;  %v302_v28 = vshll.u32 %v6038_v22, 16  ;;  %v308_v31 = vshll.u32 %v6046_v25, 16  ;;  %v312_v32 = vshrl.u32 %v6046_v25, 16  ;;  %v6075_v46 = vld [vmem:[%s6016_s6 + $0x1c] sm:$0xf] }
  0x19   : > { %5380 = vmatpush3.bf16.msra.mxu0 %v5870_v5  ;;  %5221 = vmatprep.subr.bf16.mxu1 %v5871_v6  ;;  %v281_v24 = vor.u32 %v280_v17, %v277_v16  ;;  %v291_v30 = vor.u32 %v290_v20, %v286_v19  ;;  %v318_v33 = vshll.u32 %v6049_v26, 16  ;;  %v301_v35 = vrot.slane %v299_v27, 4  ;;  %v6078_v47 = vld [vmem:[%s6016_s6 + $0x20] sm:$0x1]  ;;  %v6086_v53 = vld [vmem:[%s6016_s6 + $0x24] sm:$0xf] }
  0x1a   : > { %5381 = vmatprep.subr.bf16.mxu0 %v5872_v7  ;;  %v304_v36 = vrot.slane %v302_v28, 5  ;;  %v6064_v37 = vcombine.low %v6038_v22, %v6046_v25  ;;  %v310_v39 = vrot.slane %v308_v31, 5  ;;  %v314_v40 = vrot.slane %v312_v32, 4  ;;  %v6089_v54 = vld [vmem:[%s6016_s6 + $0x28] sm:$0xf] }
  0x1b   : > { %v282_v34 = vrot.slane %v281_v24, 4  ;;  %v292_v38 = vrot.slane %v291_v30, 4  ;;  %v320_v41 = vrot.slane %v318_v33, 5  ;;  %v1293_v45 = vrot.slane %v6049_v26, 5  ;;  %v6093_v59 = vld [vmem:[%s6016_s6 + $0x2c] sm:$0x1] }
  0x1c   : > { %5222 = vmatpush3.bf16.msra.mxu1 %v5871_v6  ;;  %v305_v44 = vor.u32 %v304_v36, %v301_v35  ;;  %v323_v48 = vshrl.u32 %v6068_v42, 16  ;;  %v315_v50 = vor.u32 %v314_v40, %v310_v39  ;;  %v326_v51 = vshll.u32 %v6068_v42, 16  ;;  %v6105_v10 = vld [vmem:[%s6016_s6 + $0x30] sm:$0xf]  ;;  %v5877_v11 = vld [vmem:[%s7386_s1 + $0x8] sm:$0xff]  }
  0x1d   : > { %5382 = vmatpush3.bf16.msra.mxu0 %v5872_v7  ;;  %5255 = vmatprep.subr.bf16.mxu1 %v6035_v18  ;;  %v287_v43 = vsel %vm6055_vm3, %v282_v34, %v286_v19  ;;  %v297_v49 = vsel %vm6055_vm3, %v292_v38, %v296_v21  ;;  %v332_v52 = vshll.u32 %v6075_v46, 16  ;;  %v336_v58 = vshrl.u32 %v6075_v46, 16  ;;  %v6113_v16 = vld [vmem:[%s6016_s6 + $0x34] sm:$0xf]  ;;  %v6120_v30 = vld [vmem:[%s6016_s6 + $0x38] sm:$0x1] }
  0x1e   : > { %5415 = vmatprep.subr.bf16.mxu0 %v6043_v23  ;;  %v4531_v55 = vcombine.low %v287_v43, %v297_v49  ;;  %v306_v56 = vrot.slane %v305_v44, 4  ;;  %v325_v57 = vrot.slane %v323_v48, 4  ;;  %v316_v60 = vrot.slane %v315_v50, 4  ;;  %v6128_v36 = vld [vmem:[%s6016_s6 + $0x3c] sm:$0xf]  ;;  %v5876_v40 = vld [vmem:[%s7386_s1 + $0xa8] sm:$0xff]  }
  0x1f   : > { %v328_v61 = vrot.slane %v326_v51, 5  ;;  %v334_v62 = vrot.slane %v332_v52, 5  ;;  %v342_v63 = vshll.u32 %v6078_v47, 16  ;;  %v338_v1 = vrot.slane %v336_v58, 4  ;;  %v5880_v43 = vld [vmem:[%s7386_s1 + $0x10] sm:$0xff]  }
  0x20   : > { %5223 = vmatprep.mubr.msk.bf16.mxu1 %vm739_vm2, %v4531_v55  ;;  %v311_v0 = vsel %vm6055_vm3, %v306_v56, %v310_v39  ;;  %v1297_v2 = vrot.slane %v6075_v46, 5  ;;  %v1300_v3 = vrot.slane %v6078_v47, 5  ;;  %v321_v4 = vsel %vm6055_vm3, %v316_v60, %v320_v41  ;;  %v6143_v51 = vld [vmem:[%s6016_s6 + $0x40] sm:$0xf] }
  0x21   : > { %v329_v5 = vor.u32 %v328_v61, %v325_v57  ;;  %v344_v6 = vrot.slane %v342_v63, 5  ;;  %v347_v7 = vshrl.u32 %v6086_v53, 16  ;;  %v4532_v12 = vcombine.low %v311_v0, %v321_v4 }
  0x22   : > { %v339_v13 = vor.u32 %v338_v1, %v334_v62  ;;  %v350_v14 = vshll.u32 %v6086_v53, 16  ;;  %v356_v15 = vshll.u32 %v6089_v54, 16  ;;  %v360_v20 = vshrl.u32 %v6089_v54, 16 }
  0x23   : > { %v330_v17 = vrot.slane %v329_v5, 4  ;;  %v349_v19 = vrot.slane %v347_v7, 4  ;;  %v366_v21 = vshll.u32 %v6093_v59, 16  ;;  %5383 = vmatprep.mubr.msk.bf16.mxu0 %vm739_vm2, %v4532_v12  ;;  %5224 = vmatmul.mubr.msk.bf16.vlgmr.msra.gmra.mrb[0].mxu1 %vm739_vm2, %v4532_v12  ;;  %v371_v31 = vshrl.u32 %v6105_v10, 16 }
  0x24   : > { %v340_v24 = vrot.slane %v339_v13, 4  ;;  %v352_v27 = vrot.slane %v350_v14, 5  ;;  %v358_v28 = vrot.slane %v356_v15, 5  ;;  %5256 = vmatpush3.bf16.msra.mxu1 %v6035_v18  ;;  %v362_v33 = vrot.slane %v360_v20, 4  ;;  %v6168_v15 = vld [vmem:[%s6016_s6 + $0x4c] sm:$0xf] }
  0x25   : > { %v335_v32 = vsel %vm6055_vm3, %v330_v17, %v334_v62  ;;  %v368_v34 = vrot.slane %v366_v21, 5  ;;  %v374_v35 = vshll.u32 %v6105_v10, 16  ;;  %v373_v41 = vrot.slane %v371_v31, 4  ;;  %5257 = vmatprep.subr.bf16.mxu1 %v5877_v11  ;;  %v6152_v62 = vld [vmem:[%s6016_s6 + $0x44] sm:$0x1]  ;;  %v5882_v21 = vld [vmem:[%s7386_s1 + $0x18] sm:$0xff]  }
  0x26   : > { %v345_v38 = vsel %vm6055_vm3, %v340_v24, %v344_v6  ;;  %v353_v39 = vor.u32 %v352_v27, %v349_v19  ;;  %v380_v18 = vshll.u32 %v6113_v16, 16  ;;  %v363_v48 = vor.u32 %v362_v33, %v358_v28  ;;  %v6160_v6 = vld [vmem:[%s6016_s6 + $0x48] sm:$0xf]  ;;  %v6180_v31 = vld [vmem:[%s6016_s6 + $0x50] sm:$0x1] }
  0x27   : > { %v6139_v44 = vcombine.low %v335_v32, %v345_v38  ;;  %v376_v49 = vrot.slane %v374_v35, 5  ;;  %v384_v50 = vshrl.u32 %v6113_v16, 16  ;;  %v390_v56 = vshll.u32 %v6120_v30, 16 }
  0x28   : > { %v354_v52 = vrot.slane %v353_v39, 4  ;;  %v382_v55 = vrot.slane %v380_v18, 5  ;;  %v395_v57 = vshrl.u32 %v6128_v36, 16  ;;  %v364_v58 = vrot.slane %v363_v48, 4  ;;  %5258 = vmatpush3.bf16.msra.mxu1 %v5877_v11  ;;  %v6190_v39 = vld [vmem:[%s6016_s6 + $0x54] sm:$0xf] }
  0x29   : > { %7421 = vst [vmem:[#allocation2_spill] sm:$0xff] %v6139_v44  ;;  %5384 = vmatmul.mubr.msk.bf16.vlgmr.msra.gmra.mrb[0].mxu0 %vm739_vm2, %v6139_v44  ;;  %5227 = vmatprep.mubr.msk.bf16.mxu1 %vm739_vm2, %v6139_v44  ;;  %v377_v60 = vor.u32 %v376_v49, %v373_v41  ;;  %v386_v61 = vrot.slane %v384_v50, 4  ;;  %v398_v63 = vshll.u32 %v6128_v36, 16  ;;  %v392_v1 = vrot.slane %v390_v56, 5  ;;  %7423 = vst [vmem:[#allocation4_spill] sm:$0xff] %v6190_v39  ;;  %v5879_v41 = vld [vmem:[%s7386_s1 + $0xb8] sm:$0xff]  }
  0x2a   : > { %5416 = vmatpush3.bf16.msra.mxu0 %v6043_v23  ;;  %v359_v0 = vsel %vm6055_vm3, %v354_v52, %v358_v28  ;;  %v397_v4 = vrot.slane %v395_v57, 4  ;;  %v404_v5 = vshll.u32 %v6143_v51, 16  ;;  %v369_v7 = vsel %vm6055_vm3, %v364_v58, %v368_v34  ;;  %v5878_v23 = vld [vmem:[%s7386_s1 + $0xb0] sm:$0xff]   ;;  %5259 = vmatprep.subr.bf16.mxu1 %v5880_v43  ;;  %v6199_v52 = vld [vmem:[%s6016_s6 + $0x58] sm:$0xf] }
  0x2b   : > { %5417 = vmatprep.subr.bf16.mxu0 %v5876_v40  ;;  %v378_v12 = vrot.slane %v377_v60, 4  ;;  %v387_v13 = vor.u32 %v386_v61, %v382_v55  ;;  %v400_v14 = vrot.slane %v398_v63, 5  ;;  %v6170_v17 = vcombine.low %v359_v0, %v369_v7  ;;  %v6209_v61 = vld [vmem:[%s6016_s6 + $0x5c] sm:$0x1] }
  0x2c   : > { %v406_v11 = vrot.slane %v404_v5, 5  ;;  %v408_v19 = vshrl.u32 %v6143_v51, 16  ;;  %v414_v20 = vshll.u32 %v6152_v62, 16  ;;  %v419_v32 = vshrl.u32 %v6160_v6, 16  ;;  %5260 = vmatpush3.bf16.msra.mxu1 %v5880_v43 }
  0x2d   : > { %7422 = vst [vmem:[#allocation3_spill] sm:$0xff] %v6170_v17  ;;  %v383_v24 = vsel %vm6055_vm3, %v378_v12, %v382_v55  ;;  %v388_v27 = vrot.slane %v387_v13, 4  ;;  %v401_v28 = vor.u32 %v400_v14, %v397_v4  ;;  %5387 = vmatprep.mubr.msk.bf16.mxu0 %vm739_vm2, %v6170_v17  ;;  %5228 = vmatmul.mubr.msk.bf16.gmra.mrb[4].mxu1 %vm739_vm2, %v6170_v17  ;;  %v422_v35 = vshll.u32 %v6160_v6, 16  ;;  %v6204_v55 = vld [vmem:[%s7386_s1 + $0x40] sm:$0xff]  }
  0x2e   : > { %v410_v33 = vrot.slane %v408_v19, 4  ;;  %v416_v34 = vrot.slane %v414_v20, 5  ;;  %v428_v38 = vshll.u32 %v6168_v15, 16  ;;  %5418 = vmatpush3.bf16.msra.mxu0 %v5876_v40  ;;  %v421_v49 = vrot.slane %v419_v32, 4  ;;  %5261 = vmatprep.subr.bf16.mxu1 %v5882_v21  ;;  %v6223_v19 = vld [vmem:[%s6016_s6 + $0x60] sm:$0xf] }
  0x2f   : > { %v393_v18 = vsel %vm6055_vm3, %v388_v27, %v392_v1  ;;  %v402_v48 = vrot.slane %v401_v28, 4  ;;  %v432_v50 = vshrl.u32 %v6168_v15, 16  ;;  %5419 = vmatprep.subr.bf16.mxu0 %v5878_v23  ;;  %v424_v58 = vrot.slane %v422_v35, 5  ;;  %v6228_v32 = vld [vmem:[%s6016_s6 + $0x64] sm:$0xf] }
  0x30   : > { %v6206_v56 = vcombine.low %v383_v24, %v393_v18  ;;  %v411_v57 = vor.u32 %v410_v33, %v406_v11  ;;  %v430_v60 = vrot.slane %v428_v38, 5  ;;  %v438_v43 = vshll.u32 %v6180_v31, 16  ;;  %5262 = vmatpush3.bf16.msra.mxu1 %v5882_v21  ;;  %v6237_v21 = vld [vmem:[%s7386_s1 + $0xc0] sm:$0xff]  }
  0x31   : > { %v407_v40 = vsel %vm6055_vm3, %v402_v48, %v406_v11  ;;  %v434_v63 = vrot.slane %v432_v50, 4  ;;  %v443_v0 = vshrl.u32 %v6190_v39, 16  ;;  %v425_v4 = vor.u32 %v424_v58, %v421_v49  ;;  %5295 = vmatprep.subr.bf16.mxu1 %v6204_v55  ;;  %v6242_v48 = vld [vmem:[%s6016_s6 + $0x68] sm:$0x1] }
  0x32   : > { %7424 = vst [vmem:[#allocation5_spill] sm:$0xff] %v6206_v56  ;;  %5388 = vmatmul.mubr.msk.bf16.gmra.mrb[4].mxu0 %vm739_vm2, %v6206_v56  ;;  %5231 = vmatprep.mubr.msk.bf16.mxu1 %vm739_vm2, %v6206_v56  ;;  %v412_v1 = vrot.slane %v411_v57, 4  ;;  %v446_v5 = vshll.u32 %v6190_v39, 16  ;;  %v452_v7 = vshll.u32 %v6199_v52, 16  ;;  %v440_v13 = vrot.slane %v438_v43, 5 }
  0x33   : > { %v435_v12 = vor.u32 %v434_v63, %v430_v60  ;;  %5420 = vmatpush3.bf16.msra.mxu0 %v5878_v23  ;;  %v445_v14 = vrot.slane %v443_v0, 4  ;;  %v456_v11 = vshrl.u32 %v6199_v52, 16  ;;  %v426_v24 = vrot.slane %v425_v4, 4  ;;  %v6256_v4 = vld [vmem:[%s6016_s6 + $0x6c] sm:$0xf] }
  0x34   : > { %v417_v20 = vsel %vm6055_vm3, %v412_v1, %v416_v34  ;;  %v448_v27 = vrot.slane %v446_v5, 5  ;;  %v454_v28 = vrot.slane %v452_v7, 5  ;;  %5421 = vmatprep.subr.bf16.mxu0 %v5879_v41  ;;  %v462_v38 = vshll.u32 %v6209_v61, 16 }
  0x35   : > { %v6231_v33 = vcombine.low %v407_v40, %v417_v20  ;;  %v436_v23 = vrot.slane %v435_v12, 4  ;;  %v458_v35 = vrot.slane %v456_v11, 4  ;;  %v431_v34 = vsel %vm6055_vm3, %v426_v24, %v430_v60 }
  0x36   : > { %v449_v18 = vor.u32 %v448_v27, %v445_v14  ;;  %v467_v49 = vshrl.u32 %v6223_v19, 16  ;;  %v470_v50 = vshll.u32 %v6223_v19, 16  ;;  %v464_v40 = vrot.slane %v462_v38, 5  ;;  %v6276_v27 = vld [vmem:[%s6016_s6 + $0x70] sm:$0xf] }
  0x37   : > { %7425 = vst [vmem:[#allocation6_spill] sm:$0xff] %v6231_v33  ;;  %5391 = vmatprep.mubr.msk.bf16.mxu0 %vm739_vm2, %v6231_v33  ;;  %5232 = vmatmul.mubr.msk.bf16.gmra.mrb[8].mxu1 %vm739_vm2, %v6231_v33  ;;  %v441_v57 = vsel %vm6055_vm3, %v436_v23, %v440_v13  ;;  %v459_v58 = vor.u32 %v458_v35, %v454_v28  ;;  %v476_v60 = vshll.u32 %v6228_v32, 16  ;;  %v480_v12 = vshrl.u32 %v6228_v32, 16 }
  0x38   : > { %v6253_v63 = vcombine.low %v431_v34, %v441_v57  ;;  %v450_v43 = vrot.slane %v449_v18, 4  ;;  %v469_v0 = vrot.slane %v467_v49, 4  ;;  %v472_v1 = vrot.slane %v470_v50, 5  ;;  %5422 = vmatpush3.bf16.msra.mxu0 %v5879_v41  ;;  %v6281_v34 = vld [vmem:[%s6016_s6 + $0x74] sm:$0x1] }
  0x39   : > { %v460_v5 = vrot.slane %v459_v58, 4  ;;  %v478_v7 = vrot.slane %v476_v60, 5  ;;  %v486_v13 = vshll.u32 %v6242_v48, 16  ;;  %5455 = vmatprep.subr.bf16.mxu0 %v6237_v21  ;;  %v4604_v20 = vrot.slane %v6038_v22, 9 }
  0x3a   : > { %7426 = vst [vmem:[#allocation7_spill] sm:$0xff] %v6253_v63  ;;  %5392 = vmatmul.mubr.msk.bf16.gmra.mrb[8].mxu0 %vm739_vm2, %v6253_v63  ;;  %5235 = vmatprep.mubr.msk.bf16.mxu1 %vm739_vm2, %v6253_v63  ;;  %v455_v41 = vsel %vm6055_vm3, %v450_v43, %v454_v28  ;;  %v473_v11 = vor.u32 %v472_v1, %v469_v0  ;;  %v1290_v24 = vrot.slane %v6046_v25, 5  ;;  %v482_v35 = vrot.slane %v480_v12, 4 }
  0x3b   : > { %v465_v23 = vsel %vm6055_vm3, %v460_v5, %v464_v40  ;;  %v488_v38 = vrot.slane %v486_v13, 5  ;;  %v491_v18 = vshrl.u32 %v6256_v4, 16  ;;  %v494_v58 = vshll.u32 %v6256_v4, 16  ;;  %v6301_v5 = vld [vmem:[%s6016_s6 + $0x78] sm:$0xf] }
  0x3c   : > { %v6284_v49 = vcombine.low %v455_v41, %v465_v23  ;;  %v474_v28 = vrot.slane %v473_v11, 4  ;;  %v1291_v22 = vsel %vm6262_vm6, %v4604_v20, %v1290_v24  ;;  %v1292_v50 = vrot.slane %v1290_v24, 4 }
  0x3d   : > { %v483_v25 = vor.u32 %v482_v35, %v478_v7  ;;  %v493_v57 = vrot.slane %v491_v18, 4  ;;  %v500_v40 = vshll.u32 %v6276_v27, 16  ;;  %v504_v0 = vshrl.u32 %v6276_v27, 16  ;;  %v6313_v35 = vld [vmem:[%s6016_s6 + $0x7c] sm:$0xf] }
  0x3e   : > { %7429 = vst [vmem:[#allocation8_spill] sm:$0xff] %v6284_v49  ;;  %5395 = vmatprep.mubr.msk.bf16.mxu0 %vm739_vm2, %v6284_v49  ;;  %v479_v60 = vsel %vm6055_vm3, %v474_v28, %v478_v7  ;;  %v1294_v43 = vsel %vm6262_vm6, %v1292_v50, %v1293_v45  ;;  %v510_v1 = vshll.u32 %v6281_v34, 16  ;;  %v496_v7 = vrot.slane %v494_v58, 5  ;;  %v6316_v18 = vld [vmem:[%s6016_s6 + $0x80] sm:$0x1] }
  0x3f   : > { %5236 = vmatmul.mubr.msk.bf16.gmra.mrb[12].mxu1 %vm739_vm2, %v6284_v49  ;;  %v484_v12 = vrot.slane %v483_v25, 4  ;;  %v6305_v13 = vcombine.low %v1291_v22, %v1294_v43  ;;  %v502_v41 = vrot.slane %v500_v40, 5  ;;  %v506_v26 = vrot.slane %v504_v0, 4 }
  0x40   : > { %v512_v11 = vrot.slane %v510_v1, 5  ;;  %v4605_v20 = vrot.slane %v6068_v42, 9  ;;  %v1299_v45 = vrot.slane %v1297_v2, 4  ;;  %v497_v23 = vor.u32 %v496_v7, %v493_v57  ;;  %v6333_v1 = vld [vmem:[%s6016_s6 + $0x84] sm:$0xf] }
  0x41   : > { %7430 = vst [vmem:[#allocation9_spill] sm:$0xff] %v6305_v13  ;;  %v489_v24 = vsel %vm6055_vm3, %v484_v12, %v488_v38  ;;  %v515_v28 = vshrl.u32 %v6301_v5, 16  ;;  %v518_v22 = vshll.u32 %v6301_v5, 16  ;;  %v507_v25 = vor.u32 %v506_v26, %v502_v41  ;;  %v6343_v12 = vld [vmem:[%s6016_s6 + $0x88] sm:$0xf] }
  0x42   : > { %v6320_v50 = vcombine.low %v479_v60, %v489_v24  ;;  %v1298_v58 = vsel %vm6262_vm6, %v4605_v20, %v1297_v2  ;;  %v1301_v38 = vsel %vm6262_vm6, %v1299_v45, %v1300_v3  ;;  %v498_v57 = vrot.slane %v497_v23, 4  ;;  %v6346_v7 = vld [vmem:[%s6016_s6 + $0x8c] sm:$0x1] }
  0x43   : > { %v6330_v40 = vcombine.low %v1298_v58, %v1301_v38  ;;  %v517_v43 = vrot.slane %v515_v28, 4  ;;  %v520_v0 = vrot.slane %v518_v22, 5  ;;  %v508_v60 = vrot.slane %v507_v25, 4 }
  0x44   : > { %7431 = vst [vmem:[#allocation10_spill] sm:$0xff] %v6320_v50  ;;  %5396 = vmatmul.mubr.msk.bf16.gmra.mrb[12].mxu0 %vm739_vm2, %v6320_v50  ;;  %5239 = vmatprep.mubr.msk.bf16.mxu1 %vm739_vm2, %v6320_v50  ;;  %v524_v2 = vshll.u32 %v6313_v35, 16  ;;  %v528_v47 = vshrl.u32 %v6313_v35, 16  ;;  %v534_v3 = vshll.u32 %v6316_v18, 16  ;;  %v503_v26 = vsel %vm6055_vm3, %v498_v57, %v502_v41 }
  0x45   : > { %7432 = vst [vmem:[#allocation11_spill] sm:$0xff] %v6330_v40  ;;  %5423 = vmatprep.mubr.msk.bf16.mxu0 %vm739_vm2, %v6305_v13  ;;  %v521_v20 = vor.u32 %v520_v0, %v517_v43  ;;  %v4606_v45 = vrot.slane %v6086_v53, 9  ;;  %v1304_v24 = vrot.slane %v6089_v54, 5  ;;  %v513_v23 = vsel %vm6055_vm3, %v508_v60, %v512_v11 }
  0x46   : > { %v526_v28 = vrot.slane %v524_v2, 5  ;;  %v530_v22 = vrot.slane %v528_v47, 4  ;;  %v536_v25 = vrot.slane %v534_v3, 5  ;;  %v6356_v58 = vcombine.low %v503_v26, %v513_v23 }
  0x47   : > { %v522_v38 = vrot.slane %v521_v20, 4  ;;  %v1305_v50 = vsel %vm6262_vm6, %v4606_v45, %v1304_v24  ;;  %v1306_v49 = vrot.slane %v1304_v24, 4  ;;  %v1307_v57 = vrot.slane %v6093_v59, 5  ;;  %v6373_v45 = vld [vmem:[%s6016_s6 + $0x90] sm:$0xf]  ;;  %v5883_v24 = vld [vmem:[%s7386_s1 + $0xc8] sm:$0xff]  }
  0x48   : > { %7433 = vst [vmem:[#allocation12_spill] sm:$0xff] %v6356_v58  ;;  %v531_v41 = vor.u32 %v530_v22, %v526_v28  ;;  %v539_v43 = vshrl.u32 %v6333_v1, 16  ;;  %v542_v0 = vshll.u32 %v6333_v1, 16  ;;  %5240 = vmatmul.mubr.msk.bf16.gmra.mrb[16].mxu1 %vm739_vm2, %v6356_v58  ;;  %v548_v60 = vshll.u32 %v6343_v12, 16  ;;  %v6381_v58 = vld [vmem:[%s6016_s6 + $0x94] sm:$0xf] }
  0x49   : > { %v527_v11 = vsel %vm6055_vm3, %v522_v38, %v526_v28  ;;  %v552_v2 = vshrl.u32 %v6343_v12, 16  ;;  %v558_v47 = vshll.u32 %v6346_v7, 16  ;;  %v1308_v59 = vsel %vm6262_vm6, %v1306_v49, %v1307_v57 }
  0x4a   : > { %v532_v3 = vrot.slane %v531_v41, 4  ;;  %v541_v26 = vrot.slane %v539_v43, 4  ;;  %v544_v20 = vrot.slane %v542_v0, 5  ;;  %v6378_v23 = vcombine.low %v1305_v50, %v1308_v59  ;;  %v6390_v0 = vld [vmem:[%s6016_s6 + $0x98] sm:$0x1] }
  0x4b   : > { %v550_v28 = vrot.slane %v548_v60, 5  ;;  %v554_v22 = vrot.slane %v552_v2, 4  ;;  %v560_v38 = vrot.slane %v558_v47, 5  ;;  %v4607_v57 = vrot.slane %v6105_v10, 9 }
  0x4c   : > { %7434 = vst [vmem:[#allocation13_spill] sm:$0xff] %v6378_v23  ;;  %5424 = vmatmul.mubr.msk.bf16.vlgmr.msra.gmra.mrb[0].mxu0 %vm739_vm2, %v6330_v40  ;;  %v537_v49 = vsel %vm6055_vm3, %v532_v3, %v536_v25  ;;  %v545_v41 = vor.u32 %v544_v20, %v541_v26  ;;  %v1311_v43 = vrot.slane %v6113_v16, 5  ;;  %v1314_v2 = vrot.slane %v6120_v30, 5  ;;  %v6500_v40 = vld [vmem:[%s6016_s6 + $0xbc] sm:$0x1] }
  0x4d   : > { %5456 = vmatpush3.bf16.msra.mxu0 %v6237_v21  ;;  %v6393_v50 = vcombine.low %v527_v11, %v537_v49  ;;  %5427 = vmatprep.mubr.msk.bf16.mxu0 %vm739_vm2, %v6378_v23  ;;  %v555_v60 = vor.u32 %v554_v22, %v550_v28  ;;  %v563_v25 = vshrl.u32 %v6373_v45, 16  ;;  %v566_v26 = vshll.u32 %v6373_v45, 16  ;;  %v6403_v21 = vld [vmem:[%s6016_s6 + $0x9c] sm:$0xf]  ;;  %v5886_v11 = vld [vmem:[%s7386_s1 + $0xd0] sm:$0xff]  }
  0x4e   : > { %v546_v47 = vrot.slane %v545_v41, 4  ;;  %v1312_v3 = vsel %vm6262_vm6, %v4607_v57, %v1311_v43  ;;  %v1313_v59 = vrot.slane %v1311_v43, 4  ;;  %5457 = vmatprep.subr.bf16.mxu0 %v5883_v24  ;;  %v572_v22 = vshll.u32 %v6381_v58, 16  ;;  %v6413_v41 = vld [vmem:[%s6016_s6 + $0xa0] sm:$0xf] }
  0x4f   : > { %7435 = vst [vmem:[#allocation14_spill] sm:$0xff] %v6393_v50  ;;  %5243 = vmatprep.mubr.msk.bf16.mxu1 %vm739_vm2, %v6393_v50  ;;  %v556_v30 = vrot.slane %v555_v60, 4  ;;  %v565_v20 = vrot.slane %v563_v25, 4  ;;  %v576_v49 = vshrl.u32 %v6381_v58, 16  ;;  %v568_v63 = vrot.slane %v566_v26, 5  ;;  %v5891_v60 = vld [vmem:[%s7386_s1 + $0xd8] sm:$0xff]  }
  0x50   : > { %v551_v57 = vsel %vm6055_vm3, %v546_v47, %v550_v28  ;;  %v1315_v43 = vsel %vm6262_vm6, %v1313_v59, %v1314_v2  ;;  %v582_v33 = vshll.u32 %v6390_v0, 16  ;;  %v574_v56 = vrot.slane %v572_v22, 5  ;;  %v6431_v59 = vld [vmem:[%s6016_s6 + $0xa4] sm:$0x1] }
  0x51   : > { %v561_v25 = vsel %vm6055_vm3, %v556_v30, %v560_v38  ;;  %v6425_v50 = vcombine.low %v1312_v3, %v1315_v43  ;;  %v578_v17 = vrot.slane %v576_v49, 4  ;;  %5458 = vmatpush3.bf16.msra.mxu0 %v5883_v24  ;;  %v569_v28 = vor.u32 %v568_v63, %v565_v20 }
  0x52   : > { %v6427_v44 = vcombine.low %v551_v57, %v561_v25  ;;  %v584_v2 = vrot.slane %v582_v33, 5  ;;  %v4608_v47 = vrot.slane %v6128_v36, 9  ;;  %5459 = vmatprep.subr.bf16.mxu0 %v5886_v11  ;;  %v1318_v23 = vrot.slane %v6143_v51, 5 }
  0x53   : > { %7436 = vst [vmem:[#allocation15_spill] sm:$0xff] %v6425_v50  ;;  %v579_v26 = vor.u32 %v578_v17, %v574_v56  ;;  %v1321_v38 = vrot.slane %v6152_v62, 5  ;;  %v587_v3 = vshrl.u32 %v6403_v21, 16  ;;  %v570_v63 = vrot.slane %v569_v28, 4  ;;  %v6444_v17 = vld [vmem:[%s6016_s6 + $0xa8] sm:$0xf] }
  0x54   : > { %7437 = vst [vmem:[#allocation16_spill] sm:$0xff] %v6427_v44  ;;  %5244 = vmatmul.mubr.msk.bf16.gmra.mrb[20].mxu1 %vm739_vm2, %v6427_v44  ;;  %5428 = vmatmul.mubr.msk.bf16.gmra.mrb[4].mxu0 %vm739_vm2, %v6425_v50  ;;  %v590_v33 = vshll.u32 %v6403_v21, 16  ;;  %v596_v24 = vshll.u32 %v6413_v41, 16  ;;  %v600_v30 = vshrl.u32 %v6413_v41, 16  ;;  %v1319_v62 = vsel %vm6262_vm6, %v4608_v47, %v1318_v23  ;;  %v6453_v44 = vld [vmem:[%s7386_s1 + $0xe0] sm:$0xff]  }
  0x55   : > { %v580_v20 = vrot.slane %v579_v26, 4  ;;  %v1320_v22 = vrot.slane %v1318_v23, 4  ;;  %v589_v49 = vrot.slane %v587_v3, 4  ;;  %5460 = vmatpush3.bf16.msra.mxu0 %v5886_v11  ;;  %v575_v57 = vsel %vm6055_vm3, %v570_v63, %v574_v56  ;;  %7438 = vst [vmem:[#allocation17_spill] sm:$0xff] %v6453_v44  ;;  %v6462_v56 = vld [vmem:[%s6016_s6 + $0xac] sm:$0xf] }
  0x56   : > { %v592_v43 = vrot.slane %v590_v33, 5  ;;  %v598_v25 = vrot.slane %v596_v24, 5  ;;  %v602_v28 = vrot.slane %v600_v30, 4  ;;  %5461 = vmatprep.subr.bf16.mxu0 %v5891_v60  ;;  %v606_v11 = vshll.u32 %v6431_v59, 16  ;;  %v6469_v30 = vld [vmem:[%s6016_s6 + $0xb0] sm:$0x1] }
  0x57   : > { %v585_v26 = vsel %vm6055_vm3, %v580_v20, %v584_v2  ;;  %v1322_v23 = vsel %vm6262_vm6, %v1320_v22, %v1321_v38  ;;  %v4609_v47 = vrot.slane %v6160_v6, 9  ;;  %v1325_v2 = vrot.slane %v6168_v15, 5 }
  0x58   : > { %v6464_v3 = vcombine.low %v575_v57, %v585_v26  ;;  %v6466_v63 = vcombine.low %v1319_v62, %v1322_v23  ;;  %v593_v33 = vor.u32 %v592_v43, %v589_v49  ;;  %v603_v24 = vor.u32 %v602_v28, %v598_v25  ;;  %v6481_v43 = vld [vmem:[%s6016_s6 + $0xb4] sm:$0xf] }
  0x59   : > { %v608_v50 = vrot.slane %v606_v11, 5  ;;  %v1328_v38 = vrot.slane %v6180_v31, 5  ;;  %v611_v20 = vshrl.u32 %v6444_v17, 16  ;;  %5462 = vmatpush3.bf16.msra.mxu0 %v5891_v60  ;;  %v614_v49 = vshll.u32 %v6444_v17, 16 }
  0x5a   : > { %7439 = vst [vmem:[#allocation18_spill] sm:$0xff] %v6464_v3  ;;  %7440 = vst [vmem:[#allocation19_spill] sm:$0xff] %v6466_v63  ;;  %5247 = vmatprep.mubr.msk.bf16.mxu1 %vm739_vm2, %v6464_v3  ;;  %5431 = vmatprep.mubr.msk.bf16.mxu0 %vm739_vm2, %v6466_v63  ;;  %v594_v62 = vrot.slane %v593_v33, 4  ;;  %v604_v22 = vrot.slane %v603_v24, 4  ;;  %v620_v57 = vshll.u32 %v6462_v56, 16  ;;  %v1326_v31 = vsel %vm6262_vm6, %v4609_v47, %v1325_v2 }
  0x5b   : > { %v1327_v60 = vrot.slane %v1325_v2, 4  ;;  %v613_v28 = vrot.slane %v611_v20, 4  ;;  %v624_v26 = vshrl.u32 %v6462_v56, 16  ;;  %5495 = vmatprep.subr.bf16.mxu0 %v6453_v44  ;;  %v616_v33 = vrot.slane %v614_v49, 5  ;;  %v6492_v3 = vld [vmem:[%s6016_s6 + $0xb8] sm:$0xf] }
  0x5c   : > { %v599_v23 = vsel %vm6055_vm3, %v594_v62, %v598_v25  ;;  %v609_v11 = vsel %vm6055_vm3, %v604_v22, %v608_v50  ;;  %v622_v24 = vrot.slane %v620_v57, 5  ;;  %v630_v20 = vshll.u32 %v6469_v30, 16 }
  0x5d   : > { %v6494_v63 = vcombine.low %v599_v23, %v609_v11  ;;  %v1329_v47 = vsel %vm6262_vm6, %v1327_v60, %v1328_v38  ;;  %v626_v2 = vrot.slane %v624_v26, 4  ;;  %v617_v25 = vor.u32 %v616_v33, %v613_v28 }
  0x5e   : > { %v6502_v13 = vcombine.low %v1326_v31, %v1329_v47  ;;  %v4610_v62 = vrot.slane %v6190_v39, 9  ;;  %v1332_v50 = vrot.slane %v6199_v52, 5  ;;  %v632_v49 = vrot.slane %v630_v20, 5 }
  0x5f   : > { %7441 = vst [vmem:[#allocation20_spill] sm:$0xff] %v6494_v63  ;;  %5248 = vmatmul.mubr.msk.bf16.gmra.mrb[24].mxu1 %vm739_vm2, %v6494_v63  ;;  %v627_v22 = vor.u32 %v626_v2, %v622_v24  ;;  %v1335_v57 = vrot.slane %v6209_v61, 5  ;;  %v635_v38 = vshrl.u32 %v6481_v43, 16  ;;  %v618_v60 = vrot.slane %v617_v25, 4 }
  0x60   : > { %7442 = vst [vmem:[#allocation21_spill] sm:$0xff] %v6502_v13  ;;  %5432 = vmatmul.mubr.msk.bf16.gmra.mrb[8].mxu0 %vm739_vm2, %v6502_v13  ;;  %v1333_v31 = vsel %vm6262_vm6, %v4610_v62, %v1332_v50  ;;  %v1334_v28 = vrot.slane %v1332_v50, 4  ;;  %v638_v26 = vshll.u32 %v6481_v43, 16  ;;  %v644_v33 = vshll.u32 %v6492_v3, 16 }
  0x61   : > { %v628_v23 = vrot.slane %v627_v22, 4  ;;  %v637_v11 = vrot.slane %v635_v38, 4  ;;  %v648_v47 = vshrl.u32 %v6492_v3, 16  ;;  %v623_v61 = vsel %vm6055_vm3, %v618_v60, %v622_v24 }
  0x62   : > { %v1336_v2 = vsel %vm6262_vm6, %v1334_v28, %v1335_v57  ;;  %v640_v20 = vrot.slane %v638_v26, 5  ;;  %v654_v25 = vshll.u32 %v6500_v40, 16  ;;  %v646_v22 = vrot.slane %v644_v33, 5 }
  0x63   : > { %v633_v62 = vsel %vm6055_vm3, %v628_v23, %v632_v49  ;;  %v6524_v50 = vcombine.low %v1333_v31, %v1336_v2  ;;  %v650_v38 = vrot.slane %v648_v47, 4  ;;  %v4611_v39 = vrot.slane %v6223_v19, 9 }
  0x64   : > { %v6526_v63 = vcombine.low %v623_v61, %v633_v62  ;;  %v641_v13 = vor.u32 %v640_v20, %v637_v11  ;;  %v656_v44 = vrot.slane %v654_v25, 5  ;;  %v1339_v57 = vrot.slane %v6228_v32, 5 }
  0x65   : > { %5435 = vmatprep.mubr.msk.bf16.mxu0 %vm739_vm2, %v6524_v50  ;;  %v651_v24 = vor.u32 %v650_v38, %v646_v22  ;;  %v1342_v60 = vrot.slane %v6242_v48, 5  ;;  %v4612_v49 = vrot.slane %v6256_v4, 9  ;;  %v4567_v28 = vcombine.low %v6022_v8, %v6025_v9 }
  0x66   : > { %5251 = vmatprep.mubr.msk.bf16.mxu1 %vm739_vm2, %v6526_v63  ;;  %v642_v31 = vrot.slane %v641_v13, 4  ;;  %v1346_v26 = vrot.slane %v6276_v27, 5  ;;  %v1349_v23 = vrot.slane %v6281_v34, 5  ;;  %v1340_v33 = vsel %vm6262_vm6, %v4611_v39, %v1339_v57 }
  0x67   : > { %v652_v11 = vrot.slane %v651_v24, 4  ;;  %v1341_v47 = vrot.slane %v1339_v57, 4  ;;  %v1353_v48 = vrot.slane %v6313_v35, 5  ;;  %v4613_v8 = vrot.slane %v6301_v5, 9 }
  0x68   : > { %v647_v61 = vsel %vm6055_vm3, %v642_v31, %v646_v22  ;;  %v1347_v13 = vsel %vm6262_vm6, %v4612_v49, %v1346_v26  ;;  %v1348_v2 = vrot.slane %v1346_v26, 4  ;;  %v1356_v39 = vrot.slane %v6316_v18, 5 }
  0x69   : > { %v657_v9 = vsel %vm6055_vm3, %v652_v11, %v656_v44  ;;  %v1343_v34 = vsel %vm6262_vm6, %v1341_v47, %v1342_v60  ;;  %v1355_v20 = vrot.slane %v1353_v48, 4  ;;  %v4614_v24 = vrot.slane %v6333_v1, 9 }
  0x6a   : > { %v6553_v25 = vcombine.low %v647_v61, %v657_v9  ;;  %v6555_v62 = vcombine.low %v1340_v33, %v1343_v34  ;;  %v1350_v22 = vsel %vm6262_vm6, %v1348_v2, %v1349_v23  ;;  %v1360_v57 = vrot.slane %v6343_v12, 5  ;;  %v5890_v2 = vld [vmem:[%s7386_s1 + $0x48] sm:$0xff]  }
  0x6b   : > { %v6559_v38 = vcombine.low %v1347_v13, %v1350_v22  ;;  %v1363_v44 = vrot.slane %v6346_v7, 5  ;;  %v1354_v18 = vsel %vm6262_vm6, %v4613_v8, %v1353_v48  ;;  %v1357_v60 = vsel %vm6262_vm6, %v1355_v20, %v1356_v39 }
  0x6c   : > { %5252 = vmatmul.mubr.msk.bf16.gmra.mrb[28].mxu1 %vm739_vm2, %v6553_v25  ;;  %5436 = vmatmul.mubr.msk.bf16.gmra.mrb[12].mxu0 %vm739_vm2, %v6555_v62  ;;  %v1362_v49 = vrot.slane %v1360_v57, 4  ;;  %v1367_v31 = vrot.slane %v6381_v58, 5  ;;  %v1374_v26 = vrot.slane %v6413_v41, 5  ;;  %v1361_v23 = vsel %vm6262_vm6, %v4614_v24, %v1360_v57 }
  0x6d   : > { %5263 = vmatprep.mubr.msk.bf16.mxu1 %vm739_vm2, %v4567_v28  ;;  %5439 = vmatprep.mubr.msk.bf16.mxu0 %vm739_vm2, %v6559_v38  ;;  %v6581_v28 = vcombine.low %v1354_v18, %v1357_v60  ;;  %v4615_v11 = vrot.slane %v6373_v45, 9  ;;  %v1370_v47 = vrot.slane %v6390_v0, 5  ;;  %v6587_v48 = vcombine.low %v6068_v42, %v6075_v46 }
  0x6e   : > { %v1364_v7 = vsel %vm6262_vm6, %v1362_v49, %v1363_v44  ;;  %v1369_v33 = vrot.slane %v1367_v31, 4  ;;  %v4616_v61 = vrot.slane %v6403_v21, 9  ;;  %v1376_v8 = vrot.slane %v1374_v26, 4 }
  0x6f   : > { %v6590_v13 = vcombine.low %v1361_v23, %v1364_v7  ;;  %v1377_v9 = vrot.slane %v6431_v59, 5  ;;  %v1381_v34 = vrot.slane %v6462_v56, 5  ;;  %v1368_v42 = vsel %vm6262_vm6, %v4615_v11, %v1367_v31  ;;  %v6706_v31 = vld [vmem:[%s7386_s1 + $0x60] sm:$0xff]  }
  0x70   : > { %v1371_v46 = vsel %vm6262_vm6, %v1369_v33, %v1370_v47  ;;  %v6610_v0 = vcombine.low %v6086_v53, %v6089_v54  ;;  %v1375_v59 = vsel %vm6262_vm6, %v4616_v61, %v1374_v26  ;;  %v6616_v20 = vcombine.low %v6223_v19, %v6228_v32  ;;  %v5896_v53 = vld [vmem:[%s7386_s1 + $0x50] sm:$0xff]  }
  0x71   : > { %v4617_v39 = vrot.slane %v6444_v17, 9  ;;  %v1388_v22 = vrot.slane %v6492_v3, 5  ;;  %v6629_v54 = vcombine.low %v6256_v4, %v6276_v27  ;;  %v6631_v19 = vcombine.low %v1368_v42, %v1371_v46 }
  0x72   : > { %v1383_v32 = vrot.slane %v1381_v34, 4  ;;  %v1384_v24 = vrot.slane %v6469_v30, 5  ;;  %v6636_v57 = vcombine.low %v6301_v5, %v6313_v35  ;;  %v6640_v44 = vcombine.low %v6333_v1, %v6343_v12  ;;  %v259_v30 = vld [vmem:[%s6016_s6 + $0xc8] sm:$0x1] }
  0x73   : > { %v6644_v18 = vcombine.low %v6373_v45, %v6381_v58  ;;  %v6648_v4 = vcombine.low %v6403_v21, %v6413_v41  ;;  %v6652_v27 = vcombine.low %v6444_v17, %v6462_v56  ;;  %v6656_v5 = vcombine.low %v6105_v10, %v6113_v16  ;;  %v6667_v21 = vld [vmem:[%s6016_s6 + $0xc4] sm:$0xf]  ;;  %v5902_v10 = vld [vmem:[%s7386_s1 + $0x58] sm:$0xff]  }
  0x74   : > { %5264 = vmatmul.mubr.msk.bf16.vlgmr.msra.gmra.mrb[0].mxu1 %vm739_vm2, %v6064_v37  ;;  %5440 = vmatmul.mubr.msk.bf16.gmra.mrb[16].mxu0 %vm739_vm2, %v6581_v28  ;;  %v6662_v1 = vcombine.low %v6481_v43, %v6492_v3  ;;  %v4618_v12 = vrot.slane %v6481_v43, 9  ;;  %v1390_v58 = vrot.slane %v1388_v22, 4  ;;  %v1391_v45 = vrot.slane %v6500_v40, 5  ;;  %v6690_v3 = vld [vmem:[%s6016_s6 + $0xc0] sm:$0xf] }
  0x75   : > { %5296 = vmatpush3.bf16.msra.mxu1 %v6204_v55  ;;  %5267 = vmatprep.mubr.msk.bf16.mxu1 %vm739_vm2, %v6587_v48  ;;  %v1378_v55 = vsel %vm6262_vm6, %v1376_v8, %v1377_v9  ;;  %v1382_v16 = vsel %vm6262_vm6, %v4617_v39, %v1381_v34  ;;  %v1385_v41 = vsel %vm6262_vm6, %v1383_v32, %v1384_v24  ;;  %v2208_v40 = vrot.slane %v6667_v21, 5 }
  0x76   : > { %5443 = vmatprep.mubr.msk.bf16.mxu0 %vm739_vm2, %v6590_v13  ;;  %5297 = vmatprep.subr.bf16.mxu1 %v5890_v2  ;;  %v6658_v35 = vcombine.low %v1375_v59, %v1378_v55  ;;  %v1389_v17 = vsel %vm6262_vm6, %v4618_v12, %v1388_v22  ;;  %v1392_v56 = vsel %vm6262_vm6, %v1390_v58, %v1391_v45  ;;  %v1950_v26 = vshrl.u32 %v6690_v3, 16  ;;  %v7443_v22 = vld [vmem:[#allocation4_spill] sm:$0xff]  ;;  %v7444_v45 = vld [vmem:[#allocation17_spill] sm:$0xff] }
  0x77   : > { %v6695_v43 = vcombine.low %v6128_v36, %v6143_v51  ;;  %v6697_v60 = vcombine.low %v1382_v16, %v1385_v41  ;;  %v6701_v49 = vcombine.low %v6160_v6, %v6168_v15  ;;  %v1953_v23 = vshll.u32 %v6690_v3, 16  ;;  %v5910_v16 = vld [vmem:[%s7386_s1 + $0xf8] sm:$0xff]   ;;  %v5919_v41 = vld [vmem:[%s6016_s6 + $0x4] sm:$0xf] }
  0x78   : > { %v1959_v7 = vshll.u32 %v6667_v21, 16  ;;  %v1963_v36 = vshrl.u32 %v6667_v21, 16  ;;  %v6712_v51 = vcombine.low %v1389_v17, %v1392_v56  ;;  %v4721_v11 = vrot.slane %v6690_v3, 9  ;;  %v5914_v17 = vld [vmem:[%s7386_s1 + $0x100] sm:$0xff]   ;;  %v5920_v56 = vld [vmem:[%s6016_s6 + $0x8] sm:$0x1] }
  0x79   : > { %5298 = vmatpush3.bf16.msra.mxu1 %v5890_v2  ;;  %v2210_v6 = vrot.slane %v2208_v40, 4  ;;  %v2211_v15 = vrot.slane %v259_v30, 5  ;;  %v1952_v33 = vrot.slane %v1950_v26, 4  ;;  %v1955_v47 = vrot.slane %v1953_v23, 5  ;;  %v5921_v26 = vld [vmem:[%s6016_s6] sm:$0xf] }
  0x7a   : > { %5299 = vmatprep.subr.bf16.mxu1 %v5896_v53  ;;  %v1961_v61 = vrot.slane %v1959_v7, 5  ;;  %v1965_v2 = vrot.slane %v1963_v36, 4  ;;  %v1969_v34 = vshll.u32 %v259_v30, 16  ;;  %v2209_v42 = vsel %vm6262_vm6, %v4721_v11, %v2208_v40 }
  0x7b   : > { %v1956_v8 = vor.u32 %v1955_v47, %v1952_v33  ;;  %v2212_v46 = vsel %vm6262_vm6, %v2210_v6, %v2211_v15  ;;  %v1283_v40 = vrot.slane %v5919_v41, 5  ;;  %v1286_v30 = vrot.slane %v5920_v56, 5  ;;  %v5909_v15 = vld [vmem:[%s7386_s1 + $0x68] sm:$0xff]   ;;  %v7445_v33 = vld [vmem:[#allocation9_spill] sm:$0xff]  ;;  %v7457_v41 = vld [vmem:[#allocation10_spill] sm:$0xff] }
  0x7c   : > { %5268 = vmatmul.mubr.msk.bf16.gmra.mrb[4].mxu1 %vm739_vm2, %v6610_v0  ;;  %5444 = vmatmul.mubr.msk.bf16.gmra.mrb[20].mxu0 %vm739_vm2, %v6631_v19  ;;  %v1966_v9 = vor.u32 %v1965_v2, %v1961_v61  ;;  %v1971_v39 = vrot.slane %v1969_v34, 5  ;;  %v6732_v32 = vcombine.low %v2209_v42, %v2212_v46  ;;  %v4603_v23 = vrot.slane %v5921_v26, 9  ;;  %v7446_v47 = vld [vmem:[#allocation11_spill] sm:$0xff]  ;;  %v5915_v2 = vld [vmem:[%s7386_s1 + $0x78] sm:$0xff]   ;;  %v5922_v34 = vld [vmem:[%s7386_s1 + $0x80] sm:$0xff]  }
  0x7d   : > { %5271 = vmatprep.mubr.msk.bf16.mxu1 %vm739_vm2, %v6656_v5  ;;  %5447 = vmatprep.mubr.msk.bf16.mxu0 %vm739_vm2, %v6658_v35  ;;  %v1957_v59 = vrot.slane %v1956_v8, 4  ;;  %v1285_v7 = vrot.slane %v1283_v40, 4  ;;  %v7447_v8 = vld [vmem:[#allocation13_spill] sm:$0xff]  ;;  %v7449_v42 = vld [vmem:[#allocation19_spill] sm:$0xff]  ;;  %v7460_v56 = vld [vmem:[#allocation16_spill] sm:$0xff] }
  0x7e   : > { %5300 = vmatpush3.bf16.msra.mxu1 %v5896_v53  ;;  %v1967_v55 = vrot.slane %v1966_v9, 4  ;;  %v6730_v53 = vcombine.low %v7443_v22, %v6199_v52  ;;  %v5903_v52 = vld [vmem:[%s7386_s1 + $0xe8] sm:$0xff]   ;;  %v1284_v36 = vsel %vm6262_vm6, %v4603_v23, %v1283_v40  ;;  %v6827_v9 = vcombine.low %v6690_v3, %v6667_v21  ;;  %v7450_v46 = vld [vmem:[#allocation21_spill] sm:$0xff]  ;;  %v6844_v3 = vld [vmem:[%s6016_s6 + $0xd0] sm:$0xf] }
  0x7f   : > { %5301 = vmatprep.subr.bf16.mxu1 %v5902_v10  ;;  %v1962_v24 = vsel %vm6055_vm3, %v1957_v59, %v1961_v61  ;;  %v1287_v11 = vsel %vm6262_vm6, %v1285_v7, %v1286_v30  ;;  %v5913_v61 = vld [vmem:[%s7386_s1 + $0x70] sm:$0xff]   ;;  %v6841_v21 = vld [vmem:[%s6016_s6 + $0xcc] sm:$0xf]  ;;  %v2693_v23 = vshrl.u32 %v6844_v3, 16  ;;  %v7461_v7 = vld [vmem:[#allocation18_spill] sm:$0xff]  ;;  %v2938_v29 = vrot.slane %v6844_v3, 5 }
  0x80   : > { %v1972_v12 = vsel %vm6055_vm3, %v1967_v55, %v1971_v39  ;;  %v4627_v6 = vcombine.low %v1284_v36, %v1287_v11  ;;  %v4759_v59 = vcombine.low %v6841_v21, %v6844_v3  ;;  %v7451_v55 = vld [vmem:[#allocation2_spill] sm:$0xff]  ;;  %v5916_v39 = vld [vmem:[%s7386_s1 + $0x108] sm:$0xff]   ;;  %v7458_v40 = vld [vmem:[#allocation12_spill] sm:$0xff]  ;;  %v2680_v30 = vshrl.u32 %v6841_v21, 16 }
  0x81   : > { %v6738_v58 = vcombine.low %v1962_v24, %v1972_v12  ;;  %v7452_v22 = vld [vmem:[#allocation3_spill] sm:$0xff]  ;;  %v7453_v24 = vld [vmem:[#allocation5_spill] sm:$0xff]  ;;  %v5917_v12 = vld [vmem:[%s7386_s1 + $0x110] sm:$0xff]   ;;  %v2683_v26 = vshll.u32 %v6841_v21, 16 }
  0x82   : > { %5302 = vmatpush3.bf16.msra.mxu1 %v5902_v10  ;;  %v5908_v10 = vld [vmem:[%s7386_s1 + $0xf0] sm:$0xff]   ;;  %v2682_v36 = vrot.slane %v2680_v30, 4 }
  0x83   : > { %5335 = vmatprep.subr.bf16.mxu1 %v6706_v31  ;;  %v2685_v11 = vrot.slane %v2683_v26, 5 }
  0x84   : > { %5272 = vmatmul.mubr.msk.bf16.gmra.mrb[8].mxu1 %vm739_vm2, %v6695_v43  ;;  %5448 = vmatmul.mubr.msk.bf16.gmra.mrb[24].mxu0 %vm739_vm2, %v6697_v60 }
  0x85   : > { %5275 = vmatprep.mubr.msk.bf16.mxu1 %vm739_vm2, %v6701_v49  ;;  %5451 = vmatprep.mubr.msk.bf16.mxu0 %vm739_vm2, %v6712_v51 }
  0x8c   : > { %5276 = vmatmul.mubr.msk.bf16.gmra.mrb[12].mxu1 %vm739_vm2, %v6730_v53  ;;  %5452 = vmatmul.mubr.msk.bf16.gmra.mrb[28].mxu0 %vm739_vm2, %v6732_v32 }
  0x8d   : > { %5279 = vmatprep.mubr.msk.bf16.mxu1 %vm739_vm2, %v6616_v20  ;;  %5463 = vmatprep.mubr.msk.bf16.mxu0 %vm739_vm2, %v6587_v48 }
  0x94   : > { %5280 = vmatmul.mubr.msk.bf16.gmra.mrb[16].mxu1 %vm739_vm2, %v6629_v54  ;;  %5464 = vmatmul.mubr.msk.bf16.vlgmr.msra.gmra.mrb[0].mxu0 %vm739_vm2, %v6610_v0 }
  0x95   : > { %5496 = vmatpush3.bf16.msra.mxu0 %v7444_v45  ;;  %5283 = vmatprep.mubr.msk.bf16.mxu1 %vm739_vm2, %v6636_v57  ;;  %v7454_v45 = vld [vmem:[#allocation6_spill] sm:$0xff] }
  0x96   : > { %5467 = vmatprep.mubr.msk.bf16.mxu0 %vm739_vm2, %v6656_v5  ;;  %5497 = vmatprep.subr.bf16.mxu0 %v5903_v52 }
  0x99   : > { %5498 = vmatpush3.bf16.msra.mxu0 %v5903_v52  ;;  %v5918_v52 = vld [vmem:[%s7386_s1 + $0x118] sm:$0xff]  }
  0x9a   : > { %5499 = vmatprep.subr.bf16.mxu0 %v5908_v10 }
  0x9c   : > { %5284 = vmatmul.mubr.msk.bf16.gmra.mrb[20].mxu1 %vm739_vm2, %v6640_v44  ;;  %5468 = vmatmul.mubr.msk.bf16.gmra.mrb[4].mxu0 %vm739_vm2, %v6695_v43 }
  0x9d   : > { %5287 = vmatprep.mubr.msk.bf16.mxu1 %vm739_vm2, %v6644_v18  ;;  %5471 = vmatprep.mubr.msk.bf16.mxu0 %vm739_vm2, %v6701_v49 }
  0x9e   : > { %5500 = vmatpush3.bf16.msra.mxu0 %v5908_v10  ;;  %v7455_v10 = vld [vmem:[#allocation7_spill] sm:$0xff] }
  0x9f   : > { %5501 = vmatprep.subr.bf16.mxu0 %v5910_v16 }
  0xa2   : > { %5502 = vmatpush3.bf16.msra.mxu0 %v5910_v16  ;;  %v7456_v16 = vld [vmem:[#allocation8_spill] sm:$0xff] }
  0xa3   : > { %5535 = vmatprep.subr.bf16.mxu0 %v5914_v17 }
  0xa4   : > { %5288 = vmatmul.mubr.msk.bf16.gmra.mrb[24].mxu1 %vm739_vm2, %v6648_v4  ;;  %5472 = vmatmul.mubr.msk.bf16.gmra.mrb[8].mxu0 %vm739_vm2, %v6730_v53 }
  0xa5   : > { %5291 = vmatprep.mubr.msk.bf16.mxu1 %vm739_vm2, %v6652_v27  ;;  %5475 = vmatprep.mubr.msk.bf16.mxu0 %vm739_vm2, %v6616_v20 }
  0xac   : > { %5292 = vmatmul.mubr.msk.bf16.gmra.mrb[28].mxu1 %vm739_vm2, %v6662_v1  ;;  %5476 = vmatmul.mubr.msk.bf16.gmra.mrb[12].mxu0 %vm739_vm2, %v6629_v54 }
  0xad   : > { %5303 = vmatprep.mubr.msk.bf16.mxu1 %vm739_vm2, %v4627_v6  ;;  %5479 = vmatprep.mubr.msk.bf16.mxu0 %vm739_vm2, %v6636_v57 }
  0xb4   : > { %5304 = vmatmul.mubr.msk.bf16.vlgmr.msra.gmra.mrb[0].mxu1 %vm739_vm2, %v7445_v33  ;;  %5480 = vmatmul.mubr.msk.bf16.gmra.mrb[16].mxu0 %vm739_vm2, %v6640_v44  ;;  %v6912_v33 = vld [vmem:[%s6016_s6 + $0xd4] sm:$0x1] }
  0xb5   : > { %5336 = vmatpush3.bf16.msra.mxu1 %v6706_v31  ;;  %5307 = vmatprep.mubr.msk.bf16.mxu1 %vm739_vm2, %v7446_v47  ;;  %v7448_v31 = vld [vmem:[#allocation15_spill] sm:$0xff] }
  0xb6   : > { %5483 = vmatprep.mubr.msk.bf16.mxu0 %vm739_vm2, %v6644_v18  ;;  %5337 = vmatprep.subr.bf16.mxu1 %v5909_v15 }
  0xb9   : > { %5338 = vmatpush3.bf16.msra.mxu1 %v5909_v15  ;;  %v2695_v15 = vrot.slane %v2693_v23, 4 }
  0xba   : > { %5339 = vmatprep.subr.bf16.mxu1 %v5913_v61 }
  0xbc   : > { %5308 = vmatmul.mubr.msk.bf16.gmra.mrb[4].mxu1 %vm739_vm2, %v7447_v8  ;;  %5484 = vmatmul.mubr.msk.bf16.gmra.mrb[20].mxu0 %vm739_vm2, %v6648_v4 }
  0xbd   : > { %5311 = vmatprep.mubr.msk.bf16.mxu1 %vm739_vm2, %v7448_v31  ;;  %5487 = vmatprep.mubr.msk.bf16.mxu0 %vm739_vm2, %v6652_v27 }
  0xbe   : > { %5340 = vmatpush3.bf16.msra.mxu1 %v5913_v61  ;;  %v7462_v61 = vld [vmem:[#allocation20_spill] sm:$0xff] }
  0xbf   : > { %5341 = vmatprep.subr.bf16.mxu1 %v5915_v2 }
  0xc2   : > { %5342 = vmatpush3.bf16.msra.mxu1 %v5915_v2  ;;  %v2686_v2 = vor.u32 %v2685_v11, %v2682_v36 }
  0xc3   : > { %5575 = vmatprep.subr.bf16.mxu1 %v5922_v34 }
  0xc4   : > { %5312 = vmatmul.mubr.msk.bf16.gmra.mrb[8].mxu1 %vm739_vm2, %v7449_v42  ;;  %5488 = vmatmul.mubr.msk.bf16.gmra.mrb[24].mxu0 %vm739_vm2, %v6662_v1 }
  0xc5   : > { %5315 = vmatprep.mubr.msk.bf16.mxu1 %vm739_vm2, %v7450_v46  ;;  %5491 = vmatprep.mubr.msk.bf16.mxu0 %vm739_vm2, %v6827_v9 }
  0xcc   : > { %5316 = vmatmul.mubr.msk.bf16.gmra.mrb[12].mxu1 %vm739_vm2, %v6524_v50  ;;  %5492 = vmatmul.mubr.msk.bf16.gmra.mrb[28].mxu0 %vm739_vm2, %v4759_v59  ;;  %v2699_v59 = vshll.u32 %v6912_v33, 16 }
  0xcd   : > { %5319 = vmatprep.mubr.msk.bf16.mxu1 %vm739_vm2, %v6555_v62  ;;  %5503 = vmatprep.mubr.msk.bf16.mxu0 %vm739_vm2, %v7451_v55  ;;  %v5925_v55 = vld [vmem:[%s7386_s1 + $0x98] sm:$0xff]  }
  0xd4   : > { %5320 = vmatmul.mubr.msk.bf16.gmra.mrb[16].mxu1 %vm739_vm2, %v6559_v38  ;;  %5504 = vmatmul.mubr.msk.bf16.vlgmr.msra.gmra.mrb[0].mxu0 %vm739_vm2, %v7452_v22  ;;  %v2701_v22 = vrot.slane %v2699_v59, 5 }
  0xd5   : > { %5536 = vmatpush3.bf16.msra.mxu0 %v5914_v17  ;;  %5323 = vmatprep.mubr.msk.bf16.mxu1 %vm739_vm2, %v6581_v28  ;;  %v7459_v17 = vld [vmem:[#allocation14_spill] sm:$0xff] }
  0xd6   : > { %5507 = vmatprep.mubr.msk.bf16.mxu0 %vm739_vm2, %v7453_v24  ;;  %5537 = vmatprep.subr.bf16.mxu0 %v5916_v39 }
  0xd9   : > { %5538 = vmatpush3.bf16.msra.mxu0 %v5916_v39 }
  0xda   : > { %5539 = vmatprep.subr.bf16.mxu0 %v5917_v12 }
  0xdc   : > { %5324 = vmatmul.mubr.msk.bf16.gmra.mrb[20].mxu1 %vm739_vm2, %v6590_v13  ;;  %5508 = vmatmul.mubr.msk.bf16.gmra.mrb[4].mxu0 %vm739_vm2, %v7454_v45 }
  0xdd   : > { %5327 = vmatprep.mubr.msk.bf16.mxu1 %vm739_vm2, %v6631_v19  ;;  %5511 = vmatprep.mubr.msk.bf16.mxu0 %vm739_vm2, %v7455_v10 }
  0xde   : > { %5540 = vmatpush3.bf16.msra.mxu0 %v5917_v12 }
  0xdf   : > { %5541 = vmatprep.subr.bf16.mxu0 %v5918_v52 }
  0xe2   : > { %5542 = vmatpush3.bf16.msra.mxu0 %v5918_v52 }
  0xe4   : > { %5328 = vmatmul.mubr.msk.bf16.gmra.mrb[24].mxu1 %vm739_vm2, %v6658_v35  ;;  %5512 = vmatmul.mubr.msk.bf16.gmra.mrb[8].mxu0 %vm739_vm2, %v7456_v16 }
  0xe5   : > { %5331 = vmatprep.mubr.msk.bf16.mxu1 %vm739_vm2, %v6697_v60  ;;  %5515 = vmatprep.mubr.msk.bf16.mxu0 %vm739_vm2, %v7457_v41 }
  0xec   : > { %5332 = vmatmul.mubr.msk.bf16.gmra.mrb[28].mxu1 %vm739_vm2, %v6712_v51  ;;  %5516 = vmatmul.mubr.msk.bf16.gmra.mrb[12].mxu0 %vm739_vm2, %v7458_v40 }
  0xed   : > { %5343 = vmatprep.mubr.msk.bf16.mxu1 %vm739_vm2, %v6064_v37  ;;  %5519 = vmatprep.mubr.msk.bf16.mxu0 %vm739_vm2, %v7459_v17  ;;  %v2689_v37 = vshll.u32 %v6844_v3, 16 }
  0xef   : > { %v2691_v6 = vrot.slane %v2689_v37, 5 }
  0xf4   : > { %5344 = vmatmul.mubr.msk.bf16.vlgmr.msra.gmra.mrb[0].mxu1 %vm739_vm2, %v6587_v48  ;;  %5520 = vmatmul.mubr.msk.bf16.gmra.mrb[16].mxu0 %vm739_vm2, %v7460_v56  ;;  %v5923_v48 = vld [vmem:[%s7386_s1 + $0x88] sm:$0xff]  }
  0xf5   : > { %5579 = vmatpush3.bf16.msra.mxu1 %v5922_v34  ;;  %5347 = vmatprep.mubr.msk.bf16.mxu1 %vm739_vm2, %v6610_v0  ;;  %v5924_v0 = vld [vmem:[%s7386_s1 + $0x90] sm:$0xff]   ;;  %v2696_v34 = vor.u32 %v2695_v15, %v2691_v6 }
  0xf6   : > { %5523 = vmatprep.mubr.msk.bf16.mxu0 %vm739_vm2, %v7461_v7  ;;  %5576 = vmatprep.subr.bf16.mxu1 %v5923_v48 }
  0xf7   : > { %v2697_v39 = vrot.slane %v2696_v34, 4 }
  0xf9   : > { %5580 = vmatpush3.bf16.msra.mxu1 %v5923_v48  ;;  %v2702_v24 = vsel %vm6055_vm3, %v2697_v39, %v2701_v22 }
  0xfa   : > { %5577 = vmatprep.subr.bf16.mxu1 %v5924_v0 }
  0xfc   : > { %5348 = vmatmul.mubr.msk.bf16.gmra.mrb[4].mxu1 %vm739_vm2, %v6656_v5  ;;  %5524 = vmatmul.mubr.msk.bf16.gmra.mrb[20].mxu0 %vm739_vm2, %v7462_v61  ;;  %v2687_v5 = vrot.slane %v2686_v2, 4 }
  0xfd   : > { %5351 = vmatprep.mubr.msk.bf16.mxu1 %vm739_vm2, %v6695_v43  ;;  %5527 = vmatprep.mubr.msk.bf16.mxu0 %vm739_vm2, %v6526_v63 }
  0xfe   : > { %5581 = vmatpush3.bf16.msra.mxu1 %v5924_v0  ;;  %v2692_v43 = vsel %vm6055_vm3, %v2687_v5, %v2691_v6 }
  0xff   : > { %5578 = vmatprep.subr.bf16.mxu1 %v5925_v55  ;;  %v4788_v12 = vcombine.low %v2692_v43, %v2702_v24 }
 0x102   : > { %5582 = vmatpush3.bf16.msra.mxu1 %v5925_v55 }
 0x104   : > { %5352 = vmatmul.mubr.msk.bf16.gmra.mrb[8].mxu1 %vm739_vm2, %v6701_v49  ;;  %5528 = vmatmul.mubr.msk.bf16.gmra.mrb[24].mxu0 %vm739_vm2, %v6553_v25 }
 0x105   : > { %5355 = vmatprep.mubr.msk.bf16.mxu1 %vm739_vm2, %v6730_v53  ;;  %5531 = vmatprep.mubr.msk.bf16.mxu0 %vm739_vm2, %v6738_v58 }
 0x10c   : > { %5356 = vmatmul.mubr.msk.bf16.gmra.mrb[12].mxu1 %vm739_vm2, %v6616_v20  ;;  %5532 = vmatmul.mubr.msk.bf16.gmra.mrb[28].mxu0 %vm739_vm2, %v4788_v12 }
 0x10d   : > { %5359 = vmatprep.mubr.msk.bf16.mxu1 %vm739_vm2, %v6629_v54  ;;  %5543 = vmatprep.mubr.msk.bf16.mxu0 %vm739_vm2, %v7446_v47 }
 0x114   : > { %5360 = vmatmul.mubr.msk.bf16.gmra.mrb[16].mxu1 %vm739_vm2, %v6636_v57  ;;  %5544 = vmatmul.mubr.msk.bf16.vlgmr.msra.gmra.mrb[0].mxu0 %vm739_vm2, %v7447_v8 }
 0x115   : > { %5363 = vmatprep.mubr.msk.bf16.mxu1 %vm739_vm2, %v6640_v44  ;;  %5547 = vmatprep.mubr.msk.bf16.mxu0 %vm739_vm2, %v7448_v31  ;;  %v4903_v31 = vld [vmem:[%s7387_s2] ss:$0 sm:$0xff] }
 0x11c   : > { %5364 = vmatmul.mubr.msk.bf16.gmra.mrb[20].mxu1 %vm739_vm2, %v6644_v18  ;;  %5548 = vmatmul.mubr.msk.bf16.gmra.mrb[4].mxu0 %vm739_vm2, %v7449_v42 }
 0x11d   : > { %5367 = vmatprep.mubr.msk.bf16.mxu1 %vm739_vm2, %v6648_v4  ;;  %5551 = vmatprep.mubr.msk.bf16.mxu0 %vm739_vm2, %v7450_v46  ;;  %v3805_v46 = vcombine.high %v4903_v31, %v4903_v31 }
 0x124   : > { %5368 = vmatmul.mubr.msk.bf16.gmra.mrb[24].mxu1 %vm739_vm2, %v6652_v27  ;;  %5552 = vmatmul.mubr.msk.bf16.gmra.mrb[8].mxu0 %vm739_vm2, %v6524_v50  ;;  %v4809_v50 = vrot.slane %v6841_v21, 9 }
 0x125   : > { %5371 = vmatprep.mubr.msk.bf16.mxu1 %vm739_vm2, %v6662_v1  ;;  %5555 = vmatprep.mubr.msk.bf16.mxu0 %vm739_vm2, %v6555_v62  ;;  %v2940_v62 = vrot.slane %v2938_v29, 4 }
 0x12c   : > { %5372 = vmatmul.mubr.msk.bf16.gmra.mrb[28].mxu1 %vm739_vm2, %v6827_v9  ;;  %5556 = vmatmul.mubr.msk.bf16.gmra.mrb[12].mxu0 %vm739_vm2, %v6559_v38  ;;  %v2941_v38 = vrot.slane %v6912_v33, 5 }
 0x12d   : > { %5399 = vmatprep.mubr.msk.bf16.mxu1 %vm739_vm2, %v7458_v40  ;;  %5559 = vmatprep.mubr.msk.bf16.mxu0 %vm739_vm2, %v6581_v28  ;;  %v2939_v28 = vsel %vm6262_vm6, %v4809_v50, %v2938_v29 }
 0x134   : > { %5400 = vmatmul.mubr.msk.bf16.vlgmr.msra.gmra.mrb[16].mxu1 %vm739_vm2, %v7459_v17  ;;  %5560 = vmatmul.mubr.msk.bf16.gmra.mrb[16].mxu0 %vm739_vm2, %v6590_v13  ;;  %v2942_v13 = vsel %vm6262_vm6, %v2940_v62, %v2941_v38 }
 0x135   : > { %5403 = vmatprep.mubr.msk.bf16.mxu1 %vm739_vm2, %v7460_v56  ;;  %5563 = vmatprep.mubr.msk.bf16.mxu0 %vm739_vm2, %v6631_v19  ;;  %v4818_v20 = vcombine.low %v2939_v28, %v2942_v13 }
 0x13c   : > { %5404 = vmatmul.mubr.msk.bf16.gmra.mrb[20].mxu1 %vm739_vm2, %v7461_v7  ;;  %5564 = vmatmul.mubr.msk.bf16.gmra.mrb[20].mxu0 %vm739_vm2, %v6658_v35 }
 0x13d   : > { %5407 = vmatprep.mubr.msk.bf16.mxu1 %vm739_vm2, %v7462_v61  ;;  %5567 = vmatprep.mubr.msk.bf16.mxu0 %vm739_vm2, %v6697_v60  ;;  %v5950_v60 = vmov 1983009808  }
 0x13e   : > { %v3209_v49 = vunpack.c.l.s4 %v5950_v60 }
 0x144   : > { %5408 = vmatmul.mubr.msk.bf16.gmra.mrb[24].mxu1 %vm739_vm2, %v6526_v63  ;;  %5568 = vmatmul.mubr.msk.bf16.gmra.mrb[24].mxu0 %vm739_vm2, %v6712_v51  ;;  %v3211_v51 = vlaneseq }
 0x145   : > { %5411 = vmatprep.mubr.msk.bf16.mxu1 %vm739_vm2, %v6553_v25  ;;  %5571 = vmatprep.mubr.msk.bf16.mxu0 %vm739_vm2, %v6732_v32 }
 0x146   : > { %v3212_v47 = vshrl.u32 %v3211_v51, 7 }
 0x14c   : > { %5412 = vmatmul.mubr.msk.bf16.gmra.mrb[28].mxu1 %vm739_vm2, %v6738_v58  ;;  %5572 = vmatmul.mubr.msk.bf16.gmra.mrb[28].mxu0 %vm739_vm2, %v4818_v20  ;;  %v3210_v58 = vunpack.c.0.s8 %v3209_v49 }
 0x14e   : > { %v7037_v42 = vsub.s32 %v3210_v58, %v3212_v47 }
 0x150   : > { %v7040_v21 = vrot.slane %v4903_v31, %v7037_v42  ;;  %v7043_v10 = vrot.slane %v3805_v46, %v7037_v42 }
 0x152   : > { %v7047_v40 = vcombine.high %v7040_v21, %v7040_v21  ;;  %v7051_v23 = vcombine.high %v7043_v10, %v7043_v10  ;;  %v7055_v36 = vrot.slane %v7040_v21, 1  ;;  %v7063_v34 = vrot.slane %v7043_v10, 1 }
 0x154   : > { %v7058_v11 = vrot.slane %v7047_v40, 1  ;;  %v7066_v59 = vrot.slane %v7051_v23, 1 }
 0x1c7   : > { %v5345_v63 = vpop.f32.mrb[0].mxu1 }
 0x1c8   : > { %v1790_v54 = vpop.f32.mrb[1].mxu1 }
 0x1c9   : > { %v5346_v19 = vpop.f32.mrb[2].mxu1 }
 0x1ca   : > { %v1793_v57 = vpop.f32.mrb[3].mxu1 }
 0x1cf   : > { %v5349_v25 = vpop.f32.mrb[4].mxu1 }
 0x1d0   : > { %v1806_v44 = vpop.f32.mrb[5].mxu1 }
 0x1d1   : > { %v7014_v18 = vpop.f32.mrb[6].mxu1 }
 0x1d2   : > { %v7016_v4 = vpop.f32.mrb[7].mxu1 }
 0x1d7   : > { %v7018_v27 = vpop.f32.mrb[8].mxu1 }
 0x1d8   : > { %v7020_v14 = vpop.f32.mrb[9].mxu1 }
 0x1d9   : > { %v7022_v35 = vpop.f32.mrb[10].mxu1 }
 0x1da   : > { %v7024_v1 = vpop.f32.mrb[11].mxu1 }
 0x1df   : > { %v7026_v53 = vpop.f32.mrb[12].mxu1 }
 0x1e0   : > { %v7028_v32 = vpop.f32.mrb[13].mxu1 }
 0x1e1   : > { %v7030_v8 = vpop.f32.mrb[14].mxu1 }
 0x1e2   : > { %v7035_v9 = vpop.f32.mrb[15].mxu1 }
 0x1e7   : > { %v5545_v3 = vpop.f32.mrb[0].mxu0 }
 0x1e8   : > { %v5583_v52 = vadd.f32 %v5545_v3, %v5345_v63  ;;  %v3016_v45 = vpop.f32.mrb[1].mxu0 }
 0x1e9   : > { %v5584_v16 = vadd.f32 %v3016_v45, %v1790_v54  ;;  %v5546_v41 = vpop.f32.mrb[2].mxu0 }
 0x1ea   : > { %v5585_v17 = vadd.f32 %v5546_v41, %v5346_v19  ;;  %v3019_v56 = vpop.f32.mrb[3].mxu0 }
 0x1eb   : > { %v3175_v30 = vmax.f32 %v5584_v16, %v5583_v52  ;;  %v5586_v26 = vadd.f32 %v3019_v56, %v1793_v57 }
 0x1ed   : > { %v3207_v37 = vcombine.high %v3175_v30, %v3175_v30  ;;  %v3214_v7 = vrot.slane %v3175_v30, %v7037_v42  ;;  %v3176_v48 = vmax.f32 %v5586_v26, %v5585_v17 }
 0x1ef   : > { %v3221_v6 = vrot.slane %v3207_v37, %v7037_v42  ;;  %v3222_v15 = vcombine.high %v3214_v7, %v3214_v7  ;;  %v4839_v33 = vrot.slane %v3214_v7, 9  ;;  %v3224_v0 = vcombine.high %v3176_v48, %v3176_v48  ;;  %v5549_v61 = vpop.f32.mrb[4].mxu0 }
 0x1f0   : > { %v3231_v2 = vrot.slane %v3176_v48, %v7037_v42  ;;  %v5587_v55 = vadd.f32 %v5549_v61, %v5349_v25  ;;  %v3032_v5 = vpop.f32.mrb[5].mxu0 }
 0x1f1   : > { %v3223_v39 = vcombine.high %v3221_v6, %v3221_v6  ;;  %v4840_v22 = vrot.slane %v3222_v15, 9  ;;  %v4841_v43 = vrot.slane %v3221_v6, 9  ;;  %v3735_v24 = vmax.f32 %v3214_v7, %v4839_v33  ;;  %v7068_v12 = vpop.f32.mrb[6].mxu0 }
 0x1f2   : > { %v3238_v29 = vrot.slane %v3224_v0, %v7037_v42  ;;  %v3239_v50 = vcombine.high %v3231_v2, %v3231_v2  ;;  %v4843_v62 = vrot.slane %v3231_v2, 9  ;;  %v5588_v38 = vadd.f32 %v3032_v5, %v1806_v44  ;;  %v7071_v28 = vpop.f32.mrb[7].mxu0 }
 0x1f3   : > { %v4842_v13 = vrot.slane %v3223_v39, 9  ;;  %v3736_v20 = vmax.f32 %v3222_v15, %v4840_v22  ;;  %v3737_v63 = vmax.f32 %v3221_v6, %v4841_v43  ;;  %v3834_v54 = vadd.f32 %v7040_v21, %v3735_v24 }
 0x1f4   : > { %v3240_v19 = vcombine.high %v3238_v29, %v3238_v29  ;;  %v4844_v57 = vrot.slane %v3239_v50, 9  ;;  %v4845_v25 = vrot.slane %v3238_v29, 9  ;;  %v3739_v60 = vmax.f32 %v3231_v2, %v4843_v62 }
 0x1f5   : > { %v3738_v49 = vmax.f32 %v3223_v39, %v4842_v13  ;;  %v3835_v51 = vadd.f32 %v7055_v36, %v3736_v20  ;;  %v3836_v58 = vadd.f32 %v7047_v40, %v3737_v63  ;;  %v3898_v47 = vmax.f32 %v3834_v54, 0.0 }
 0x1f6   : > { %v4846_v44 = vrot.slane %v3240_v19, 9  ;;  %v3740_v31 = vmax.f32 %v3239_v50, %v4844_v57  ;;  %v3741_v46 = vmax.f32 %v3238_v29, %v4845_v25  ;;  %v3838_v3 = vadd.f32 %v7043_v10, %v3739_v60 }
 0x1f7   : > { %v3837_v52 = vadd.f32 %v7058_v11, %v3738_v49  ;;  %v3899_v45 = vmax.f32 %v3835_v51, 0.0  ;;  %v3900_v16 = vmax.f32 %v3836_v58, 0.0  ;;  %v4971_v41 = vpack.c.bf16 %v3898_v47, %v3898_v47  ;;  %v7078_v17 = vpop.f32.mrb[8].mxu0 }
 0x1f8   : > { %v3742_v56 = vmax.f32 %v3240_v19, %v4846_v44  ;;  %v3839_v30 = vadd.f32 %v7063_v34, %v3740_v31  ;;  %v3840_v26 = vadd.f32 %v7051_v23, %v3741_v46  ;;  %v3902_v37 = vmax.f32 %v3838_v3, 0.0  ;;  %v7082_v7 = vpop.f32.mrb[9].mxu0 }
 0x1f9   : > { %v3901_v48 = vmax.f32 %v3837_v52, 0.0  ;;  %v4972_v6 = vpack.c.bf16 %v3899_v45, %v3899_v45  ;;  %v4973_v15 = vpack.c.bf16 %v3900_v16, %v3900_v16  ;;  %v4218_v33 = vunpack.c.l.b16 %v4971_v41  ;;  %v7084_v0 = vpop.f32.mrb[10].mxu0 }
 0x1fa   : > { %v3841_v61 = vadd.f32 %v7066_v59, %v3742_v56  ;;  %v3903_v2 = vmax.f32 %v3839_v30, 0.0  ;;  %v3904_v5 = vmax.f32 %v3840_v26, 0.0  ;;  %v4975_v39 = vpack.c.bf16 %v3902_v37, %v3902_v37  ;;  %v7087_v22 = vpop.f32.mrb[11].mxu0 }
 0x1fb   : > { %v4974_v43 = vpack.c.bf16 %v3901_v48, %v3901_v48  ;;  %v4219_v24 = vunpack.c.l.b16 %v4972_v6  ;;  %v4220_v29 = vunpack.c.l.b16 %v4973_v15  ;;  %v3177_v50 = vmax.f32 %v5588_v38, %v5587_v55 }
 0x1fc   : > { %v3905_v62 = vmax.f32 %v3841_v61, 0.0  ;;  %v4976_v13 = vpack.c.bf16 %v3903_v2, %v3903_v2  ;;  %v4977_v20 = vpack.c.bf16 %v3904_v5, %v3904_v5  ;;  %v4222_v63 = vunpack.c.l.b16 %v4975_v39 }
 0x1fd   : > { %v4221_v54 = vunpack.c.l.b16 %v4974_v43  ;;  %v4282_v19 = vrot.slane %v4219_v24, 7  ;;  %v4285_v57 = vrot.slane %v4220_v29, 6  ;;  %v3241_v25 = vcombine.high %v3177_v50, %v3177_v50 }
 0x1fe   : > { %v4978_v60 = vpack.c.bf16 %v3905_v62, %v3905_v62  ;;  %v4223_v49 = vunpack.c.l.b16 %v4976_v13  ;;  %v4224_v51 = vunpack.c.l.b16 %v4977_v20  ;;  %v4291_v58 = vrot.slane %v4222_v63, 4 }
 0x1ff   : > { %v4284_v47 = vsel %vm4283_vm7, %v4282_v19, %v4218_v33  ;;  %v4288_v44 = vrot.slane %v4221_v54, 5  ;;  %v3248_v31 = vrot.slane %v3177_v50, %v7037_v42  ;;  %v3255_v55 = vrot.slane %v3241_v25, %v7037_v42  ;;  %v7092_v38 = vpop.f32.mrb[12].mxu0 }
 0x200   : > { %v4287_v46 = vsel %vm4286_vm8, %v4285_v57, %v4284_v47  ;;  %v4225_v3 = vunpack.c.l.b16 %v4978_v60  ;;  %v4294_v52 = vrot.slane %v4223_v49, 3  ;;  %v4297_v45 = vrot.slane %v4224_v51, 2  ;;  %v7095_v16 = vpop.f32.mrb[13].mxu0 }
 0x201   : > { %v4290_v41 = vsel %vm4289_vm9, %v4288_v44, %v4287_v46  ;;  %v3256_v56 = vcombine.high %v3248_v31, %v3248_v31  ;;  %v3257_v30 = vcombine.high %v3255_v55, %v3255_v55  ;;  %v4847_v26 = vrot.slane %v3248_v31, 9  ;;  %v7098_v37 = vpop.f32.mrb[14].mxu0 }
 0x202   : > { %v4293_v48 = vsel %vm4292_vm10, %v4291_v58, %v4290_v41  ;;  %v4300_v6 = vrot.slane %v4225_v3, 1  ;;  %v4849_v15 = vrot.slane %v3255_v55, 9  ;;  %v5589_v33 = vadd.f32 %v7068_v12, %v7014_v18  ;;  %v7104_v61 = vpop.f32.mrb[15].mxu0 }
 0x203   : > { %v4296_v2 = vsel %vm4295_vm11, %v4294_v52, %v4293_v48  ;;  %v4848_v5 = vrot.slane %v3256_v56, 9  ;;  %v4850_v39 = vrot.slane %v3257_v30, 9  ;;  %v3743_v43 = vmax.f32 %v3248_v31, %v4847_v26 }
 0x204   : > { %v4299_v24 = vsel %vm4298_vm12, %v4297_v45, %v4296_v2  ;;  %v3745_v29 = vmax.f32 %v3255_v55, %v4849_v15  ;;  %v5590_v50 = vadd.f32 %v7071_v28, %v7016_v4  ;;  %v5591_v62 = vadd.f32 %v7078_v17, %v7018_v27 }
 0x205   : > { %v4302_v18 = vsel %vm4301_vm13, %v4300_v6, %v4299_v24  ;;  %v3744_v12 = vmax.f32 %v3256_v56, %v4848_v5  ;;  %v3746_v13 = vmax.f32 %v3257_v30, %v4850_v39  ;;  %v3842_v20 = vadd.f32 %v7040_v21, %v3743_v43 }
 0x206   : > { %v4401_v63 = vpack.c.b16 %v4302_v18, %v4302_v18  ;;  %v3844_v54 = vadd.f32 %v7047_v40, %v3745_v29  ;;  %v3178_v19 = vmax.f32 %v5590_v50, %v5589_v33  ;;  %v5592_v4 = vadd.f32 %v7082_v7, %v7020_v14 }
 0x207   : > { %v3843_v27 = vadd.f32 %v7055_v36, %v3744_v12  ;;  %v3845_v28 = vadd.f32 %v7058_v11, %v3746_v13  ;;  %v3906_v17 = vmax.f32 %v3842_v20, 0.0  ;;  %v7126_v57 = vadd.f32 %v7084_v0, %v7022_v35  ;;  %v7128_v25 = vpop.f32.mrb[16].mxu1  ;;  %v7130_v60 = vpop.f32.mrb[16].mxu0 }
 0x208   : > { %4417 = vst [vmem:[%s7115_s10] sm:$0xf] %v4401_v63  ;;  %v3908_v49 = vmax.f32 %v3844_v54, 0.0  ;;  %v3258_v51 = vcombine.high %v3178_v19, %v3178_v19  ;;  %v3265_v58 = vrot.slane %v3178_v19, %v7037_v42  ;;  %v3179_v47 = vmax.f32 %v5592_v4, %v5591_v62  ;;  %v7134_v14 = vpop.f32.mrb[17].mxu1  ;;  %v7136_v7 = vpop.f32.mrb[17].mxu0 }
 0x209   : > { %v3907_v44 = vmax.f32 %v3843_v27, 0.0  ;;  %v3909_v31 = vmax.f32 %v3845_v28, 0.0  ;;  %v4979_v55 = vpack.c.bf16 %v3906_v17, %v3906_v17  ;;  %v7140_v35 = vadd.f32 %v7087_v22, %v7024_v1  ;;  %v7142_v0 = vpop.f32.mrb[18].mxu1  ;;  %v7144_v46 = vpop.f32.mrb[18].mxu0 }
 0x20a   : > { %v4981_v3 = vpack.c.bf16 %v3908_v49, %v3908_v49  ;;  %v3272_v52 = vrot.slane %v3258_v51, %v7037_v42  ;;  %v3273_v45 = vcombine.high %v3265_v58, %v3265_v58  ;;  %v4851_v41 = vrot.slane %v3265_v58, 9  ;;  %v7147_v56 = vpop.f32.mrb[19].mxu1  ;;  %v7149_v30 = vpop.f32.mrb[19].mxu0 }
 0x20b   : > { %v4980_v26 = vpack.c.bf16 %v3907_v44, %v3907_v44  ;;  %v4982_v48 = vpack.c.bf16 %v3909_v31, %v3909_v31  ;;  %v4226_v6 = vunpack.c.l.b16 %v4979_v55  ;;  %v3275_v15 = vcombine.high %v3179_v47, %v3179_v47 }
 0x20c   : > { %v4228_v33 = vunpack.c.l.b16 %v4981_v3  ;;  %v3274_v1 = vcombine.high %v3272_v52, %v3272_v52  ;;  %v4852_v22 = vrot.slane %v3273_v45, 9  ;;  %v4853_v2 = vrot.slane %v3272_v52, 9 }
 0x20d   : > { %v4227_v5 = vunpack.c.l.b16 %v4980_v26  ;;  %v4229_v39 = vunpack.c.l.b16 %v4982_v48  ;;  %v3747_v43 = vmax.f32 %v3265_v58, %v4851_v41  ;;  %v3282_v24 = vrot.slane %v3179_v47, %v7037_v42 }
 0x20e   : > { %v4305_v29 = vrot.slane %v4228_v33, 6  ;;  %v4854_v50 = vrot.slane %v3274_v1, 9  ;;  %v3748_v62 = vmax.f32 %v3273_v45, %v4852_v22  ;;  %v3749_v18 = vmax.f32 %v3272_v52, %v4853_v2 }
 0x20f   : > { %v4303_v12 = vrot.slane %v4227_v5, 7  ;;  %v4307_v13 = vrot.slane %v4229_v39, 5  ;;  %v3846_v20 = vadd.f32 %v7043_v10, %v3747_v43  ;;  %v3289_v63 = vrot.slane %v3275_v15, %v7037_v42  ;;  %v7154_v54 = vpop.f32.mrb[20].mxu1  ;;  %v7156_v19 = vpop.f32.mrb[20].mxu0 }
 0x210   : > { %v3750_v4 = vmax.f32 %v3274_v1, %v4854_v50  ;;  %v3847_v27 = vadd.f32 %v7063_v34, %v3748_v62  ;;  %v3848_v28 = vadd.f32 %v7051_v23, %v3749_v18  ;;  %v3290_v17 = vcombine.high %v3282_v24, %v3282_v24  ;;  %v7160_v49 = vpop.f32.mrb[21].mxu1  ;;  %v7162_v51 = vpop.f32.mrb[21].mxu0 }
 0x211   : > { %v4304_v58 = vsel %vm4283_vm7, %v4303_v12, %v4226_v6  ;;  %v3910_v47 = vmax.f32 %v3846_v20, 0.0  ;;  %v3291_v44 = vcombine.high %v3289_v63, %v3289_v63  ;;  %v4855_v31 = vrot.slane %v3282_v24, 9  ;;  %v7165_v55 = vpop.f32.mrb[22].mxu1  ;;  %v7167_v3 = vpop.f32.mrb[22].mxu0 }
 0x212   : > { %v4306_v52 = vsel %vm4286_vm8, %v4305_v29, %v4304_v58  ;;  %v3849_v45 = vadd.f32 %v7066_v59, %v3750_v4  ;;  %v3911_v41 = vmax.f32 %v3847_v27, 0.0  ;;  %v3912_v26 = vmax.f32 %v3848_v28, 0.0  ;;  %v7171_v48 = vpop.f32.mrb[23].mxu1  ;;  %v7173_v15 = vpop.f32.mrb[23].mxu0 }
 0x213   : > { %v4983_v33 = vpack.c.bf16 %v3910_v47, %v3910_v47  ;;  %v4308_v6 = vsel %vm4289_vm9, %v4307_v13, %v4306_v52  ;;  %v4856_v1 = vrot.slane %v3290_v17, 9  ;;  %v4857_v22 = vrot.slane %v3289_v63, 9 }
 0x214   : > { %v3913_v2 = vmax.f32 %v3849_v45, 0.0  ;;  %v4984_v5 = vpack.c.bf16 %v3911_v41, %v3911_v41  ;;  %v4985_v39 = vpack.c.bf16 %v3912_v26, %v3912_v26  ;;  %v4858_v43 = vrot.slane %v3291_v44, 9 }
 0x215   : > { %v4230_v50 = vunpack.c.l.b16 %v4983_v33  ;;  %v3751_v62 = vmax.f32 %v3282_v24, %v4855_v31  ;;  %v3752_v29 = vmax.f32 %v3290_v17, %v4856_v1  ;;  %v3753_v18 = vmax.f32 %v3289_v63, %v4857_v22 }
 0x216   : > { %v4986_v12 = vpack.c.bf16 %v3913_v2, %v3913_v2  ;;  %v4231_v20 = vunpack.c.l.b16 %v4984_v5  ;;  %v4232_v4 = vunpack.c.l.b16 %v4985_v39  ;;  %v3754_v27 = vmax.f32 %v3291_v44, %v4858_v43 }
 0x217   : > { %v4309_v28 = vrot.slane %v4230_v50, 4  ;;  %v3850_v58 = vadd.f32 %v7040_v21, %v3751_v62  ;;  %v3851_v47 = vadd.f32 %v7055_v36, %v3752_v29  ;;  %v3852_v13 = vadd.f32 %v7047_v40, %v3753_v18  ;;  %v7179_v52 = vpop.f32.mrb[24].mxu1  ;;  %v7181_v45 = vpop.f32.mrb[24].mxu0 }
 0x218   : > { %v4233_v41 = vunpack.c.l.b16 %v4986_v12  ;;  %v4311_v26 = vrot.slane %v4231_v20, 3  ;;  %v4313_v24 = vrot.slane %v4232_v4, 2  ;;  %v3853_v63 = vadd.f32 %v7058_v11, %v3754_v27  ;;  %v7184_v17 = vpop.f32.mrb[25].mxu1  ;;  %v7186_v31 = vpop.f32.mrb[25].mxu0 }
 0x219   : > { %v4310_v44 = vsel %vm4292_vm10, %v4309_v28, %v4308_v6  ;;  %v3914_v33 = vmax.f32 %v3850_v58, 0.0  ;;  %v3915_v1 = vmax.f32 %v3851_v47, 0.0  ;;  %v3916_v22 = vmax.f32 %v3852_v13, 0.0  ;;  %v7189_v2 = vpop.f32.mrb[26].mxu1  ;;  %v7191_v5 = vpop.f32.mrb[26].mxu0 }
 0x21a   : > { %v4312_v39 = vsel %vm4295_vm11, %v4311_v26, %v4310_v44  ;;  %v4315_v43 = vrot.slane %v4233_v41, 1  ;;  %v3917_v50 = vmax.f32 %v3853_v63, 0.0  ;;  %v3180_v62 = vmax.f32 %v7140_v35, %v7126_v57  ;;  %v7196_v29 = vpop.f32.mrb[27].mxu1  ;;  %v7198_v18 = vpop.f32.mrb[27].mxu0 }
 0x21b   : > { %7463 = vst [vmem:[#allocation4_spill] sm:$0xff] %v7198_v18  ;;  %v4314_v6 = vsel %vm4298_vm12, %v4313_v24, %v4312_v39  ;;  %v4987_v12 = vpack.c.bf16 %v3914_v33, %v3914_v33  ;;  %v4988_v20 = vpack.c.bf16 %v3915_v1, %v3915_v1  ;;  %v4989_v4 = vpack.c.bf16 %v3916_v22, %v3916_v22 }
 0x21c   : > { %v4316_v27 = vsel %vm4301_vm13, %v4315_v43, %v4314_v6  ;;  %v4990_v28 = vpack.c.bf16 %v3917_v50, %v3917_v50  ;;  %v3292_v58 = vcombine.high %v3180_v62, %v3180_v62  ;;  %v3299_v47 = vrot.slane %v3180_v62, %v7037_v42 }
 0x21d   : > { %v4402_v13 = vpack.c.b16 %v4316_v27, %v4316_v27  ;;  %v4234_v41 = vunpack.c.l.b16 %v4987_v12  ;;  %v4235_v26 = vunpack.c.l.b16 %v4988_v20  ;;  %v4236_v57 = vunpack.c.l.b16 %v4989_v4 }
 0x21e   : > { %v4237_v35 = vunpack.c.l.b16 %v4990_v28  ;;  %v3306_v63 = vrot.slane %v3292_v58, %v7037_v42  ;;  %v3307_v44 = vcombine.high %v3299_v47, %v3299_v47  ;;  %v4859_v18 = vrot.slane %v3299_v47, 9 }
 0x21f   : > { %4418 = vst [vmem:[%s7115_s10 + $0x4] sm:$0xf] %v4402_v13  ;;  %v4317_v24 = vrot.slane %v4235_v26, 7  ;;  %v4319_v33 = vrot.slane %v4236_v57, 6  ;;  %v5595_v1 = vadd.f32 %v7092_v38, %v7026_v53  ;;  %v5596_v22 = vadd.f32 %v7095_v16, %v7028_v32  ;;  %v7209_v39 = vpop.f32.mrb[28].mxu1  ;;  %v7211_v43 = vpop.f32.mrb[28].mxu0 }
 0x220   : > { %v4321_v50 = vrot.slane %v4237_v35, 5  ;;  %v3308_v62 = vcombine.high %v3306_v63, %v3306_v63  ;;  %v4860_v6 = vrot.slane %v3307_v44, 9  ;;  %v4861_v12 = vrot.slane %v3306_v63, 9  ;;  %v7213_v20 = vpop.f32.mrb[29].mxu1  ;;  %v7215_v4 = vpop.f32.mrb[29].mxu0 }
 0x221   : > { %7464 = vst [vmem:[#allocation17_spill] sm:$0xff] %v7213_v20  ;;  %7465 = vst [vmem:[#allocation9_spill] sm:$0xff] %v7215_v4  ;;  %v4318_v27 = vsel %vm4283_vm7, %v4317_v24, %v4234_v41  ;;  %v3755_v28 = vmax.f32 %v3299_v47, %v4859_v18  ;;  %v3181_v58 = vmax.f32 %v5596_v22, %v5595_v1  ;;  %v7220_v32 = vpop.f32.mrb[30].mxu1  ;;  %v7222_v38 = vpop.f32.mrb[30].mxu0 }
 0x222   : > { %v5597_v53 = vadd.f32 %v7098_v37, %v7030_v8  ;;  %7466 = vst [vmem:[#allocation11_spill] sm:$0xff] %v7220_v32  ;;  %7467 = vst [vmem:[#allocation13_spill] sm:$0xff] %v7222_v38  ;;  %v4320_v16 = vsel %vm4286_vm8, %v4319_v33, %v4318_v27  ;;  %v4862_v13 = vrot.slane %v3308_v62, 9  ;;  %v3756_v26 = vmax.f32 %v3307_v44, %v4860_v6  ;;  %v7225_v35 = vpop.f32.mrb[31].mxu1  ;;  %v7227_v20 = vpop.f32.mrb[31].mxu0 }
 0x223   : > { %v3757_v57 = vmax.f32 %v3306_v63, %v4861_v12  ;;  %7468 = vst [vmem:[#allocation15_spill] sm:$0xff] %v7225_v35  ;;  %7469 = vst [vmem:[#allocation19_spill] sm:$0xff] %v7227_v20  ;;  %v3854_v41 = vadd.f32 %v7043_v10, %v3755_v28  ;;  %v4322_v18 = vsel %vm4289_vm9, %v4321_v50, %v4320_v16 }
 0x224   : > { %v3309_v47 = vcombine.high %v3181_v58, %v3181_v58  ;;  %v3316_v8 = vrot.slane %v3181_v58, %v7037_v42  ;;  %v3758_v37 = vmax.f32 %v3308_v62, %v4862_v13  ;;  %v3855_v24 = vadd.f32 %v7063_v34, %v3756_v26 }
 0x225   : > { %v3856_v1 = vadd.f32 %v7051_v23, %v3757_v57  ;;  %v5598_v44 = vadd.f32 %v7104_v61, %v7035_v9  ;;  %v3918_v63 = vmax.f32 %v3854_v41, 0.0 }
 0x226   : > { %v3323_v33 = vrot.slane %v3309_v47, %v7037_v42  ;;  %v3324_v22 = vcombine.high %v3316_v8, %v3316_v8  ;;  %v4863_v6 = vrot.slane %v3316_v8, 9  ;;  %v3857_v12 = vadd.f32 %v7066_v59, %v3758_v37 }
 0x227   : > { %v3919_v27 = vmax.f32 %v3855_v24, 0.0  ;;  %v3920_v50 = vmax.f32 %v3856_v1, 0.0  ;;  %v3182_v28 = vmax.f32 %v5598_v44, %v5597_v53  ;;  %v4991_v16 = vpack.c.bf16 %v3918_v63, %v3918_v63 }
 0x228   : > { %v3325_v58 = vcombine.high %v3323_v33, %v3323_v33  ;;  %v4864_v62 = vrot.slane %v3324_v22, 9  ;;  %v4865_v13 = vrot.slane %v3323_v33, 9  ;;  %v3921_v26 = vmax.f32 %v3857_v12, 0.0 }
 0x229   : > { %v4992_v20 = vpack.c.bf16 %v3919_v27, %v3919_v27  ;;  %v4993_v57 = vpack.c.bf16 %v3920_v50, %v3920_v50  ;;  %v3759_v35 = vmax.f32 %v3316_v8, %v4863_v6  ;;  %v4238_v38 = vunpack.c.l.b16 %v4991_v16 }
 0x22a   : > { %v4866_v9 = vrot.slane %v3325_v58, 9  ;;  %v3760_v61 = vmax.f32 %v3324_v22, %v4864_v62  ;;  %v3761_v41 = vmax.f32 %v3323_v33, %v4865_v13  ;;  %v4994_v47 = vpack.c.bf16 %v3921_v26, %v3921_v26 }
 0x22b   : > { %v4239_v32 = vunpack.c.l.b16 %v4992_v20  ;;  %v4240_v4 = vunpack.c.l.b16 %v4993_v57  ;;  %v3858_v37 = vadd.f32 %v7040_v21, %v3759_v35  ;;  %v4323_v24 = vrot.slane %v4238_v38, 4 }
 0x22c   : > { %v3762_v1 = vmax.f32 %v3325_v58, %v4866_v9  ;;  %v3859_v53 = vadd.f32 %v7055_v36, %v3760_v61  ;;  %v3860_v44 = vadd.f32 %v7047_v40, %v3761_v41  ;;  %v4241_v63 = vunpack.c.l.b16 %v4994_v47 }
 0x22d   : > { %v4325_v12 = vrot.slane %v4239_v32, 3  ;;  %v4327_v27 = vrot.slane %v4240_v4, 2  ;;  %v3922_v50 = vmax.f32 %v3858_v37, 0.0  ;;  %v4324_v8 = vsel %vm4292_vm10, %v4323_v24, %v4322_v18 }
 0x22e   : > { %v3861_v22 = vadd.f32 %v7058_v11, %v3762_v1  ;;  %v3923_v33 = vmax.f32 %v3859_v53, 0.0  ;;  %v3924_v6 = vmax.f32 %v3860_v44, 0.0  ;;  %v4329_v16 = vrot.slane %v4241_v63, 1 }
 0x22f   : > { %v4326_v20 = vsel %vm4295_vm11, %v4325_v12, %v4324_v8  ;;  %v4995_v35 = vpack.c.bf16 %v3922_v50, %v3922_v50  ;;  %v3326_v38 = vcombine.high %v3182_v28, %v3182_v28  ;;  %v3333_v18 = vrot.slane %v3182_v28, %v7037_v42 }
 0x230   : > { %v4328_v58 = vsel %vm4298_vm12, %v4327_v27, %v4326_v20  ;;  %v3925_v62 = vmax.f32 %v3861_v22, 0.0  ;;  %v4996_v13 = vpack.c.bf16 %v3923_v33, %v3923_v33  ;;  %v4997_v26 = vpack.c.bf16 %v3924_v6, %v3924_v6 }
 0x231   : > { %v4330_v4 = vsel %vm4301_vm13, %v4329_v16, %v4328_v58  ;;  %v4242_v32 = vunpack.c.l.b16 %v4995_v35  ;;  %v3340_v57 = vrot.slane %v3326_v38, %v7037_v42  ;;  %v3341_v37 = vcombine.high %v3333_v18, %v3333_v18 }
 0x232   : > { %v4403_v9 = vpack.c.b16 %v4330_v4, %v4330_v4  ;;  %v4998_v61 = vpack.c.bf16 %v3925_v62, %v3925_v62  ;;  %v4243_v41 = vunpack.c.l.b16 %v4996_v13  ;;  %v4244_v47 = vunpack.c.l.b16 %v4997_v26 }
 0x233   : > { %v3342_v24 = vcombine.high %v3340_v57, %v3340_v57  ;;  %v4867_v1 = vrot.slane %v3333_v18, 9  ;;  %v4869_v53 = vrot.slane %v3340_v57, 9  ;;  %v5599_v27 = vadd.f32 %v7130_v60, %v7128_v25 }
 0x234   : > { %4419 = vst [vmem:[%s7115_s10 + $0x8] sm:$0xf] %v4403_v9  ;;  %v4245_v44 = vunpack.c.l.b16 %v4998_v61  ;;  %v4331_v63 = vrot.slane %v4243_v41, 7  ;;  %v4333_v12 = vrot.slane %v4244_v47, 6  ;;  %v4868_v50 = vrot.slane %v3341_v37, 9 }
 0x235   : > { %v4870_v8 = vrot.slane %v3342_v24, 9  ;;  %v3763_v28 = vmax.f32 %v3333_v18, %v4867_v1  ;;  %v3765_v22 = vmax.f32 %v3340_v57, %v4869_v53  ;;  %v5600_v20 = vadd.f32 %v7136_v7, %v7134_v14 }
 0x236   : > { %v4332_v33 = vsel %vm4283_vm7, %v4331_v63, %v4242_v32  ;;  %v4335_v6 = vrot.slane %v4245_v44, 5  ;;  %v5601_v16 = vadd.f32 %v7144_v46, %v7142_v0  ;;  %v3764_v38 = vmax.f32 %v3341_v37, %v4868_v50 }
 0x237   : > { %v4334_v35 = vsel %vm4286_vm8, %v4333_v12, %v4332_v33  ;;  %v3766_v58 = vmax.f32 %v3342_v24, %v4870_v8  ;;  %v3862_v62 = vadd.f32 %v7043_v10, %v3763_v28  ;;  %v3864_v25 = vadd.f32 %v7051_v23, %v3765_v22 }
 0x238   : > { %v4336_v60 = vsel %vm4289_vm9, %v4335_v6, %v4334_v35  ;;  %v3183_v13 = vmax.f32 %v5600_v20, %v5599_v27  ;;  %v5602_v26 = vadd.f32 %v7149_v30, %v7147_v56  ;;  %v3863_v4 = vadd.f32 %v7063_v34, %v3764_v38 }
 0x239   : > { %v3865_v14 = vadd.f32 %v7066_v59, %v3766_v58  ;;  %v3926_v7 = vmax.f32 %v3862_v62, 0.0  ;;  %v5603_v0 = vadd.f32 %v7156_v19, %v7154_v54  ;;  %v3928_v46 = vmax.f32 %v3864_v25, 0.0 }
 0x23a   : > { %v3343_v32 = vcombine.high %v3183_v13, %v3183_v13  ;;  %v3350_v18 = vrot.slane %v3183_v13, %v7037_v42  ;;  %v3184_v57 = vmax.f32 %v5602_v26, %v5601_v16  ;;  %v3927_v9 = vmax.f32 %v3863_v4, 0.0 }
 0x23b   : > { %v3929_v61 = vmax.f32 %v3865_v14, 0.0  ;;  %v4999_v41 = vpack.c.bf16 %v3926_v7, %v3926_v7  ;;  %v5604_v47 = vadd.f32 %v7162_v51, %v7160_v49  ;;  %v5001_v56 = vpack.c.bf16 %v3928_v46, %v3928_v46 }
 0x23c   : > { %v3357_v30 = vrot.slane %v3343_v32, %v7037_v42  ;;  %v3358_v37 = vcombine.high %v3350_v18, %v3350_v18  ;;  %v4871_v24 = vrot.slane %v3350_v18, 9  ;;  %v5000_v1 = vpack.c.bf16 %v3927_v9, %v3927_v9 }
 0x23d   : > { %v5002_v53 = vpack.c.bf16 %v3929_v61, %v3929_v61  ;;  %v4246_v44 = vunpack.c.l.b16 %v4999_v41  ;;  %v3360_v54 = vcombine.high %v3184_v57, %v3184_v57  ;;  %v4248_v19 = vunpack.c.l.b16 %v5001_v56 }
 0x23e   : > { %v3359_v63 = vcombine.high %v3357_v30, %v3357_v30  ;;  %v4872_v12 = vrot.slane %v3358_v37, 9  ;;  %v4873_v27 = vrot.slane %v3357_v30, 9  ;;  %v4247_v50 = vunpack.c.l.b16 %v5000_v1 }
 0x23f   : > { %v4249_v8 = vunpack.c.l.b16 %v5002_v53  ;;  %v4337_v28 = vrot.slane %v4246_v44, 4  ;;  %v3767_v22 = vmax.f32 %v3350_v18, %v4871_v24  ;;  %v4341_v33 = vrot.slane %v4248_v19, 2 }
 0x240   : > { %v4874_v6 = vrot.slane %v3359_v63, 9  ;;  %v3768_v49 = vmax.f32 %v3358_v37, %v4872_v12  ;;  %v3769_v51 = vmax.f32 %v3357_v30, %v4873_v27  ;;  %v4339_v16 = vrot.slane %v4247_v50, 3 }
 0x241   : > { %v4338_v20 = vsel %vm4292_vm10, %v4337_v28, %v4336_v60  ;;  %v4343_v35 = vrot.slane %v4249_v8, 1  ;;  %v3866_v38 = vadd.f32 %v7040_v21, %v3767_v22  ;;  %v3367_v13 = vrot.slane %v3184_v57, %v7037_v42 }
 0x242   : > { %v3770_v58 = vmax.f32 %v3359_v63, %v4874_v6  ;;  %v3867_v62 = vadd.f32 %v7055_v36, %v3768_v49  ;;  %v3868_v25 = vadd.f32 %v7047_v40, %v3769_v51  ;;  %v4340_v26 = vsel %vm4295_vm11, %v4339_v16, %v4338_v20 }
 0x243   : > { %v3930_v4 = vmax.f32 %v3866_v38, 0.0  ;;  %v3374_v14 = vrot.slane %v3360_v54, %v7037_v42  ;;  %v3185_v7 = vmax.f32 %v5604_v47, %v5603_v0  ;;  %v4342_v46 = vsel %vm4298_vm12, %v4341_v33, %v4340_v26 }
 0x244   : > { %v3869_v60 = vadd.f32 %v7058_v11, %v3770_v58  ;;  %v3931_v32 = vmax.f32 %v3867_v62, 0.0  ;;  %v3932_v18 = vmax.f32 %v3868_v25, 0.0  ;;  %v4344_v9 = vsel %vm4301_vm13, %v4343_v35, %v4342_v46 }
 0x245   : > { %v5003_v61 = vpack.c.bf16 %v3930_v4, %v3930_v4  ;;  %v3375_v41 = vcombine.high %v3367_v13, %v3367_v13  ;;  %v3376_v56 = vcombine.high %v3374_v14, %v3374_v14  ;;  %v4404_v30 = vpack.c.b16 %v4344_v9, %v4344_v9 }
 0x246   : > { %v3933_v57 = vmax.f32 %v3869_v60, 0.0  ;;  %v5004_v37 = vpack.c.bf16 %v3931_v32, %v3931_v32  ;;  %v5005_v24 = vpack.c.bf16 %v3932_v18, %v3932_v18  ;;  %v4875_v53 = vrot.slane %v3367_v13, 9 }
 0x247   : > { %v4250_v1 = vunpack.c.l.b16 %v5003_v61  ;;  %v4876_v44 = vrot.slane %v3375_v41, 9  ;;  %v4877_v0 = vrot.slane %v3374_v14, 9  ;;  %4420 = vst [vmem:[%s7115_s10 + $0xc] sm:$0xf] %v4404_v30  ;;  %v4878_v63 = vrot.slane %v3376_v56, 9 }
 0x248   : > { %v5006_v47 = vpack.c.bf16 %v3933_v57, %v3933_v57  ;;  %v4251_v54 = vunpack.c.l.b16 %v5004_v37  ;;  %v4252_v19 = vunpack.c.l.b16 %v5005_v24  ;;  %v3771_v12 = vmax.f32 %v3367_v13, %v4875_v53 }
 0x249   : > { %v3772_v27 = vmax.f32 %v3375_v41, %v4876_v44  ;;  %v3773_v50 = vmax.f32 %v3374_v14, %v4877_v0  ;;  %v3377_v8 = vcombine.high %v3185_v7, %v3185_v7  ;;  %v3774_v6 = vmax.f32 %v3376_v56, %v4878_v63 }
 0x24a   : > { %v4253_v28 = vunpack.c.l.b16 %v5006_v47  ;;  %v4345_v22 = vrot.slane %v4251_v54, 7  ;;  %v4347_v33 = vrot.slane %v4252_v19, 6  ;;  %v3870_v49 = vadd.f32 %v7043_v10, %v3771_v12 }
 0x24b   : > { %v3871_v51 = vadd.f32 %v7063_v34, %v3772_v27  ;;  %v3872_v20 = vadd.f32 %v7051_v23, %v3773_v50  ;;  %v3384_v16 = vrot.slane %v3185_v7, %v7037_v42  ;;  %v3873_v58 = vadd.f32 %v7066_v59, %v3774_v6 }
 0x24c   : > { %v4346_v35 = vsel %vm4283_vm7, %v4345_v22, %v4250_v1  ;;  %v4349_v38 = vrot.slane %v4253_v28, 5  ;;  %v3391_v62 = vrot.slane %v3377_v8, %v7037_v42  ;;  %v3934_v13 = vmax.f32 %v3870_v49, 0.0 }
 0x24d   : > { %v4348_v25 = vsel %vm4286_vm8, %v4347_v33, %v4346_v35  ;;  %v3935_v26 = vmax.f32 %v3871_v51, 0.0  ;;  %v3936_v4 = vmax.f32 %v3872_v20, 0.0  ;;  %v3937_v14 = vmax.f32 %v3873_v58, 0.0 }
 0x24e   : > { %v4350_v46 = vsel %vm4289_vm9, %v4349_v38, %v4348_v25  ;;  %v3392_v60 = vcombine.high %v3384_v16, %v3384_v16  ;;  %v3393_v32 = vcombine.high %v3391_v62, %v3391_v62  ;;  %v5007_v18 = vpack.c.bf16 %v3934_v13, %v3934_v13 }
 0x24f   : > { %v5008_v9 = vpack.c.bf16 %v3935_v26, %v3935_v26  ;;  %v5009_v7 = vpack.c.bf16 %v3936_v4, %v3936_v4  ;;  %v4879_v61 = vrot.slane %v3384_v16, 9  ;;  %v5010_v41 = vpack.c.bf16 %v3937_v14, %v3937_v14 }
 0x250   : > { %v4880_v56 = vrot.slane %v3392_v60, 9  ;;  %v4881_v30 = vrot.slane %v3391_v62, 9  ;;  %v4882_v57 = vrot.slane %v3393_v32, 9  ;;  %v4254_v37 = vunpack.c.l.b16 %v5007_v18 }
 0x251   : > { %v4255_v24 = vunpack.c.l.b16 %v5008_v9  ;;  %v4256_v1 = vunpack.c.l.b16 %v5009_v7  ;;  %v3775_v53 = vmax.f32 %v3384_v16, %v4879_v61  ;;  %v4257_v44 = vunpack.c.l.b16 %v5010_v41 }
 0x252   : > { %v3776_v0 = vmax.f32 %v3392_v60, %v4880_v56  ;;  %v3777_v47 = vmax.f32 %v3391_v62, %v4881_v30  ;;  %v3778_v54 = vmax.f32 %v3393_v32, %v4882_v57  ;;  %v4351_v19 = vrot.slane %v4254_v37, 4 }
 0x253   : > { %v4353_v63 = vrot.slane %v4255_v24, 3  ;;  %v4355_v12 = vrot.slane %v4256_v1, 2  ;;  %v3874_v27 = vadd.f32 %v7040_v21, %v3775_v53  ;;  %v4357_v50 = vrot.slane %v4257_v44, 1 }
 0x254   : > { %v3875_v8 = vadd.f32 %v7055_v36, %v3776_v0  ;;  %v3876_v28 = vadd.f32 %v7047_v40, %v3777_v47  ;;  %v3877_v22 = vadd.f32 %v7058_v11, %v3778_v54  ;;  %v4352_v33 = vsel %vm4292_vm10, %v4351_v19, %v4350_v46  ;;  %v7470_v0 = vld [vmem:[#allocation4_spill] sm:$0xff] }
 0x255   : > { %v3938_v6 = vmax.f32 %v3874_v27, 0.0  ;;  %v5605_v49 = vadd.f32 %v7167_v3, %v7165_v55  ;;  %v5606_v51 = vadd.f32 %v7173_v15, %v7171_v48  ;;  %v4354_v20 = vsel %vm4295_vm11, %v4353_v63, %v4352_v33 }
 0x256   : > { %v3939_v16 = vmax.f32 %v3875_v8, 0.0  ;;  %v3940_v35 = vmax.f32 %v3876_v28, 0.0  ;;  %v3941_v38 = vmax.f32 %v3877_v22, 0.0  ;;  %v4356_v58 = vsel %vm4298_vm12, %v4355_v12, %v4354_v20 }
 0x257   : > { %v5011_v62 = vpack.c.bf16 %v3938_v6, %v3938_v6  ;;  %v3186_v25 = vmax.f32 %v5606_v51, %v5605_v49  ;;  %v5607_v13 = vadd.f32 %v7181_v45, %v7179_v52  ;;  %v4358_v26 = vsel %vm4301_vm13, %v4357_v50, %v4356_v58 }
 0x258   : > { %v5012_v4 = vpack.c.bf16 %v3939_v16, %v3939_v16  ;;  %v5013_v55 = vpack.c.bf16 %v3940_v35, %v3940_v35  ;;  %v5014_v3 = vpack.c.bf16 %v3941_v38, %v3941_v38  ;;  %v4405_v14 = vpack.c.b16 %v4358_v26, %v4358_v26 }
 0x259   : > { %v4258_v48 = vunpack.c.l.b16 %v5011_v62  ;;  %v3394_v15 = vcombine.high %v3186_v25, %v3186_v25  ;;  %v3401_v46 = vrot.slane %v3186_v25, %v7037_v42  ;;  %v5608_v9 = vadd.f32 %v7186_v31, %v7184_v17 }
 0x25a   : > { %v4259_v60 = vunpack.c.l.b16 %v5012_v4  ;;  %v4260_v32 = vunpack.c.l.b16 %v5013_v55  ;;  %v4261_v18 = vunpack.c.l.b16 %v5014_v3  ;;  %4421 = vst [vmem:[%s7115_s10 + $0x10] sm:$0xf] %v4405_v14  ;;  %v7311_v61 = vadd.f32 %v7191_v5, %v7189_v2 }
 0x25b   : > { %v3408_v7 = vrot.slane %v3394_v15, %v7037_v42  ;;  %v3409_v52 = vcombine.high %v3401_v46, %v3401_v46  ;;  %v4883_v45 = vrot.slane %v3401_v46, 9  ;;  %v3187_v57 = vmax.f32 %v5608_v9, %v5607_v13 }
 0x25c   : > { %v4359_v41 = vrot.slane %v4259_v60, 7  ;;  %v4361_v56 = vrot.slane %v4260_v32, 6  ;;  %v4363_v30 = vrot.slane %v4261_v18, 5  ;;  %v5610_v47 = vadd.f32 %v7470_v0, %v7196_v29 }
 0x25d   : > { %v3410_v37 = vcombine.high %v3408_v7, %v3408_v7  ;;  %v4884_v24 = vrot.slane %v3409_v52, 9  ;;  %v4885_v1 = vrot.slane %v3408_v7, 9  ;;  %v3779_v53 = vmax.f32 %v3401_v46, %v4883_v45 }
 0x25e   : > { %v4360_v44 = vsel %vm4283_vm7, %v4359_v41, %v4258_v48  ;;  %v3411_v17 = vcombine.high %v3187_v57, %v3187_v57  ;;  %v3418_v31 = vrot.slane %v3187_v57, %v7037_v42 }
 0x25f   : > { %v4362_v54 = vsel %vm4286_vm8, %v4361_v56, %v4360_v44  ;;  %v4886_v2 = vrot.slane %v3410_v37, 9  ;;  %v3780_v5 = vmax.f32 %v3409_v52, %v4884_v24  ;;  %v3781_v19 = vmax.f32 %v3408_v7, %v4885_v1 }
 0x260   : > { %v3878_v63 = vadd.f32 %v7043_v10, %v3779_v53  ;;  %v4364_v12 = vsel %vm4289_vm9, %v4363_v30, %v4362_v54  ;;  %v3425_v27 = vrot.slane %v3411_v17, %v7037_v42  ;;  %v3426_v50 = vcombine.high %v3418_v31, %v3418_v31 }
 0x261   : > { %v3782_v8 = vmax.f32 %v3410_v37, %v4886_v2  ;;  %v3879_v28 = vadd.f32 %v7063_v34, %v3780_v5  ;;  %v3880_v22 = vadd.f32 %v7051_v23, %v3781_v19  ;;  %v4887_v33 = vrot.slane %v3418_v31, 9 }
 0x262   : > { %v3942_v6 = vmax.f32 %v3878_v63, 0.0  ;;  %v3427_v29 = vcombine.high %v3425_v27, %v3425_v27  ;;  %v4888_v49 = vrot.slane %v3426_v50, 9  ;;  %v4889_v51 = vrot.slane %v3425_v27, 9 }
 0x263   : > { %v3881_v20 = vadd.f32 %v7066_v59, %v3782_v8  ;;  %v3943_v16 = vmax.f32 %v3879_v28, 0.0  ;;  %v3944_v35 = vmax.f32 %v3880_v22, 0.0  ;;  %v3783_v38 = vmax.f32 %v3418_v31, %v4887_v33 }
 0x264   : > { %v5015_v58 = vpack.c.bf16 %v3942_v6, %v3942_v6  ;;  %v4890_v62 = vrot.slane %v3427_v29, 9  ;;  %v3784_v25 = vmax.f32 %v3426_v50, %v4888_v49  ;;  %v3785_v13 = vmax.f32 %v3425_v27, %v4889_v51  ;;  %v7471_v49 = vld [vmem:[#allocation17_spill] sm:$0xff] }
 0x265   : > { %v3945_v26 = vmax.f32 %v3881_v20, 0.0  ;;  %v5016_v4 = vpack.c.bf16 %v3943_v16, %v3943_v16  ;;  %v5017_v55 = vpack.c.bf16 %v3944_v35, %v3944_v35  ;;  %v3882_v3 = vadd.f32 %v7040_v21, %v3783_v38  ;;  %v7472_v51 = vld [vmem:[#allocation9_spill] sm:$0xff]  ;;  %v7473_v38 = vld [vmem:[#allocation11_spill] sm:$0xff] }
 0x266   : > { %v4262_v14 = vunpack.c.l.b16 %v5015_v58  ;;  %v3786_v48 = vmax.f32 %v3427_v29, %v4890_v62  ;;  %v3883_v15 = vadd.f32 %v7055_v36, %v3784_v25  ;;  %v3884_v46 = vadd.f32 %v7047_v40, %v3785_v13  ;;  %v7474_v58 = vld [vmem:[#allocation13_spill] sm:$0xff]  ;;  %v7475_v25 = vld [vmem:[#allocation15_spill] sm:$0xff] }
 0x267   : > { %v5018_v60 = vpack.c.bf16 %v3945_v26, %v3945_v26  ;;  %v4263_v32 = vunpack.c.l.b16 %v5016_v4  ;;  %v4264_v18 = vunpack.c.l.b16 %v5017_v55  ;;  %v3946_v9 = vmax.f32 %v3882_v3, 0.0 }
 0x268   : > { %v4365_v7 = vrot.slane %v4262_v14, 4  ;;  %v3885_v52 = vadd.f32 %v7058_v11, %v3786_v48  ;;  %v3947_v45 = vmax.f32 %v3883_v15, 0.0  ;;  %v3948_v41 = vmax.f32 %v3884_v46, 0.0 }
 0x269   : > { %v4265_v56 = vunpack.c.l.b16 %v5018_v60  ;;  %v4367_v30 = vrot.slane %v4263_v32, 3  ;;  %v4369_v57 = vrot.slane %v4264_v18, 2  ;;  %v5019_v37 = vpack.c.bf16 %v3946_v9, %v3946_v9 }
 0x26a   : > { %v4366_v24 = vsel %vm4292_vm10, %v4365_v7, %v4364_v12  ;;  %v3949_v1 = vmax.f32 %v3885_v52, 0.0  ;;  %v5020_v53 = vpack.c.bf16 %v3947_v45, %v3947_v45  ;;  %v5021_v44 = vpack.c.bf16 %v3948_v41, %v3948_v41 }
 0x26b   : > { %v4368_v17 = vsel %vm4295_vm11, %v4367_v30, %v4366_v24  ;;  %v4371_v31 = vrot.slane %v4265_v56, 1  ;;  %v4266_v0 = vunpack.c.l.b16 %v5019_v37  ;;  %v3188_v54 = vmax.f32 %v5610_v47, %v7311_v61 }
 0x26c   : > { %v4370_v2 = vsel %vm4298_vm12, %v4369_v57, %v4368_v17  ;;  %v5022_v5 = vpack.c.bf16 %v3949_v1, %v3949_v1  ;;  %v4267_v19 = vunpack.c.l.b16 %v5020_v53  ;;  %v4268_v63 = vunpack.c.l.b16 %v5021_v44 }
 0x26d   : > { %v4372_v27 = vsel %vm4301_vm13, %v4371_v31, %v4370_v2  ;;  %v3428_v50 = vcombine.high %v3188_v54, %v3188_v54  ;;  %v3435_v12 = vrot.slane %v3188_v54, %v7037_v42  ;;  %v5611_v8 = vadd.f32 %v7211_v43, %v7209_v39  ;;  %v7476_v39 = vld [vmem:[#allocation19_spill] sm:$0xff] }
 0x26e   : > { %v4406_v28 = vpack.c.b16 %v4372_v27, %v4372_v27  ;;  %v4269_v22 = vunpack.c.l.b16 %v5022_v5  ;;  %v4373_v33 = vrot.slane %v4267_v19, 7  ;;  %v4375_v6 = vrot.slane %v4268_v63, 6 }
 0x26f   : > { %v3442_v61 = vrot.slane %v3428_v50, %v7037_v42  ;;  %v3443_v47 = vcombine.high %v3435_v12, %v3435_v12  ;;  %v4891_v29 = vrot.slane %v3435_v12, 9  ;;  %v5612_v20 = vadd.f32 %v7472_v51, %v7471_v49 }
 0x270   : > { %4422 = vst [vmem:[%s7115_s10 + $0x14] sm:$0xf] %v4406_v28  ;;  %v4374_v16 = vsel %vm4283_vm7, %v4373_v33, %v4266_v0  ;;  %v4377_v35 = vrot.slane %v4269_v22, 5  ;;  %v5613_v62 = vadd.f32 %v7474_v58, %v7473_v38  ;;  %v5614_v43 = vadd.f32 %v7476_v39, %v7475_v25 }
 0x271   : > { %v4376_v13 = vsel %vm4286_vm8, %v4375_v6, %v4374_v16  ;;  %v3444_v26 = vcombine.high %v3442_v61, %v3442_v61  ;;  %v4892_v4 = vrot.slane %v3443_v47, 9  ;;  %v4893_v55 = vrot.slane %v3442_v61, 9 }
 0x272   : > { %v3787_v3 = vmax.f32 %v3435_v12, %v4891_v29  ;;  %v3189_v14 = vmax.f32 %v5612_v20, %v5611_v8  ;;  %v3190_v48 = vmax.f32 %v5614_v43, %v5613_v62  ;;  %v4378_v32 = vsel %vm4289_vm9, %v4377_v35, %v4376_v13 }
 0x273   : > { %v4894_v15 = vrot.slane %v3444_v26, 9  ;;  %v3788_v46 = vmax.f32 %v3443_v47, %v4892_v4  ;;  %v3789_v60 = vmax.f32 %v3442_v61, %v4893_v55 }
 0x274   : > { %v3886_v18 = vadd.f32 %v7043_v10, %v3787_v3  ;;  %v3445_v9 = vcombine.high %v3189_v14, %v3189_v14  ;;  %v3452_v7 = vrot.slane %v3189_v14, %v7037_v42  ;;  %v3462_v52 = vcombine.high %v3190_v48, %v3190_v48 }
 0x275   : > { %v3790_v45 = vmax.f32 %v3444_v26, %v4894_v15  ;;  %v3887_v41 = vadd.f32 %v7063_v34, %v3788_v46  ;;  %v3888_v56 = vadd.f32 %v7051_v23, %v3789_v60  ;;  %v3469_v30 = vrot.slane %v3190_v48, %v7037_v42 }
 0x276   : > { %v3950_v57 = vmax.f32 %v3886_v18, 0.0  ;;  %v3459_v37 = vrot.slane %v3445_v9, %v7037_v42  ;;  %v3460_v24 = vcombine.high %v3452_v7, %v3452_v7  ;;  %v4895_v1 = vrot.slane %v3452_v7, 9 }
 0x277   : > { %v3889_v53 = vadd.f32 %v7066_v59, %v3790_v45  ;;  %v3951_v44 = vmax.f32 %v3887_v41, 0.0  ;;  %v3952_v17 = vmax.f32 %v3888_v56, 0.0  ;;  %v3476_v31 = vrot.slane %v3462_v52, %v7037_v42 }
 0x278   : > { %v5023_v0 = vpack.c.bf16 %v3950_v57, %v3950_v57  ;;  %v3461_v54 = vcombine.high %v3459_v37, %v3459_v37  ;;  %v4896_v2 = vrot.slane %v3460_v24, 9  ;;  %v4897_v5 = vrot.slane %v3459_v37, 9 }
 0x279   : > { %v3953_v19 = vmax.f32 %v3889_v53, 0.0  ;;  %v5024_v63 = vpack.c.bf16 %v3951_v44, %v3951_v44  ;;  %v5025_v27 = vpack.c.bf16 %v3952_v17, %v3952_v17  ;;  %v3791_v50 = vmax.f32 %v3452_v7, %v4895_v1 }
 0x27a   : > { %v4270_v12 = vunpack.c.l.b16 %v5023_v0  ;;  %v4898_v8 = vrot.slane %v3461_v54, 9  ;;  %v3792_v28 = vmax.f32 %v3460_v24, %v4896_v2  ;;  %v3793_v22 = vmax.f32 %v3459_v37, %v4897_v5 }
 0x27b   : > { %v5026_v33 = vpack.c.bf16 %v3953_v19, %v3953_v19  ;;  %v4271_v6 = vunpack.c.l.b16 %v5024_v63  ;;  %v4272_v61 = vunpack.c.l.b16 %v5025_v27  ;;  %v3890_v47 = vadd.f32 %v7040_v21, %v3791_v50 }
 0x27c   : > { %v4379_v29 = vrot.slane %v4270_v12, 4  ;;  %v3794_v49 = vmax.f32 %v3461_v54, %v4898_v8  ;;  %v3891_v42 = vadd.f32 %v7055_v36, %v3792_v28  ;;  %v3892_v51 = vadd.f32 %v7047_v40, %v3793_v22 }
 0x27d   : > { %v4273_v20 = vunpack.c.l.b16 %v5026_v33  ;;  %v4381_v16 = vrot.slane %v4271_v6, 3  ;;  %v4383_v35 = vrot.slane %v4272_v61, 2  ;;  %v3954_v38 = vmax.f32 %v3890_v47, 0.0 }
 0x27e   : > { %v4380_v58 = vsel %vm4292_vm10, %v4379_v29, %v4378_v32  ;;  %v3893_v62 = vadd.f32 %v7058_v11, %v3794_v49  ;;  %v3955_v25 = vmax.f32 %v3891_v42, 0.0  ;;  %v3956_v39 = vmax.f32 %v3892_v51, 0.0 }
 0x27f   : > { %v4382_v43 = vsel %vm4295_vm11, %v4381_v16, %v4380_v58  ;;  %v4385_v13 = vrot.slane %v4273_v20, 1  ;;  %v5027_v21 = vpack.c.bf16 %v3954_v38, %v3954_v38  ;;  %v3477_v26 = vcombine.high %v3469_v30, %v3469_v30 }
 0x280   : > { %v4384_v36 = vsel %vm4298_vm12, %v4383_v35, %v4382_v43  ;;  %v3957_v4 = vmax.f32 %v3893_v62, 0.0  ;;  %v5028_v40 = vpack.c.bf16 %v3955_v25, %v3955_v25  ;;  %v5029_v55 = vpack.c.bf16 %v3956_v39, %v3956_v39 }
 0x281   : > { %v4386_v3 = vsel %vm4301_vm13, %v4385_v13, %v4384_v36  ;;  %v3478_v14 = vcombine.high %v3476_v31, %v3476_v31  ;;  %v4899_v48 = vrot.slane %v3469_v30, 9  ;;  %v4900_v32 = vrot.slane %v3477_v26, 9 }
 0x282   : > { %v4407_v15 = vpack.c.b16 %v4386_v3, %v4386_v3  ;;  %v5030_v46 = vpack.c.bf16 %v3957_v4, %v3957_v4  ;;  %v4275_v11 = vunpack.c.l.b16 %v5028_v40  ;;  %v4276_v60 = vunpack.c.l.b16 %v5029_v55 }
 0x283   : > { %v4901_v18 = vrot.slane %v3476_v31, 9  ;;  %v4902_v9 = vrot.slane %v3478_v14, 9  ;;  %v3795_v7 = vmax.f32 %v3469_v30, %v4899_v48  ;;  %v4274_v52 = vunpack.c.l.b16 %v5027_v21 }
 0x284   : > { %4423 = vst [vmem:[%s7115_s10 + $0x18] sm:$0xf] %v4407_v15  ;;  %v4277_v45 = vunpack.c.l.b16 %v5030_v46  ;;  %v4387_v41 = vrot.slane %v4275_v11, 7  ;;  %v3796_v56 = vmax.f32 %v3477_v26, %v4900_v32  ;;  %v4389_v1 = vrot.slane %v4276_v60, 6 }
 0x285   : > { %v3797_v57 = vmax.f32 %v3476_v31, %v4901_v18  ;;  %v3798_v37 = vmax.f32 %v3478_v14, %v4902_v9  ;;  %v3894_v24 = vadd.f32 %v7043_v10, %v3795_v7 }
 0x286   : > { %v4388_v53 = vsel %vm4283_vm7, %v4387_v41, %v4274_v52  ;;  %v3895_v44 = vadd.f32 %v7063_v34, %v3796_v56  ;;  %v4391_v30 = vrot.slane %v4277_v45, 5 }
 0x287   : > { %v3896_v17 = vadd.f32 %v7051_v23, %v3797_v57  ;;  %v3897_v0 = vadd.f32 %v7066_v59, %v3798_v37  ;;  %v3958_v54 = vmax.f32 %v3894_v24, 0.0  ;;  %v4390_v63 = vsel %vm4286_vm8, %v4389_v1, %v4388_v53 }
 0x288   : > { %v3959_v2 = vmax.f32 %v3895_v44, 0.0  ;;  %v4392_v23 = vsel %vm4289_vm9, %v4391_v30, %v4390_v63 }
 0x289   : > { %v3960_v5 = vmax.f32 %v3896_v17, 0.0  ;;  %v3961_v19 = vmax.f32 %v3897_v0, 0.0  ;;  %v5031_v31 = vpack.c.bf16 %v3958_v54, %v3958_v54 }
 0x28a   : > { %v5032_v27 = vpack.c.bf16 %v3959_v2, %v3959_v2 }
 0x28b   : > { %v5033_v50 = vpack.c.bf16 %v3960_v5, %v3960_v5  ;;  %v5034_v10 = vpack.c.bf16 %v3961_v19, %v3961_v19  ;;  %v4278_v12 = vunpack.c.l.b16 %v5031_v31 }
 0x28c   : > { %v4279_v8 = vunpack.c.l.b16 %v5032_v27 }
 0x28d   : > { %v4280_v28 = vunpack.c.l.b16 %v5033_v50  ;;  %v4281_v34 = vunpack.c.l.b16 %v5034_v10  ;;  %v4393_v22 = vrot.slane %v4278_v12, 4 }
 0x28e   : > { %v4395_v59 = vrot.slane %v4279_v8, 3 }
 0x28f   : > { %v4394_v33 = vsel %vm4292_vm10, %v4393_v22, %v4392_v23  ;;  %v4397_v6 = vrot.slane %v4280_v28, 2  ;;  %v4399_v47 = vrot.slane %v4281_v34, 1 }
 0x290   : > { %v4396_v61 = vsel %vm4295_vm11, %v4395_v59, %v4394_v33 }
 0x291   : > { %v4398_v29 = vsel %vm4298_vm12, %v4397_v6, %v4396_v61 }
 0x292   : > { %v4400_v49 = vsel %vm4301_vm13, %v4399_v47, %v4398_v29 }
 0x293   : > { %v4408_v42 = vpack.c.b16 %v4400_v49, %v4400_v49 }
 0x295   : > { %4424 = vst [vmem:[%s7115_s10 + $0x1c] sm:$0xf] %v4408_v42 }
 0x296 PF: > { %s13_s14 = sadd.s32 1, %s5948_s14   ;;  %s7477_s12 = smov %s5944_s13 }
 0x297   : > { %p10_p5 = scmp.ge.s32.totalorder %s13_s14, 4   ;;  %s7478_s13 = smov %s7480_s15 }
 0x299   :  { %12 = sbr.rel (!%p10_p5) target bundleno = 2 (0x2), region = 70 }

// kernel: lidar_backbone_forward.5
= control target key start
LH: loop header
LB: loop body
LE: loop exit
PB: predicated region body
PF: predicated region fallthrough
CT: control target
= control target key end

     0   :  { %s3463_s12 = smov 0   ;;  %s3465_s13 = smov 0   ;;  %s4384_s0 = inlined_call_operand.vmem [shape: bf16[2,1,10,10,128], index: 0, kind: input, shape index: {}]   ;;  %s4385_s1 = inlined_call_operand.vmem [shape: bf16[9,128,256], index: 1, kind: input, shape index: {}]   ;;  %s4386_s2 = inlined_call_operand.vmem [shape: f32[1,256], index: 2, kind: input, shape index: {}]   ;;  %s4387_s3 = inlined_call_operand.vmem [shape: f32[2,16,256], index: 3, kind: output, shape index: {}]  }
   0x1   :  { %s3467_s14 = smov 0  }
   0x2 LB: > { %s25_s15 = sadd.s32 1, %s3435_s13  ;;  %p2689_p0 = scmp.ge.s32.totalorder %s3439_s14, 1  ;;  %s3439_s14 = sphi %s3467_s14, %s13_s14   ;;  %s3435_s13 = sphi %s3465_s13, %s4393_s13   ;;  %s3431_s12 = sphi %s3463_s12, %s4392_s12  }
   0x3   : > { %p27_p1 = scmp.ge.s32.totalorder %s25_s15, 2  ;;  %p157_p2 = scmp.lt.s32.totalorder %s3439_s14, 3 }
   0x5   : > { %s4395_s15 = smov (%p27_p1, %s25_s15), 0  ;;  %p158_p3 = pnand %p2689_p0, %p157_p2 }
   0x6   : > { %v3192_v0 = vld [vmem:[%s4385_s1 + $0x84] ss:$8 sps:$4 sm:$0xff] (!%p158_p3)   ;;  %v3441_v2 = vmov (!%p158_p3), 0   ;;  %v3196_v3 = vld [vmem:[%s4385_s1 + $0x80] ss:$8 sps:$4 sm:$0xff] (!%p158_p3)   ;;  %p190_p4 = scmp.lt.s32.totalorder (!%p158_p3), %s3431_s12, 1 }
   0x7   : > { %161 = sbr.rel (%p158_p3) target bundleno = 436 (0x1b4), region = 32  ;;  %v3194_v1 = vld [vmem:[%s4385_s1 + $0x204] ss:$8 sps:$4 sm:$0xff] (!%p158_p3)   ;;  %507 = vmatprep.mubr.bf16.mxu1 (!%p158_p3), %v3441_v2  ;;  %1318 = vmatprep.mubr.bf16.mxu0 (!%p158_p3), %v3441_v2  ;;  %v3197_v4 = vld [vmem:[%s4385_s1 + $0x200] ss:$8 sps:$4 sm:$0xff] (!%p158_p3)   ;;  %vm733_vm3 = vcmask (!%p158_p3), 1042432  }
   0x8   : > { %475 = vmatprep.subr.bf16.mxu1 (!%p158_p3), %v3192_v0  ;;  %1286 = vmatprep.subr.bf16.mxu0 (!%p158_p3), %v3194_v1  ;;  %v3198_v5 = vld [vmem:[%s4385_s1 + $0x94] ss:$8 sps:$4 sm:$0xff] (!%p158_p3)   ;;  %v3202_v7 = vld [vmem:[%s4385_s1 + $0x90] ss:$8 sps:$4 sm:$0xff] (!%p158_p3)   ;;  %v3204_v9 = vld [vmem:[%s4385_s1 + $0xa4] ss:$8 sps:$4 sm:$0xff] (!%p158_p3)  }
   0x9   : > { %476 = vmatpush1.bf16.msra.mxu1 (!%p158_p3), %v3196_v3  ;;  %1287 = vmatpush1.bf16.msra.mxu0 (!%p158_p3), %v3197_v4  ;;  %v3200_v6 = vld [vmem:[%s4385_s1 + $0x214] ss:$8 sps:$4 sm:$0xff] (!%p158_p3)   ;;  %v3203_v8 = vld [vmem:[%s4385_s1 + $0x210] ss:$8 sps:$4 sm:$0xff] (!%p158_p3)   ;;  %v3206_v10 = vld [vmem:[%s4385_s1 + $0x224] ss:$8 sps:$4 sm:$0xff] (!%p158_p3)  }
   0xa   : > { %477 = vmatprep.subr.bf16.mxu1 (!%p158_p3), %v3198_v5  ;;  %1288 = vmatprep.subr.bf16.mxu0 (!%p158_p3), %v3200_v6  ;;  %v3208_v11 = vld [vmem:[%s4385_s1 + $0xa0] ss:$8 sps:$4 sm:$0xff] (!%p158_p3)   ;;  %v3210_v13 = vld [vmem:[%s4385_s1 + $0xb4] ss:$8 sps:$4 sm:$0xff] (!%p158_p3)   ;;  %v3214_v15 = vld [vmem:[%s4385_s1 + $0xb0] ss:$8 sps:$4 sm:$0xff] (!%p158_p3)  }
   0xb   : > { %v3209_v12 = vld [vmem:[%s4385_s1 + $0x220] ss:$8 sps:$4 sm:$0xff] (!%p158_p3)   ;;  %v3212_v14 = vld [vmem:[%s4385_s1 + $0x234] ss:$8 sps:$4 sm:$0xff] (!%p158_p3)   ;;  %v3215_v16 = vld [vmem:[%s4385_s1 + $0x230] ss:$8 sps:$4 sm:$0xff] (!%p158_p3)  }
   0xc   : > { %v3216_v17 = vld [vmem:[%s4385_s1 + $0xc4] ss:$8 sps:$4 sm:$0xff] (!%p158_p3)   ;;  %v3220_v19 = vld [vmem:[%s4385_s1 + $0xc0] ss:$8 sps:$4 sm:$0xff] (!%p158_p3)   ;;  %v3222_v21 = vld [vmem:[%s4385_s1 + $0xd4] ss:$8 sps:$4 sm:$0xff] (!%p158_p3)  }
   0xd   : > { %478 = vmatpush1.bf16.msra.mxu1 (!%p158_p3), %v3202_v7  ;;  %1289 = vmatpush1.bf16.msra.mxu0 (!%p158_p3), %v3203_v8  ;;  %v3218_v18 = vld [vmem:[%s4385_s1 + $0x244] ss:$8 sps:$4 sm:$0xff] (!%p158_p3)   ;;  %v3221_v20 = vld [vmem:[%s4385_s1 + $0x240] ss:$8 sps:$4 sm:$0xff] (!%p158_p3)   ;;  %v3224_v22 = vld [vmem:[%s4385_s1 + $0x254] ss:$8 sps:$4 sm:$0xff] (!%p158_p3)  }
   0xe   : > { %479 = vmatprep.subr.bf16.mxu1 %v3204_v9  ;;  %1290 = vmatprep.subr.bf16.mxu0 %v3206_v10  ;;  %s4397_s12 = smov (!%p190_p4, %s3431_s12), 1  ;;  %vm247_vm0 = vsmask.f32 3328  ;;  %v3226_v23 = vld [vmem:[%s4385_s1 + $0xd0] ss:$8 sps:$4 sm:$0xff]   ;;  %vm734_vm4 = vcmask 1046532  }
   0xf   : > { %s3165_s29 = smul.u32 80, %s4397_s12  ;;  %vm248_vm1 = vsmask.f32 7440  ;;  %v3227_v24 = vld [vmem:[%s4385_s1 + $0x250] ss:$8 sps:$4 sm:$0xff]   ;;  %vm3658_vm5 = vmor %vm733_vm3, %vm734_vm4  ;;  %vm2546_vm6 = vcmask 1041409  }
  0x10   : > { %v3228_v25 = vld [vmem:[%s4385_s1 + $0xe4] ss:$8 sps:$4 sm:$0xff]   ;;  %v3232_v29 = vld [vmem:[%s4385_s1 + $0xe0] ss:$8 sps:$4 sm:$0xff]   ;;  %v3234_v39 = vld [vmem:[%s4385_s1 + $0xf4] ss:$8 sps:$4 sm:$0xff]  }
  0x11   : > { %480 = vmatpush1.bf16.msra.mxu1 %v3208_v11  ;;  %1291 = vmatpush1.bf16.msra.mxu0 %v3209_v12  ;;  %s3559_s17 = scalar_lea.vmem %s4384_s0, %s3165_s29  ;;  %v3230_v26 = vld [vmem:[%s4385_s1 + $0x264] ss:$8 sps:$4 sm:$0xff]   ;;  %v3233_v38 = vld [vmem:[%s4385_s1 + $0x260] ss:$8 sps:$4 sm:$0xff]   ;;  %v3236_v42 = vld [vmem:[%s4385_s1 + $0x274] ss:$8 sps:$4 sm:$0xff]  }
  0x12   : > { %481 = vmatprep.subr.bf16.mxu1 %v3210_v13  ;;  %1292 = vmatprep.subr.bf16.mxu0 %v3212_v14  ;;  %v3574_v27 = vld [vmem:[%s3559_s17] sm:$0xf]  ;;  %v3577_v28 = vld [vmem:[%s3559_s17 + $0x4] sm:$0x1]  ;;  %v3583_v30 = vld [vmem:[%s3559_s17 + $0x8] sm:$0xf] }
  0x13   : > { %v3586_v31 = vld [vmem:[%s3559_s17 + $0xc] sm:$0x1]  ;;  %v251_v32 = vshrl.u32 %v3574_v27, 16  ;;  %v254_v33 = vshll.u32 %v3574_v27, 16  ;;  %v260_v34 = vshll.u32 %v3577_v28, 16  ;;  %v265_v35 = vshrl.u32 %v3583_v30, 16  ;;  %vm3617_vm2 = vmor %vm247_vm0, %vm248_vm1 }
  0x14   : > { %v268_v36 = vshll.u32 %v3583_v30, 16  ;;  %v274_v37 = vshll.u32 %v3586_v31, 16  ;;  %v3238_v46 = vld [vmem:[%s4385_s1 + $0xf0] ss:$8 sps:$4 sm:$0xff]   ;;  %v3610_v50 = vld [vmem:[%s3559_s17 + $0x14] sm:$0x1] }
  0x15   : > { %482 = vmatpush1.bf16.msra.mxu1 %v3214_v15  ;;  %1293 = vmatpush1.bf16.msra.mxu0 %v3215_v16  ;;  %v253_v40 = vrot.slane %v251_v32, 4  ;;  %v256_v41 = vrot.slane %v254_v33, 5  ;;  %v262_v43 = vrot.slane %v260_v34, 5  ;;  %v267_v44 = vrot.slane %v265_v35, 4  ;;  %v3607_v49 = vld [vmem:[%s3559_s17 + $0x10] sm:$0xf] }
  0x16   : > { %483 = vmatprep.subr.bf16.mxu1 %v3216_v17  ;;  %1294 = vmatprep.subr.bf16.mxu0 %v3218_v18  ;;  %v270_v45 = vrot.slane %v268_v36, 5  ;;  %v276_v48 = vrot.slane %v274_v37, 5  ;;  %v3239_v51 = vld [vmem:[%s4385_s1 + $0x270] ss:$8 sps:$4 sm:$0xff]   ;;  %v279_v54 = vshrl.u32 %v3607_v49, 16  ;;  %v282_v55 = vshll.u32 %v3607_v49, 16 }
  0x17   : > { %v257_v47 = vor.u32 %v256_v41, %v253_v40  ;;  %v288_v56 = vshll.u32 %v3610_v50, 16  ;;  %v3242_v58 = vld [vmem:[%s4385_s1 + $0x4] ss:$8 sps:$4 sm:$0xff]   ;;  %v2809_v59 = vcombine.low %v3583_v30, %v3607_v49  ;;  %v738_v1 = vrot.slane %v3577_v28, 5  ;;  %v3240_v5 = vld [vmem:[%s4385_s1] ss:$8 sps:$4 sm:$0xff]  }
  0x18   : > { %v271_v53 = vor.u32 %v270_v45, %v267_v44  ;;  %v281_v61 = vrot.slane %v279_v54, 4  ;;  %v284_v62 = vrot.slane %v282_v55, 5  ;;  %v3245_v63 = vld [vmem:[%s4385_s1 + $0x284] ss:$8 sps:$4 sm:$0xff]   ;;  %v2749_v3 = vrot.slane %v3574_v27, 9  ;;  %s3020_s21 = sshll.u32 %s4397_s12, 5 }
  0x19   : > { %484 = vmatpush1.bf16.msra.mxu1 %v3220_v19  ;;  %1295 = vmatpush1.bf16.msra.mxu0 %v3221_v20  ;;  %v258_v57 = vrot.slane %v257_v47, 4  ;;  %v290_v7 = vrot.slane %v288_v56, 5  ;;  %v3642_v8 = vld [vmem:[%s3559_s17 + $0x18] sm:$0xf]  ;;  %v3645_v10 = vld [vmem:[%s3559_s17 + $0x1c] sm:$0x1]  ;;  %s208_s23 = scalar_lea.vmem %s4387_s3, %s3020_s21 }
  0x1a   : > { %485 = vmatprep.subr.bf16.mxu1 %v3222_v21  ;;  %1296 = vmatprep.subr.bf16.mxu0 %v3224_v22  ;;  %v272_v60 = vrot.slane %v271_v53, 4  ;;  %v285_v6 = vor.u32 %v284_v62, %v281_v61  ;;  %v293_v11 = vshrl.u32 %v3642_v8, 16  ;;  %v296_v12 = vshll.u32 %v3642_v8, 16  ;;  %v3243_v14 = vld [vmem:[%s4385_s1 + $0x280] ss:$8 sps:$4 sm:$0xff]  }
  0x1b   : > { %v263_v0 = vsel %vm3617_vm2, %v258_v57, %v262_v43  ;;  %v3248_v15 = vld [vmem:[%s4385_s1 + $0x14] ss:$8 sps:$4 sm:$0xff]   ;;  %v302_v16 = vshll.u32 %v3645_v10, 16  ;;  %v3246_v18 = vld [vmem:[%s4385_s1 + $0x10] ss:$8 sps:$4 sm:$0xff]   ;;  %vm2548_vm7 = vcmask 1042434  }
  0x1c   : > { %v277_v4 = vsel %vm3617_vm2, %v272_v60, %v276_v48  ;;  %v286_v13 = vrot.slane %v285_v6, 4  ;;  %v295_v19 = vrot.slane %v293_v11, 4  ;;  %v298_v20 = vrot.slane %v296_v12, 5  ;;  %v3666_v21 = vld [vmem:[%s3559_s17 + $0x20] sm:$0xf] }
  0x1d   : > { %486 = vmatpush1.bf16.msra.mxu1 %v3226_v23  ;;  %1297 = vmatpush1.bf16.msra.mxu0 %v3227_v24  ;;  %v2709_v9 = vcombine.low %v263_v0, %v277_v4  ;;  %v3669_v22 = vld [vmem:[%s3559_s17 + $0x24] sm:$0x1]  ;;  %v3673_v23 = vsel %vm3658_vm5, %v2749_v3, %v738_v1  ;;  %v304_v33 = vrot.slane %v302_v16, 5  ;;  %v3249_v35 = vld [vmem:[%s4385_s1 + $0x290] ss:$8 sps:$4 sm:$0xff]   ;;  %vm2550_vm8 = vcmask 1043459  }
  0x1e   : > { %487 = vmatprep.subr.bf16.mxu1 %v3228_v25  ;;  %1298 = vmatprep.subr.bf16.mxu0 %v3230_v26  ;;  %v291_v24 = vsel %vm3617_vm2, %v286_v13, %v290_v7  ;;  %v307_v25 = vshrl.u32 %v3666_v21, 16  ;;  %v310_v26 = vshll.u32 %v3666_v21, 16  ;;  %v299_v32 = vor.u32 %v298_v20, %v295_v19  ;;  %v3254_v36 = vld [vmem:[%s4385_s1 + $0x24] ss:$8 sps:$4 sm:$0xff]   ;;  %v3252_v41 = vld [vmem:[%s4385_s1 + $0x20] ss:$8 sps:$4 sm:$0xff]  }
  0x1f   : > { %v2845_v28 = vcombine.low %v277_v4, %v291_v24  ;;  %v316_v34 = vshll.u32 %v3669_v22, 16  ;;  %v3700_v45 = vld [vmem:[%s3559_s17 + $0x28] sm:$0xf]  ;;  %v3260_v57 = vld [vmem:[%s4385_s1 + $0x34] ss:$8 sps:$4 sm:$0xff]   ;;  %vm2552_vm9 = vcmask 1044484  }
  0x20   : > { %v309_v37 = vrot.slane %v307_v25, 4  ;;  %v300_v40 = vrot.slane %v299_v32, 4  ;;  %v321_v48 = vshrl.u32 %v3700_v45, 16  ;;  %v3255_v56 = vld [vmem:[%s4385_s1 + $0x2a0] ss:$8 sps:$4 sm:$0xff]   ;;  %vm2554_vm10 = vcmask 1045509  }
  0x21   : > { %488 = vmatpush1.bf16.msra.mxu1 %v3232_v29  ;;  %1299 = vmatpush1.bf16.msra.mxu0 %v3233_v38  ;;  %v3251_v29 = vld [vmem:[%s4385_s1 + $0x294] ss:$8 sps:$4 sm:$0xff]   ;;  %v312_v38 = vrot.slane %v310_v26, 5  ;;  %v318_v44 = vrot.slane %v316_v34, 5  ;;  %v3719_v61 = vld [vmem:[%s3559_s17 + $0x30] sm:$0xf] }
  0x22   : > { %489 = vmatprep.subr.bf16.mxu1 %v3234_v39  ;;  %1300 = vmatprep.subr.bf16.mxu0 %v3236_v42  ;;  %v2810_v39 = vcombine.low %v3642_v8, %v3666_v21  ;;  %v3257_v42 = vld [vmem:[%s4385_s1 + $0x2a4] ss:$8 sps:$4 sm:$0xff]   ;;  %v305_v47 = vsel %vm3617_vm2, %v300_v40, %v304_v33  ;;  %v3728_v0 = vld [vmem:[%s3559_s17 + $0x34] sm:$0x1]  ;;  %v335_v1 = vshrl.u32 %v3719_v61, 16  ;;  %v338_v3 = vshll.u32 %v3719_v61, 16 }
  0x23   : > { %v313_v43 = vor.u32 %v312_v38, %v309_v37  ;;  %v3710_v54 = vcombine.low %v291_v24, %v305_v47  ;;  %v2811_v4 = vcombine.low %v3700_v45, %v3719_v61  ;;  %v3263_v6 = vld [vmem:[%s4385_s1 + $0x2b4] ss:$8 sps:$4 sm:$0xff]   ;;  %v344_v11 = vshll.u32 %v3728_v0, 16  ;;  %v3266_v12 = vld [vmem:[%s4385_s1 + $0x44] ss:$8 sps:$4 sm:$0xff]  }
  0x24   : > { %v337_v13 = vrot.slane %v335_v1, 4  ;;  %v3750_v24 = vld [vmem:[%s3559_s17 + $0x38] sm:$0xf]  ;;  %v3753_v25 = vld [vmem:[%s3559_s17 + $0x3c] sm:$0x1]  ;;  %vm2556_vm11 = vcmask 1046534  }
  0x25   : > { %490 = vmatpush1.bf16.msra.mxu1 %v3238_v46  ;;  %1301 = vmatpush1.bf16.msra.mxu0 %v3239_v51  ;;  %v3703_v46 = vld [vmem:[%s3559_s17 + $0x2c] sm:$0x1]  ;;  %v324_v51 = vshll.u32 %v3700_v45, 16  ;;  %v314_v55 = vrot.slane %v313_v43, 4  ;;  %v346_v20 = vrot.slane %v344_v11, 5  ;;  %v352_v32 = vshll.u32 %v3750_v24, 16 }
  0x26   : > { %652 = vmatprep.subr.bf16.mxu1 %v3242_v58  ;;  %1486 = vmatprep.subr.bf16.mxu0 %v3245_v63  ;;  %v330_v53 = vshll.u32 %v3703_v46, 16  ;;  %v323_v58 = vrot.slane %v321_v48, 4  ;;  %v3258_v63 = vld [vmem:[%s4385_s1 + $0x30] ss:$8 sps:$4 sm:$0xff]   ;;  %v358_v33 = vshll.u32 %v3753_v25, 16  ;;  %vm2558_vm12 = vcmask 1047559  }
  0x27   : > { %v326_v60 = vrot.slane %v324_v51, 5  ;;  %v319_v62 = vsel %vm3617_vm2, %v314_v55, %v318_v44  ;;  %v3272_v37 = vld [vmem:[%s4385_s1 + $0x54] ss:$8 sps:$4 sm:$0xff]   ;;  %v3772_v38 = vld [vmem:[%s3559_s17 + $0x40] sm:$0xf] }
  0x28   : > { %508 = vmatmul.mubr.bf16.vlgmr.msra.gmra.mrb[0].mxu1 %v2709_v9  ;;  %1319 = vmatmul.mubr.bf16.vlgmr.msra.gmra.mrb[0].mxu0 %v2845_v28  ;;  %v332_v9 = vrot.slane %v330_v53, 5  ;;  %v3269_v28 = vld [vmem:[%s4385_s1 + $0x2c4] ss:$8 sps:$4 sm:$0xff]   ;;  %v1167_v43 = vshrl.u32 %v3772_v38, 16  ;;  %v1170_v48 = vshll.u32 %v3772_v38, 16  ;;  %v2812_v53 = vcombine.low %v3750_v24, %v3772_v38 }
  0x29   : > { %653 = vmatpush1.bf16.msra.mxu1 %v3240_v5  ;;  %517 = vmatprep.mubr.bf16.mxu1 %v3441_v2  ;;  %v2846_v5 = vcombine.low %v305_v47, %v319_v62  ;;  %v327_v7 = vor.u32 %v326_v60, %v323_v58  ;;  %v3270_v47 = vld [vmem:[%s4385_s1 + $0x50] ss:$8 sps:$4 sm:$0xff]   ;;  %v360_v58 = vrot.slane %v358_v33, 5  ;;  %v3281_v11 = vld [vmem:[%s4385_s1 + $0x2e4] ss:$8 sps:$4 sm:$0xff]   ;;  %v2729_v33 = vcombine.low %v3574_v27, %v3583_v30 }
  0x2a   : > { %654 = vmatprep.subr.bf16.mxu1 %v3248_v15  ;;  %1487 = vmatpush1.bf16.msra.mxu0 %v3243_v14  ;;  %v340_v14 = vrot.slane %v338_v3, 5  ;;  %v3261_v15 = vld [vmem:[%s4385_s1 + $0x2b0] ss:$8 sps:$4 sm:$0xff]   ;;  %v1169_v60 = vrot.slane %v1167_v43, 4  ;;  %v3297_v27 = vld [vmem:[%s4385_s1 + $0x114] ss:$8 sps:$4 sm:$0xff]  }
  0x2b   : > { %1328 = vmatprep.mubr.bf16.mxu0 %v3441_v2  ;;  %1488 = vmatprep.subr.bf16.mxu0 %v3251_v29  ;;  %v328_v16 = vrot.slane %v327_v7, 4  ;;  %v349_v29 = vshrl.u32 %v3750_v24, 16  ;;  %v3273_v3 = vld [vmem:[%s4385_s1 + $0x2d0] ss:$8 sps:$4 sm:$0xff]   ;;  %v3292_v43 = vld [vmem:[%s4385_s1 + $0x300] ss:$8 sps:$4 sm:$0xff]  }
  0x2c   : > { %v341_v19 = vor.u32 %v340_v14, %v337_v13  ;;  %v3284_v14 = vld [vmem:[%s4385_s1 + $0x74] ss:$8 sps:$4 sm:$0xff]   ;;  %v3414_v52 = vld [vmem:[%s4385_s1 + $0x470] ss:$8 sps:$4 sm:$0xff]  }
  0x2d   : > { %655 = vmatpush1.bf16.msra.mxu1 %v3246_v18  ;;  %v3264_v18 = vld [vmem:[%s4385_s1 + $0x40] ss:$8 sps:$4 sm:$0xff]   ;;  %v333_v26 = vsel %vm3617_vm2, %v328_v16, %v332_v9  ;;  %v351_v40 = vrot.slane %v349_v29, 4  ;;  %v746_v16 = vrot.slane %v3610_v50, 5  ;;  %v3291_v29 = vld [vmem:[%s4385_s1 + $0x104] ss:$8 sps:$4 sm:$0xff]  }
  0x2e   : > { %656 = vmatprep.subr.bf16.mxu1 %v3254_v36  ;;  %1489 = vmatpush1.bf16.msra.mxu0 %v3249_v35  ;;  %v3763_v34 = vcombine.low %v319_v62, %v333_v26  ;;  %v342_v35 = vrot.slane %v341_v19, 4  ;;  %v3267_v36 = vld [vmem:[%s4385_s1 + $0x2c0] ss:$8 sps:$4 sm:$0xff]   ;;  %v3278_v62 = vld [vmem:[%s4385_s1 + $0x64] ss:$8 sps:$4 sm:$0xff]  }
  0x2f   : > { %1490 = vmatprep.subr.bf16.mxu0 %v3257_v42  ;;  %v3775_v42 = vld [vmem:[%s3559_s17 + $0x44] sm:$0x1] }
  0x30   : > { %518 = vmatmul.mubr.bf16.gmra.mrb[4].mxu1 %v3710_v54  ;;  %1329 = vmatmul.mubr.bf16.gmra.mrb[4].mxu0 %v2846_v5  ;;  %v347_v44 = vsel %vm3617_vm2, %v342_v35, %v346_v20  ;;  %v1176_v51 = vshll.u32 %v3775_v42, 16  ;;  %v3276_v5 = vld [vmem:[%s4385_s1 + $0x60] ss:$8 sps:$4 sm:$0xff]  }
  0x31   : > { %657 = vmatpush1.bf16.msra.mxu1 %v3252_v41  ;;  %527 = vmatprep.mubr.bf16.mxu1 %v3441_v2  ;;  %v354_v41 = vrot.slane %v352_v32, 5  ;;  %v2847_v55 = vcombine.low %v333_v26, %v347_v44  ;;  %v3279_v20 = vld [vmem:[%s4385_s1 + $0x2e0] ss:$8 sps:$4 sm:$0xff]   ;;  %v3282_v26 = vld [vmem:[%s4385_s1 + $0x70] ss:$8 sps:$4 sm:$0xff]  }
  0x32   : > { %658 = vmatprep.subr.bf16.mxu1 %v3260_v57  ;;  %1491 = vmatpush1.bf16.msra.mxu0 %v3255_v56  ;;  %v3275_v56 = vld [vmem:[%s4385_s1 + $0x2d4] ss:$8 sps:$4 sm:$0xff]   ;;  %v1178_v7 = vrot.slane %v1176_v51, 5  ;;  %v3285_v32 = vld [vmem:[%s4385_s1 + $0x2f0] ss:$8 sps:$4 sm:$0xff]   ;;  %v2753_v51 = vrot.slane %v3666_v21, 9 }
  0x33   : > { %1338 = vmatprep.mubr.bf16.mxu0 %v3441_v2  ;;  %1492 = vmatprep.subr.bf16.mxu0 %v3263_v6  ;;  %v355_v57 = vor.u32 %v354_v41, %v351_v40  ;;  %v3289_v35 = vld [vmem:[%s4385_s1 + $0x100] ss:$8 sps:$4 sm:$0xff]   ;;  %v3294_v40 = vld [vmem:[%s4385_s1 + $0x304] ss:$8 sps:$4 sm:$0xff]  }
  0x35   : > { %659 = vmatpush1.bf16.msra.mxu1 %v3258_v63  ;;  %v1172_v63 = vrot.slane %v1170_v48, 5  ;;  %v356_v1 = vrot.slane %v355_v57, 4  ;;  %v750_v48 = vrot.slane %v3645_v10, 5  ;;  %v3304_v57 = vld [vmem:[%s4385_s1 + $0x124] ss:$8 sps:$4 sm:$0xff]  }
  0x36   : > { %660 = vmatprep.subr.bf16.mxu1 %v3266_v12  ;;  %1493 = vmatpush1.bf16.msra.mxu0 %v3261_v15  ;;  %v742_v15 = vrot.slane %v3586_v31, 5  ;;  %v2751_v31 = vrot.slane %v3607_v49, 9  ;;  %v3298_v10 = vld [vmem:[%s4385_s1 + $0x310] ss:$8 sps:$4 sm:$0xff]  }
  0x37   : > { %1494 = vmatprep.subr.bf16.mxu0 %v3269_v28  ;;  %v1173_v6 = vor.u32 %v1172_v63, %v1169_v60  ;;  %v361_v9 = vsel %vm3617_vm2, %v356_v1, %v360_v58  ;;  %v3287_v28 = vld [vmem:[%s4385_s1 + $0x2f4] ss:$8 sps:$4 sm:$0xff]   ;;  %v3302_v58 = vld [vmem:[%s4385_s1 + $0x120] ss:$8 sps:$4 sm:$0xff]   ;;  %v3307_v63 = vld [vmem:[%s4385_s1 + $0x324] ss:$8 sps:$4 sm:$0xff]  }
  0x38   : > { %528 = vmatmul.mubr.bf16.gmra.mrb[8].mxu1 %v3763_v34  ;;  %1339 = vmatmul.mubr.bf16.gmra.mrb[8].mxu0 %v2847_v55  ;;  %v3807_v12 = vcombine.low %v347_v44, %v361_v9  ;;  %v2752_v44 = vrot.slane %v3642_v8, 9  ;;  %v754_v55 = vrot.slane %v3669_v22, 5  ;;  %v3883_v22 = vcombine.low %v3607_v49, %v3642_v8  ;;  %v3310_v1 = vld [vmem:[%s4385_s1 + $0x134] ss:$8 sps:$4 sm:$0xff]   ;;  %v3397_v49 = vld [vmem:[%s4385_s1 + $0x420] ss:$8 sps:$4 sm:$0xff]  }
  0x39   : > { %661 = vmatpush1.bf16.msra.mxu1 %v3264_v18  ;;  %537 = vmatprep.mubr.bf16.mxu1 %v3441_v2  ;;  %v1174_v13 = vrot.slane %v1173_v6, 4  ;;  %v2750_v18 = vrot.slane %v3583_v30, 9  ;;  %v758_v6 = vrot.slane %v3703_v46, 5  ;;  %v3313_v46 = vld [vmem:[%s4385_s1 + $0x334] ss:$8 sps:$4 sm:$0xff]  }
  0x3a   : > { %662 = vmatprep.subr.bf16.mxu1 %v3272_v37  ;;  %1495 = vmatpush1.bf16.msra.mxu0 %v3267_v36  ;;  %v3850_v37 = vsel %vm3658_vm5, %v2751_v31, %v746_v16  ;;  %v3890_v60 = vsel %vm3658_vm5, %v2752_v44, %v750_v48  ;;  %v3315_v16 = vld [vmem:[%s4385_s1 + $0x140] ss:$8 sps:$4 sm:$0xff]   ;;  %v3323_v31 = vld [vmem:[%s4385_s1 + $0x154] ss:$8 sps:$4 sm:$0xff]   ;;  %v3333_v48 = vld [vmem:[%s4385_s1 + $0x364] ss:$8 sps:$4 sm:$0xff]  }
  0x3b   : > { %1348 = vmatprep.mubr.bf16.mxu0 %v3441_v2  ;;  %1496 = vmatprep.subr.bf16.mxu0 %v3275_v56  ;;  %v3818_v19 = vsel %vm3617_vm2, %v1174_v13, %v1178_v7  ;;  %v3846_v36 = vsel %vm3658_vm5, %v2750_v18, %v742_v15  ;;  %v3300_v56 = vld [vmem:[%s4385_s1 + $0x314] ss:$8 sps:$4 sm:$0xff]   ;;  %v2755_v7 = vrot.slane %v3719_v61, 9  ;;  %v762_v13 = vrot.slane %v3728_v0, 5  ;;  %v3311_v15 = vld [vmem:[%s4385_s1 + $0x330] ss:$8 sps:$4 sm:$0xff]  }
  0x3c   : > { %v2848_v50 = vcombine.low %v361_v9, %v3818_v19  ;;  %v2882_v41 = vcombine.low %v3846_v36, %v3850_v37  ;;  %v3305_v9 = vld [vmem:[%s4385_s1 + $0x320] ss:$8 sps:$4 sm:$0xff]   ;;  %v3928_v0 = vcombine.low %v3666_v21, %v3700_v45 }
  0x3d   : > { %663 = vmatpush1.bf16.msra.mxu1 %v3270_v47  ;;  %v3295_v47 = vld [vmem:[%s4385_s1 + $0x110] ss:$8 sps:$4 sm:$0xff]  }
  0x3e   : > { %664 = vmatprep.subr.bf16.mxu1 %v3278_v62  ;;  %1497 = vmatpush1.bf16.msra.mxu0 %v3273_v3  ;;  %v3894_v62 = vsel %vm3658_vm5, %v2753_v51, %v754_v55  ;;  %v3336_v51 = vld [vmem:[%s4385_s1 + $0x174] ss:$8 sps:$4 sm:$0xff]  }
  0x3f   : > { %1498 = vmatprep.subr.bf16.mxu0 %v3281_v11  ;;  %v2883_v3 = vcombine.low %v3890_v60, %v3894_v62  ;;  %v3308_v11 = vld [vmem:[%s4385_s1 + $0x130] ss:$8 sps:$4 sm:$0xff]  }
  0x40   : > { %538 = vmatmul.mubr.bf16.gmra.mrb[12].mxu1 %v3807_v12  ;;  %1349 = vmatmul.mubr.bf16.gmra.mrb[12].mxu0 %v2848_v50 }
  0x41   : > { %665 = vmatpush1.bf16.msra.mxu1 %v3276_v5  ;;  %684 = vmatprep.mubr.bf16.mxu1 %v3441_v2  ;;  %v2754_v5 = vrot.slane %v3700_v45, 9 }
  0x42   : > { %666 = vmatprep.subr.bf16.mxu1 %v3284_v14  ;;  %1499 = vmatpush1.bf16.msra.mxu0 %v3279_v20  ;;  %v3317_v14 = vld [vmem:[%s4385_s1 + $0x144] ss:$8 sps:$4 sm:$0xff]   ;;  %v3939_v20 = vsel %vm3658_vm5, %v2755_v7, %v762_v13  ;;  %v3343_v7 = vld [vmem:[%s4385_s1 + $0x380] ss:$8 sps:$4 sm:$0xff]   ;;  %v4043_v13 = vcombine.low %v3850_v37, %v3890_v60  ;;  %v3358_v60 = vld [vmem:[%s4385_s1 + $0x1b0] ss:$8 sps:$4 sm:$0xff]  }
  0x43   : > { %1518 = vmatprep.mubr.bf16.mxu0 %v3441_v2  ;;  %1500 = vmatprep.subr.bf16.mxu0 %v3287_v28  ;;  %v3935_v18 = vsel %vm3658_vm5, %v2754_v5, %v758_v6  ;;  %v2756_v28 = vrot.slane %v3750_v24, 9  ;;  %v3345_v5 = vld [vmem:[%s4385_s1 + $0x384] ss:$8 sps:$4 sm:$0xff]   ;;  %v3348_v6 = vld [vmem:[%s4385_s1 + $0x194] ss:$8 sps:$4 sm:$0xff]  }
  0x44   : > { %v2884_v50 = vcombine.low %v3935_v18, %v3939_v20  ;;  %v3355_v37 = vld [vmem:[%s4385_s1 + $0x3a0] ss:$8 sps:$4 sm:$0xff]  }
  0x45   : > { %667 = vmatpush1.bf16.msra.mxu1 %v3282_v26  ;;  %v3320_v26 = vld [vmem:[%s4385_s1 + $0x344] ss:$8 sps:$4 sm:$0xff]  }
  0x46   : > { %881 = vmatprep.subr.bf16.mxu1 %v3291_v29  ;;  %1501 = vmatpush1.bf16.msra.mxu0 %v3285_v32  ;;  %v766_v29 = vrot.slane %v3753_v25, 5  ;;  %v2865_v32 = vrot.slane %v3772_v38, 9  ;;  %v3326_v25 = vld [vmem:[%s4385_s1 + $0x354] ss:$8 sps:$4 sm:$0xff]  }
  0x47   : > { %1676 = vmatprep.subr.bf16.mxu0 %v3294_v40  ;;  %v1378_v40 = vrot.slane %v3775_v42, 5  ;;  %v3973_v42 = vcombine.low %v3719_v61, %v3750_v24  ;;  %v3411_v61 = vld [vmem:[%s4385_s1 + $0x460] ss:$8 sps:$4 sm:$0xff]  }
  0x48   : > { %685 = vmatmul.mubr.bf16.vlgmr.msra.gmra.mrb[0].mxu1 %v2729_v33  ;;  %v3318_v33 = vld [vmem:[%s4385_s1 + $0x340] ss:$8 sps:$4 sm:$0xff]   ;;  %v3980_v44 = vsel %vm3658_vm5, %v2756_v28, %v766_v29  ;;  %v3372_v28 = vld [vmem:[%s4385_s1 + $0x1d4] ss:$8 sps:$4 sm:$0xff]  }
  0x49   : > { %882 = vmatpush1.bf16.msra.mxu1 %v3289_v35  ;;  %694 = vmatprep.mubr.bf16.mxu1 %v3441_v2  ;;  %v3321_v35 = vld [vmem:[%s4385_s1 + $0x150] ss:$8 sps:$4 sm:$0xff]   ;;  %v3375_v29 = vld [vmem:[%s4385_s1 + $0x3d4] ss:$8 sps:$4 sm:$0xff]  }
  0x4a   : > { %883 = vmatprep.subr.bf16.mxu1 %v3297_v27  ;;  %1519 = vmatmul.mubr.bf16.vlgmr.msra.gmra.mrb[0].mxu0 %v2882_v41  ;;  %v3330_v27 = vld [vmem:[%s4385_s1 + $0x164] ss:$8 sps:$4 sm:$0xff]   ;;  %v3324_v41 = vld [vmem:[%s4385_s1 + $0x350] ss:$8 sps:$4 sm:$0xff]  }
  0x4b   : > { %1677 = vmatpush1.bf16.msra.mxu0 %v3292_v43  ;;  %1528 = vmatprep.mubr.bf16.mxu0 %v3441_v2  ;;  %v3328_v43 = vld [vmem:[%s4385_s1 + $0x160] ss:$8 sps:$4 sm:$0xff]  }
  0x4c   : > { %1678 = vmatprep.subr.bf16.mxu0 %v3300_v56  ;;  %v3331_v56 = vld [vmem:[%s4385_s1 + $0x360] ss:$8 sps:$4 sm:$0xff]  }
  0x4d   : > { %884 = vmatpush1.bf16.msra.mxu1 %v3295_v47  ;;  %v3984_v47 = vsel %vm3658_vm5, %v2865_v32, %v1378_v40  ;;  %v3378_v32 = vld [vmem:[%s4385_s1 + $0x1e4] ss:$8 sps:$4 sm:$0xff]   ;;  %v4110_v40 = vld [vmem:[%s3559_s17 + $0x48] sm:$0xf] }
  0x4e   : > { %885 = vmatprep.subr.bf16.mxu1 %v3304_v57  ;;  %v2885_v55 = vcombine.low %v3980_v44, %v3984_v47  ;;  %v3334_v57 = vld [vmem:[%s4385_s1 + $0x170] ss:$8 sps:$4 sm:$0xff]   ;;  %v1769_v30 = vshll.u32 %v4110_v40, 16 }
  0x4f   : > { %1679 = vmatpush1.bf16.msra.mxu0 %v3298_v10  ;;  %v3339_v10 = vld [vmem:[%s4385_s1 + $0x374] ss:$8 sps:$4 sm:$0xff]  }
  0x50   : > { %695 = vmatmul.mubr.bf16.gmra.mrb[4].mxu1 %v3883_v22  ;;  %1680 = vmatprep.subr.bf16.mxu0 %v3307_v63  ;;  %v3337_v63 = vld [vmem:[%s4385_s1 + $0x370] ss:$8 sps:$4 sm:$0xff]  }
  0x51   : > { %886 = vmatpush1.bf16.msra.mxu1 %v3302_v58  ;;  %704 = vmatprep.mubr.bf16.mxu1 %v3441_v2  ;;  %v3342_v58 = vld [vmem:[%s4385_s1 + $0x184] ss:$8 sps:$4 sm:$0xff]  }
  0x52   : > { %887 = vmatprep.subr.bf16.mxu1 %v3310_v1  ;;  %1529 = vmatmul.mubr.bf16.gmra.mrb[4].mxu0 %v2883_v3  ;;  %v2773_v1 = vcombine.low %v3673_v23, %v3846_v36  ;;  %v3340_v3 = vld [vmem:[%s4385_s1 + $0x180] ss:$8 sps:$4 sm:$0xff]   ;;  %v3346_v23 = vld [vmem:[%s4385_s1 + $0x190] ss:$8 sps:$4 sm:$0xff]   ;;  %v3351_v36 = vld [vmem:[%s4385_s1 + $0x394] ss:$8 sps:$4 sm:$0xff]  }
  0x53   : > { %1681 = vmatpush1.bf16.msra.mxu0 %v3305_v9  ;;  %1538 = vmatprep.mubr.bf16.mxu0 %v3441_v2  ;;  %v3354_v9 = vld [vmem:[%s4385_s1 + $0x1a4] ss:$8 sps:$4 sm:$0xff]  }
  0x54   : > { %1682 = vmatprep.subr.bf16.mxu0 %v3313_v46  ;;  %v3352_v46 = vld [vmem:[%s4385_s1 + $0x1a0] ss:$8 sps:$4 sm:$0xff]  }
  0x55   : > { %888 = vmatpush1.bf16.msra.mxu1 %v3308_v11  ;;  %v3349_v11 = vld [vmem:[%s4385_s1 + $0x390] ss:$8 sps:$4 sm:$0xff]  }
  0x56   : > { %889 = vmatprep.subr.bf16.mxu1 %v3317_v14  ;;  %v3360_v14 = vld [vmem:[%s4385_s1 + $0x1b4] ss:$8 sps:$4 sm:$0xff]  }
  0x57   : > { %1683 = vmatpush1.bf16.msra.mxu0 %v3311_v15  ;;  %v3363_v15 = vld [vmem:[%s4385_s1 + $0x3b4] ss:$8 sps:$4 sm:$0xff]  }
  0x58   : > { %705 = vmatmul.mubr.bf16.gmra.mrb[8].mxu1 %v3928_v0  ;;  %1684 = vmatprep.subr.bf16.mxu0 %v3320_v26  ;;  %v3361_v26 = vld [vmem:[%s4385_s1 + $0x3b0] ss:$8 sps:$4 sm:$0xff]  }
  0x59   : > { %890 = vmatpush1.bf16.msra.mxu1 %v3315_v16  ;;  %714 = vmatprep.mubr.bf16.mxu1 %v3441_v2  ;;  %v3366_v16 = vld [vmem:[%s4385_s1 + $0x1c4] ss:$8 sps:$4 sm:$0xff]  }
  0x5a   : > { %891 = vmatprep.subr.bf16.mxu1 %v3323_v31  ;;  %1539 = vmatmul.mubr.bf16.gmra.mrb[8].mxu0 %v2884_v50  ;;  %v4075_v31 = vcombine.low %v3894_v62, %v3935_v18  ;;  %v3364_v50 = vld [vmem:[%s4385_s1 + $0x1c0] ss:$8 sps:$4 sm:$0xff]   ;;  %v3370_v18 = vld [vmem:[%s4385_s1 + $0x1d0] ss:$8 sps:$4 sm:$0xff]  }
  0x5b   : > { %1685 = vmatpush1.bf16.msra.mxu0 %v3318_v33  ;;  %1548 = vmatprep.mubr.bf16.mxu0 %v3441_v2  ;;  %v3367_v62 = vld [vmem:[%s4385_s1 + $0x3c0] ss:$8 sps:$4 sm:$0xff]   ;;  %v3373_v33 = vld [vmem:[%s4385_s1 + $0x3d0] ss:$8 sps:$4 sm:$0xff]  }
  0x5c   : > { %1686 = vmatprep.subr.bf16.mxu0 %v3326_v25  ;;  %v3376_v25 = vld [vmem:[%s4385_s1 + $0x1e0] ss:$8 sps:$4 sm:$0xff]  }
  0x5d   : > { %892 = vmatpush1.bf16.msra.mxu1 %v3321_v35  ;;  %v4107_v35 = vcombine.low %v3939_v20, %v3980_v44  ;;  %v2918_v20 = vcombine.low %v3772_v38, %v4110_v40  ;;  %v3388_v44 = vld [vmem:[%s4385_s1 + $0x3f4] ss:$8 sps:$4 sm:$0xff]  }
  0x5e   : > { %893 = vmatprep.subr.bf16.mxu1 %v3330_v27  ;;  %v3382_v27 = vld [vmem:[%s4385_s1 + $0x3e4] ss:$8 sps:$4 sm:$0xff]  }
  0x5f   : > { %1687 = vmatpush1.bf16.msra.mxu0 %v3324_v41  ;;  %v3385_v41 = vld [vmem:[%s4385_s1 + $0x1f4] ss:$8 sps:$4 sm:$0xff]  }
  0x60   : > { %715 = vmatmul.mubr.bf16.gmra.mrb[12].mxu1 %v3973_v42  ;;  %1688 = vmatprep.subr.bf16.mxu0 %v3333_v48  ;;  %v3392_v48 = vld [vmem:[%s4385_s1 + $0x404] ss:$8 sps:$4 sm:$0xff]  }
  0x61   : > { %894 = vmatpush1.bf16.msra.mxu1 %v3328_v43  ;;  %913 = vmatprep.mubr.bf16.mxu1 %v3441_v2  ;;  %v3383_v43 = vld [vmem:[%s4385_s1 + $0x1f0] ss:$8 sps:$4 sm:$0xff]  }
  0x62   : > { %895 = vmatprep.subr.bf16.mxu1 %v3336_v51  ;;  %1549 = vmatmul.mubr.bf16.gmra.mrb[12].mxu0 %v2885_v55  ;;  %v3386_v51 = vld [vmem:[%s4385_s1 + $0x3f0] ss:$8 sps:$4 sm:$0xff]   ;;  %v3390_v55 = vld [vmem:[%s4385_s1 + $0x400] ss:$8 sps:$4 sm:$0xff]  }
  0x63   : > { %1689 = vmatpush1.bf16.msra.mxu0 %v3331_v56  ;;  %1708 = vmatprep.mubr.bf16.mxu0 %v3441_v2  ;;  %v3395_v56 = vld [vmem:[%s4385_s1 + $0x414] ss:$8 sps:$4 sm:$0xff]  }
  0x64   : > { %1690 = vmatprep.subr.bf16.mxu0 %v3339_v10  ;;  %v3399_v10 = vld [vmem:[%s4385_s1 + $0x424] ss:$8 sps:$4 sm:$0xff]  }
  0x65   : > { %896 = vmatpush1.bf16.msra.mxu1 %v3334_v57  ;;  %v3393_v57 = vld [vmem:[%s4385_s1 + $0x410] ss:$8 sps:$4 sm:$0xff]  }
  0x66   : > { %1077 = vmatprep.subr.bf16.mxu1 %v3342_v58  ;;  %v1766_v58 = vshrl.u32 %v4110_v40, 16 }
  0x67   : > { %1691 = vmatpush1.bf16.msra.mxu0 %v3337_v63  ;;  %v1771_v63 = vrot.slane %v1769_v30, 5 }
  0x68   : > { %914 = vmatmul.mubr.bf16.vlgmr.msra.gmra.mrb[0].mxu1 %v2773_v1  ;;  %1879 = vmatprep.subr.bf16.mxu0 %v3345_v5  ;;  %v3400_v1 = vld [vmem:[%s4385_s1 + $0x430] ss:$8 sps:$4 sm:$0xff]   ;;  %v3406_v5 = vld [vmem:[%s4385_s1 + $0x444] ss:$8 sps:$4 sm:$0xff]  }
  0x69   : > { %1078 = vmatpush1.bf16.msra.mxu1 %v3340_v3  ;;  %923 = vmatprep.mubr.bf16.mxu1 %v3441_v2  ;;  %v230_v3 = vld [vmem:[%s3559_s17 + $0x4c] sm:$0x1] }
  0x6a   : > { %1079 = vmatprep.subr.bf16.mxu1 %v3348_v6  ;;  %1709 = vmatmul.mubr.bf16.vlgmr.msra.gmra.mrb[0].mxu0 %v3883_v22  ;;  %v3357_v22 = vld [vmem:[%s4385_s1 + $0x3a4] ss:$8 sps:$4 sm:$0xff]   ;;  %v1775_v21 = vshll.u32 %v230_v3, 16  ;;  %v3409_v6 = vld [vmem:[%s4385_s1 + $0x454] ss:$8 sps:$4 sm:$0xff]  }
  0x6b   : > { %1880 = vmatpush1.bf16.msra.mxu0 %v3343_v7  ;;  %1718 = vmatprep.mubr.bf16.mxu0 %v3441_v2 }
  0x6c   : > { %1881 = vmatprep.subr.bf16.mxu0 %v3351_v36  ;;  %v1777_v7 = vrot.slane %v1775_v21, 5  ;;  %v3413_v36 = vld [vmem:[%s4385_s1 + $0x464] ss:$8 sps:$4 sm:$0xff]  }
  0x6d   : > { %1080 = vmatpush1.bf16.msra.mxu1 %v3346_v23  ;;  %v3407_v23 = vld [vmem:[%s4385_s1 + $0x450] ss:$8 sps:$4 sm:$0xff]  }
  0x6e   : > { %1081 = vmatprep.subr.bf16.mxu1 %v3354_v9 }
  0x6f   : > { %1882 = vmatpush1.bf16.msra.mxu0 %v3349_v11 }
  0x70   : > { %924 = vmatmul.mubr.bf16.gmra.mrb[4].mxu1 %v4043_v13  ;;  %1883 = vmatprep.subr.bf16.mxu0 %v3357_v22 }
  0x71   : > { %1082 = vmatpush1.bf16.msra.mxu1 %v3352_v46  ;;  %933 = vmatprep.mubr.bf16.mxu1 %v3441_v2 }
  0x72   : > { %1083 = vmatprep.subr.bf16.mxu1 %v3360_v14  ;;  %1719 = vmatmul.mubr.bf16.gmra.mrb[4].mxu0 %v3928_v0  ;;  %v3369_v0 = vld [vmem:[%s4385_s1 + $0x3c4] ss:$8 sps:$4 sm:$0xff]  }
  0x73   : > { %1884 = vmatpush1.bf16.msra.mxu0 %v3355_v37  ;;  %1728 = vmatprep.mubr.bf16.mxu0 %v3441_v2 }
  0x74   : > { %1885 = vmatprep.subr.bf16.mxu0 %v3363_v15 }
  0x75   : > { %1084 = vmatpush1.bf16.msra.mxu1 %v3358_v60 }
  0x76   : > { %1085 = vmatprep.subr.bf16.mxu1 %v3366_v16 }
  0x77   : > { %1886 = vmatpush1.bf16.msra.mxu0 %v3361_v26 }
  0x78   : > { %934 = vmatmul.mubr.bf16.gmra.mrb[8].mxu1 %v4075_v31  ;;  %1887 = vmatprep.subr.bf16.mxu0 %v3369_v0 }
  0x79   : > { %1086 = vmatpush1.bf16.msra.mxu1 %v3364_v50  ;;  %943 = vmatprep.mubr.bf16.mxu1 %v3441_v2 }
  0x7a   : > { %1087 = vmatprep.subr.bf16.mxu1 %v3372_v28  ;;  %1729 = vmatmul.mubr.bf16.gmra.mrb[8].mxu0 %v3973_v42  ;;  %v3380_v42 = vld [vmem:[%s4385_s1 + $0x3e0] ss:$8 sps:$4 sm:$0xff]  }
  0x7b   : > { %1888 = vmatpush1.bf16.msra.mxu0 %v3367_v62  ;;  %1738 = vmatprep.mubr.bf16.mxu0 %v3441_v2 }
  0x7c   : > { %1889 = vmatprep.subr.bf16.mxu0 %v3375_v29 }
  0x7d   : > { %1088 = vmatpush1.bf16.msra.mxu1 %v3370_v18 }
  0x7e   : > { %1089 = vmatprep.subr.bf16.mxu1 %v3378_v32 }
  0x7f   : > { %1890 = vmatpush1.bf16.msra.mxu0 %v3373_v33 }
  0x80   : > { %944 = vmatmul.mubr.bf16.gmra.mrb[12].mxu1 %v4107_v35  ;;  %1891 = vmatprep.subr.bf16.mxu0 %v3382_v27 }
  0x81   : > { %1090 = vmatpush1.bf16.msra.mxu1 %v3376_v25  ;;  %1109 = vmatprep.mubr.bf16.mxu1 %v3441_v2  ;;  %v3442_v25 = vmov 1983009808  }
  0x82   : > { %1091 = vmatprep.subr.bf16.mxu1 %v3385_v41  ;;  %1739 = vmatmul.mubr.bf16.gmra.mrb[12].mxu0 %v2918_v20  ;;  %v2181_v27 = vunpack.c.l.s4 %v3442_v25 }
  0x83   : > { %1892 = vmatpush1.bf16.msra.mxu0 %v3380_v42  ;;  %1911 = vmatprep.mubr.bf16.mxu0 %v3441_v2 }
  0x84   : > { %1893 = vmatprep.subr.bf16.mxu0 %v3388_v44 }
  0x85   : > { %1092 = vmatpush1.bf16.msra.mxu1 %v3383_v43 }
  0x86   : > { %3021 = vmatprep.subr.bf16.mxu1 %v3392_v48 }
  0x87   : > { %1894 = vmatpush1.bf16.msra.mxu0 %v3386_v51 }
  0x88   : > { %1110 = vmatmul.mubr.bf16.vlgmr.msra.gmra.mrb[0].mxu1 %v2809_v59  ;;  %2073 = vmatprep.subr.bf16.mxu0 %v3392_v48  ;;  %v3402_v59 = vld [vmem:[%s4385_s1 + $0x434] ss:$8 sps:$4 sm:$0xff]  }
  0x89   : > { %3029 = vmatpush1.bf16.msra.mxu1 %v3390_v55  ;;  %1119 = vmatprep.mubr.bf16.mxu1 %v3441_v2 }
  0x8a   : > { %3022 = vmatprep.subr.bf16.mxu1 %v3395_v56  ;;  %1912 = vmatmul.mubr.bf16.vlgmr.msra.gmra.mrb[0].mxu0 %v3710_v54  ;;  %v1768_v54 = vrot.slane %v1766_v58, 4 }
  0x8b   : > { %2074 = vmatpush1.bf16.msra.mxu0 %v3390_v55  ;;  %1921 = vmatprep.mubr.bf16.mxu0 %v3441_v2  ;;  %v2182_v55 = vunpack.c.0.s8 %v2181_v27 }
  0x8c   : > { %2075 = vmatprep.subr.bf16.mxu0 %v3395_v56  ;;  %v1772_v8 = vor.u32 %v1771_v63, %v1768_v54 }
  0x8d   : > { %3030 = vmatpush1.bf16.msra.mxu1 %v3393_v57 }
  0x8e   : > { %3023 = vmatprep.subr.bf16.mxu1 %v3399_v10 }
  0x8f   : > { %2076 = vmatpush1.bf16.msra.mxu0 %v3393_v57 }
  0x90   : > { %1120 = vmatmul.mubr.bf16.gmra.mrb[4].mxu1 %v2810_v39  ;;  %2077 = vmatprep.subr.bf16.mxu0 %v3399_v10  ;;  %v3404_v39 = vld [vmem:[%s4385_s1 + $0x440] ss:$8 sps:$4 sm:$0xff]  }
  0x91   : > { %3031 = vmatpush1.bf16.msra.mxu1 %v3397_v49  ;;  %1129 = vmatprep.mubr.bf16.mxu1 %v3441_v2 }
  0x92   : > { %3024 = vmatprep.subr.bf16.mxu1 %v3402_v59  ;;  %1922 = vmatmul.mubr.bf16.gmra.mrb[4].mxu0 %v3763_v34  ;;  %v1773_v34 = vrot.slane %v1772_v8, 4 }
  0x93   : > { %2078 = vmatpush1.bf16.msra.mxu0 %v3397_v49  ;;  %1931 = vmatprep.mubr.bf16.mxu0 %v3441_v2 }
  0x94   : > { %2079 = vmatprep.subr.bf16.mxu0 %v3402_v59  ;;  %v1778_v45 = vsel %vm3617_vm2, %v1773_v34, %v1777_v7 }
  0x95   : > { %3032 = vmatpush1.bf16.msra.mxu1 %v3400_v1  ;;  %v2951_v9 = vcombine.low %v3818_v19, %v1778_v45  ;;  %v1971_v19 = vrot.slane %v230_v3, 5 }
  0x96   : > { %3025 = vmatprep.subr.bf16.mxu1 %v3406_v5 }
  0x97   : > { %2080 = vmatpush1.bf16.msra.mxu0 %v3400_v1 }
  0x98   : > { %1130 = vmatmul.mubr.bf16.gmra.mrb[8].mxu1 %v2811_v4  ;;  %2081 = vmatprep.subr.bf16.mxu0 %v3406_v5  ;;  %v3416_v4 = vld [vmem:[%s4385_s1 + $0x474] ss:$8 sps:$4 sm:$0xff]  }
  0x99   : > { %3033 = vmatpush1.bf16.msra.mxu1 %v3404_v39  ;;  %1139 = vmatprep.mubr.bf16.mxu1 %v3441_v2 }
  0x9a   : > { %3026 = vmatprep.subr.bf16.mxu1 %v3409_v6  ;;  %1932 = vmatmul.mubr.bf16.gmra.mrb[8].mxu0 %v3807_v12  ;;  %v2968_v12 = vrot.slane %v4110_v40, 9 }
  0x9b   : > { %2082 = vmatpush1.bf16.msra.mxu0 %v3404_v39  ;;  %1941 = vmatprep.mubr.bf16.mxu0 %v3441_v2 }
  0x9c   : > { %2083 = vmatprep.subr.bf16.mxu0 %v3409_v6  ;;  %v1972_v24 = vsel %vm3658_vm5, %v2968_v12, %v1971_v19 }
  0x9d   : > { %3034 = vmatpush1.bf16.msra.mxu1 %v3407_v23  ;;  %v2985_v38 = vcombine.low %v3984_v47, %v1972_v24 }
  0x9e   : > { %3027 = vmatprep.subr.bf16.mxu1 %v3413_v36 }
  0x9f   : > { %2084 = vmatpush1.bf16.msra.mxu0 %v3407_v23 }
  0xa0   : > { %1140 = vmatmul.mubr.bf16.gmra.mrb[12].mxu1 %v2812_v53  ;;  %2085 = vmatprep.subr.bf16.mxu0 %v3413_v36 }
  0xa1   : > { %3035 = vmatpush1.bf16.msra.mxu1 %v3411_v61  ;;  %2125 = vmatprep.mubr.bf16.mxu1 %v3441_v2 }
  0xa2   : > { %3028 = vmatprep.subr.bf16.mxu1 %v3416_v4  ;;  %1942 = vmatmul.mubr.bf16.gmra.mrb[12].mxu0 %v2951_v9 }
  0xa3   : > { %2086 = vmatpush1.bf16.msra.mxu0 %v3411_v61  ;;  %2105 = vmatprep.mubr.bf16.mxu0 %v3441_v2 }
  0xa4   : > { %2087 = vmatprep.subr.bf16.mxu0 %v3416_v4 }
  0xa5   : > { %3036 = vmatpush1.bf16.msra.mxu1 %v3414_v52 }
  0xa7   : > { %2088 = vmatpush1.bf16.msra.mxu0 %v3414_v52 }
  0xa8   : > { %2126 = vmatmul.mubr.bf16.vlgmr.msra.gmra.mrb[16].mxu1 %v4107_v35  ;;  %v2330_v35 = vld [vmem:[%s4386_s2] sm:$0x3] }
  0xa9   : > { %2135 = vmatprep.mubr.bf16.mxu1 %v3441_v2 }
  0xaa   : > { %2106 = vmatmul.mubr.bf16.vlgmr.msra.gmra.mrb[0].mxu0 %v4043_v13  ;;  %v2183_v13 = vlaneseq }
  0xab   : > { %2115 = vmatprep.mubr.bf16.mxu0 %v3441_v2 }
  0xac   : > { %v2184_v16 = vshrl.u32 %v2183_v13, 7 }
  0xae   : > { %v4232_v18 = vsub.s32 0, %v2184_v16  ;;  %v2338_v29 = vsub.s32 1, %v2184_v16  ;;  %v4240_v63 = vsub.s32 %v2182_v55, %v2184_v16 }
  0xb0   : > { %2136 = vmatmul.mubr.bf16.gmra.mrb[20].mxu1 %v2985_v38  ;;  %v2335_v42 = vrot.slane %v2330_v35, %v4232_v18  ;;  %v2339_v43 = vrot.slane %v2330_v35, %v2338_v29 }
  0xb2   : > { %2116 = vmatmul.mubr.bf16.gmra.mrb[4].mxu0 %v4075_v31  ;;  %v2340_v30 = vcombine.low %v2335_v42, %v2339_v43  ;;  %v2341_v13 = vcombine.high %v2335_v42, %v2339_v43 }
  0xb4   : > { %v4243_v8 = vrot.slane %v2340_v30, %v4240_v63  ;;  %v4262_v25 = vrot.slane %v2341_v13, %v4240_v63 }
  0xb6   : > { %v4247_v52 = vcombine.high %v4243_v8, %v4243_v8 }
 0x15b   : > { %v1111_v53 = vpop.f32.mrb[0].mxu1 }
 0x15c   : > { %v1113_v11 = vpop.f32.mrb[1].mxu1 }
 0x15d   : > { %v1115_v46 = vpop.f32.mrb[2].mxu1 }
 0x15e   : > { %v1117_v22 = vpop.f32.mrb[3].mxu1 }
 0x163   : > { %v4224_v14 = vpop.f32.mrb[4].mxu1 }
 0x164   : > { %v4226_v37 = vpop.f32.mrb[5].mxu1 }
 0x165   : > { %v4228_v60 = vpop.f32.mrb[6].mxu1 }
 0x166   : > { %v4230_v17 = vpop.f32.mrb[7].mxu1 }
 0x16b   : > { %v1131_v15 = vpop.f32.mrb[8].mxu1 }
 0x16c   : > { %v1133_v2 = vpop.f32.mrb[9].mxu1 }
 0x16d   : > { %v1135_v47 = vpop.f32.mrb[10].mxu1  ;;  %v1933_v26 = vpop.f32.mrb[8].mxu0 }
 0x16e   : > { %v1137_v50 = vpop.f32.mrb[11].mxu1  ;;  %v3045_v31 = vadd.f32 %v1933_v26, %v1131_v15  ;;  %v1935_v0 = vpop.f32.mrb[9].mxu0 }
 0x16f   : > { %v3047_v28 = vadd.f32 %v1935_v0, %v1133_v2  ;;  %v1937_v62 = vpop.f32.mrb[10].mxu0 }
 0x170   : > { %v3049_v32 = vadd.f32 %v1937_v62, %v1135_v47  ;;  %v1939_v33 = vpop.f32.mrb[11].mxu0 }
 0x171   : > { %v3051_v40 = vadd.f32 %v1939_v33, %v1137_v50 }
 0x173   : > { %v1141_v41 = vpop.f32.mrb[12].mxu1 }
 0x174   : > { %v1143_v20 = vpop.f32.mrb[13].mxu1 }
 0x175   : > { %v1145_v44 = vpop.f32.mrb[14].mxu1  ;;  %v1943_v48 = vpop.f32.mrb[12].mxu0 }
 0x176   : > { %v1147_v51 = vpop.f32.mrb[15].mxu1  ;;  %v3053_v56 = vadd.f32 %v1943_v48, %v1141_v41  ;;  %v1945_v57 = vpop.f32.mrb[13].mxu0 }
 0x177   : > { %v3055_v10 = vadd.f32 %v1945_v57, %v1143_v20  ;;  %v1947_v58 = vpop.f32.mrb[14].mxu0 }
 0x178   : > { %v3057_v49 = vadd.f32 %v1947_v58, %v1145_v44  ;;  %v1949_v59 = vpop.f32.mrb[15].mxu0 }
 0x179   : > { %v4238_v54 = vadd.f32 %v1949_v59, %v1147_v51 }
 0x17b   : > { %v2127_v1 = vpop.f32.mrb[16].mxu1 }
 0x17c   : > { %v3046_v3 = vadd.f32 %v3045_v31, %v2127_v1  ;;  %v2129_v5 = vpop.f32.mrb[17].mxu1 }
 0x17d   : > { %v3048_v21 = vadd.f32 %v3047_v28, %v2129_v5  ;;  %v2131_v39 = vpop.f32.mrb[18].mxu1  ;;  %v2107_v6 = vpop.f32.mrb[0].mxu0  ;;  %v4253_v28 = vsub.s32 2, %v2184_v16 }
 0x17e   : > { %v3050_v34 = vadd.f32 %v3049_v32, %v2131_v39  ;;  %v2133_v7 = vpop.f32.mrb[19].mxu1  ;;  %v3037_v23 = vadd.f32 %v2107_v6, %v1111_v53  ;;  %v2109_v36 = vpop.f32.mrb[1].mxu0  ;;  %v2358_v53 = vrot.slane %v4243_v8, 1 }
 0x17f   : > { %v3052_v45 = vadd.f32 %v3051_v40, %v2133_v7  ;;  %v3038_v61 = vadd.f32 %v2109_v36, %v1113_v11  ;;  %v2111_v4 = vpop.f32.mrb[2].mxu0  ;;  %v2359_v11 = vrot.slane %v4247_v52, 1 }
 0x180   : > { %v2166_v9 = vmax.f32 %v3046_v3, %v3050_v34  ;;  %v3039_v12 = vadd.f32 %v2111_v4, %v1115_v46  ;;  %v2113_v19 = vpop.f32.mrb[3].mxu0 }
 0x181   : > { %v2167_v24 = vmax.f32 %v3048_v21, %v3052_v45  ;;  %v3040_v38 = vadd.f32 %v2113_v19, %v1117_v22 }
 0x182   : > { %v2162_v15 = vmax.f32 %v3037_v23, %v3039_v12 }
 0x183   : > { %v2214_v2 = vcombine.low %v2166_v9, %v2167_v24  ;;  %v2215_v47 = vcombine.high %v2166_v9, %v2167_v24  ;;  %v2137_v26 = vpop.f32.mrb[20].mxu1  ;;  %v2163_v50 = vmax.f32 %v3038_v61, %v3040_v38 }
 0x184   : > { %v4251_v31 = vadd.f32 %v3053_v56, %v2137_v26  ;;  %v2139_v0 = vpop.f32.mrb[21].mxu1 }
 0x185   : > { %v2222_v46 = vrot.slane %v2214_v2, %v4240_v63  ;;  %v2229_v62 = vrot.slane %v2215_v47, %v4240_v63  ;;  %v4257_v22 = vadd.f32 %v3055_v10, %v2139_v0  ;;  %v2141_v29 = vpop.f32.mrb[22].mxu1  ;;  %v2178_v32 = vcombine.low %v2162_v15, %v2163_v50  ;;  %v2117_v35 = vpop.f32.mrb[4].mxu0 }
 0x186   : > { %v2179_v33 = vcombine.high %v2162_v15, %v2163_v50  ;;  %v4259_v40 = vadd.f32 %v3057_v49, %v2141_v29  ;;  %v4264_v27 = vpop.f32.mrb[23].mxu1  ;;  %v2119_v43 = vpop.f32.mrb[5].mxu0  ;;  %v4269_v51 = vadd.f32 %v2117_v35, %v4224_v14 }
 0x187   : > { %v2230_v41 = vcombine.high %v2222_v46, %v2222_v46  ;;  %v2231_v16 = vcombine.high %v2229_v62, %v2229_v62  ;;  %v3010_v20 = vrot.slane %v2222_v46, 9  ;;  %v3012_v42 = vrot.slane %v2229_v62, 9  ;;  %v2121_v56 = vpop.f32.mrb[6].mxu0 }
 0x188   : > { %v2186_v44 = vrot.slane %v2178_v32, %v4240_v63  ;;  %v2193_v48 = vrot.slane %v2179_v33, %v4240_v63  ;;  %v4272_v55 = vadd.f32 %v2119_v43, %v4226_v37  ;;  %v4274_v49 = vpop.f32.mrb[7].mxu0 }
 0x189   : > { %v3011_v57 = vrot.slane %v2230_v41, 9  ;;  %v3013_v10 = vrot.slane %v2231_v16, 9  ;;  %v2322_v58 = vmax.f32 %v2222_v46, %v3010_v20  ;;  %v2324_v30 = vmax.f32 %v2229_v62, %v3012_v42 }
 0x18a   : > { %v2194_v59 = vcombine.high %v2186_v44, %v2186_v44  ;;  %v2195_v1 = vcombine.high %v2193_v48, %v2193_v48  ;;  %v3002_v3 = vrot.slane %v2186_v44, 9  ;;  %v3004_v5 = vrot.slane %v2193_v48, 9 }
 0x18b   : > { %v2323_v21 = vmax.f32 %v2230_v41, %v3011_v57  ;;  %v2325_v39 = vmax.f32 %v2231_v16, %v3013_v10  ;;  %v2378_v14 = vadd.f32 %v4243_v8, %v2322_v58  ;;  %v2380_v37 = vadd.f32 %v4247_v52, %v2324_v30 }
 0x18c   : > { %v3003_v6 = vrot.slane %v2194_v59, 9  ;;  %v3005_v34 = vrot.slane %v2195_v1, 9  ;;  %v2314_v7 = vmax.f32 %v2186_v44, %v3002_v3  ;;  %v2316_v23 = vmax.f32 %v2193_v48, %v3004_v5 }
 0x18d   : > { %v2379_v36 = vadd.f32 %v2358_v53, %v2323_v21  ;;  %v2381_v45 = vadd.f32 %v2359_v11, %v2325_v39  ;;  %v2394_v61 = vmax.f32 %v2378_v14, 0.0  ;;  %v2396_v4 = vmax.f32 %v2380_v37, 0.0 }
 0x18e   : > { %v2315_v9 = vmax.f32 %v2194_v59, %v3003_v6  ;;  %v2317_v12 = vmax.f32 %v2195_v1, %v3005_v34  ;;  %v2370_v19 = vadd.f32 %v4243_v8, %v2314_v7  ;;  %v2372_v24 = vadd.f32 %v4247_v52, %v2316_v23 }
 0x18f   : > { %v2395_v38 = vmax.f32 %v2379_v36, 0.0  ;;  %v2397_v13 = vmax.f32 %v2381_v45, 0.0  ;;  %v2485_v15 = vrot.slane %v2394_v61, %v4232_v18  ;;  %v2489_v2 = vrot.slane %v2394_v61, %v4253_v28 }
 0x190   : > { %v2371_v47 = vadd.f32 %v2358_v53, %v2315_v9  ;;  %v2373_v26 = vadd.f32 %v2359_v11, %v2317_v12  ;;  %v2386_v50 = vmax.f32 %v2370_v19, 0.0  ;;  %v2388_v0 = vmax.f32 %v2372_v24, 0.0 }
 0x191   : > { %v2493_v46 = vrot.slane %v2395_v38, %v4232_v18  ;;  %v2497_v62 = vrot.slane %v2395_v38, %v4253_v28  ;;  %v2501_v29 = vrot.slane %v2396_v4, %v4232_v18  ;;  %v2505_v8 = vrot.slane %v2396_v4, %v4253_v28 }
 0x192   : > { %v2387_v32 = vmax.f32 %v2371_v47, 0.0  ;;  %v2389_v52 = vmax.f32 %v2373_v26, 0.0  ;;  %v2421_v33 = vrot.slane %v2386_v50, %v4232_v18  ;;  %v2425_v35 = vrot.slane %v2386_v50, %v4253_v28 }
 0x193   : > { %v2437_v41 = vrot.slane %v2388_v0, %v4232_v18  ;;  %v2441_v53 = vrot.slane %v2388_v0, %v4253_v28  ;;  %v2509_v11 = vrot.slane %v2397_v13, %v4232_v18  ;;  %v2513_v16 = vrot.slane %v2397_v13, %v4253_v28 }
 0x194   : > { %v2429_v20 = vrot.slane %v2387_v32, %v4232_v18  ;;  %v2433_v42 = vrot.slane %v2387_v32, %v4253_v28  ;;  %v2445_v43 = vrot.slane %v2389_v52, %v4232_v18  ;;  %v2449_v44 = vrot.slane %v2389_v52, %v4253_v28 }
 0x195   : > { %v2567_v48 = vsel %vm2546_vm6, %v2493_v46, %v2485_v15  ;;  %v2574_v57 = vsel %vm2546_vm6, %v2497_v62, %v2489_v2  ;;  %v3043_v10 = vadd.f32 %v2121_v56, %v4228_v60  ;;  %v2168_v58 = vmax.f32 %v4251_v31, %v4259_v40 }
 0x196   : > { %v2547_v30 = vsel %vm2546_vm6, %v2429_v20, %v2421_v33  ;;  %v2560_v59 = vsel %vm2546_vm6, %v2433_v42, %v2425_v35  ;;  %v2568_v1 = vsel %vm2548_vm7, %v2501_v29, %v2567_v48  ;;  %v2575_v3 = vsel %vm2548_vm7, %v2505_v8, %v2574_v57 }
 0x197   : > { %v2549_v5 = vsel %vm2548_vm7, %v2437_v41, %v2547_v30  ;;  %v2561_v21 = vsel %vm2548_vm7, %v2441_v53, %v2560_v59  ;;  %v4308_v39 = vsel %vm2550_vm8, %v2509_v11, %v2568_v1  ;;  %v4311_v60 = vsel %vm2550_vm8, %v2513_v16, %v2575_v3 }
 0x198   : > { %v4314_v31 = vsel %vm2550_vm8, %v2445_v43, %v2549_v5  ;;  %v4317_v40 = vsel %vm2550_vm8, %v2449_v44, %v2561_v21  ;;  %v2164_v56 = vmax.f32 %v4269_v51, %v3043_v10  ;;  %v3044_v14 = vadd.f32 %v4274_v49, %v4230_v17 }
 0x199   : > { %v3060_v37 = vadd.f32 %v4238_v54, %v4264_v27  ;;  %v2357_v34 = vcombine.high %v4262_v25, %v4262_v25  ;;  %v2360_v17 = vrot.slane %v4262_v25, 1 }
 0x19a   : > { %v2165_v6 = vmax.f32 %v4272_v55, %v3044_v14 }
 0x19b   : > { %v2169_v7 = vmax.f32 %v4257_v22, %v3060_v37  ;;  %v2361_v49 = vrot.slane %v2357_v34, 1 }
 0x19c   : > { %v2196_v23 = vcombine.low %v2164_v56, %v2165_v6  ;;  %v2197_v36 = vcombine.high %v2164_v56, %v2165_v6 }
 0x19d   : > { %v2232_v45 = vcombine.low %v2168_v58, %v2169_v7  ;;  %v2233_v61 = vcombine.high %v2168_v58, %v2169_v7 }
 0x19e   : > { %v2204_v4 = vrot.slane %v2196_v23, %v4240_v63  ;;  %v2211_v51 = vrot.slane %v2197_v36, %v4240_v63 }
 0x19f   : > { %v2240_v54 = vrot.slane %v2232_v45, %v4240_v63  ;;  %v2247_v27 = vrot.slane %v2233_v61, %v4240_v63 }
 0x1a0   : > { %v2212_v55 = vcombine.high %v2204_v4, %v2204_v4  ;;  %v2213_v9 = vcombine.high %v2211_v51, %v2211_v51  ;;  %v3006_v12 = vrot.slane %v2204_v4, 9  ;;  %v3008_v19 = vrot.slane %v2211_v51, 9 }
 0x1a1   : > { %v2248_v22 = vcombine.high %v2240_v54, %v2240_v54  ;;  %v2249_v24 = vcombine.high %v2247_v27, %v2247_v27  ;;  %v3014_v38 = vrot.slane %v2240_v54, 9  ;;  %v3016_v13 = vrot.slane %v2247_v27, 9 }
 0x1a2   : > { %v3007_v15 = vrot.slane %v2212_v55, 9  ;;  %v3009_v2 = vrot.slane %v2213_v9, 9  ;;  %v2318_v47 = vmax.f32 %v2204_v4, %v3006_v12  ;;  %v2320_v26 = vmax.f32 %v2211_v51, %v3008_v19 }
 0x1a3   : > { %v3015_v50 = vrot.slane %v2248_v22, 9  ;;  %v3017_v0 = vrot.slane %v2249_v24, 9  ;;  %v2326_v46 = vmax.f32 %v2240_v54, %v3014_v38  ;;  %v2328_v63 = vmax.f32 %v2247_v27, %v3016_v13 }
 0x1a4   : > { %v2319_v62 = vmax.f32 %v2212_v55, %v3007_v15  ;;  %v2321_v29 = vmax.f32 %v2213_v9, %v3009_v2  ;;  %v2374_v8 = vadd.f32 %v4262_v25, %v2318_v47  ;;  %v2376_v32 = vadd.f32 %v2357_v34, %v2320_v26 }
 0x1a5   : > { %v2327_v52 = vmax.f32 %v2248_v22, %v3015_v50  ;;  %v2329_v33 = vmax.f32 %v2249_v24, %v3017_v0  ;;  %v2382_v35 = vadd.f32 %v4262_v25, %v2326_v46  ;;  %v2384_v41 = vadd.f32 %v2357_v34, %v2328_v63 }
 0x1a6   : > { %v2375_v53 = vadd.f32 %v2360_v17, %v2319_v62  ;;  %v2377_v11 = vadd.f32 %v2361_v49, %v2321_v29  ;;  %v2390_v16 = vmax.f32 %v2374_v8, 0.0  ;;  %v2392_v20 = vmax.f32 %v2376_v32, 0.0 }
 0x1a7   : > { %v2383_v42 = vadd.f32 %v2360_v17, %v2327_v52  ;;  %v2385_v43 = vadd.f32 %v2361_v49, %v2329_v33  ;;  %v2398_v44 = vmax.f32 %v2382_v35, 0.0  ;;  %v2400_v48 = vmax.f32 %v2384_v41, 0.0 }
 0x1a8   : > { %v2391_v57 = vmax.f32 %v2375_v53, 0.0  ;;  %v2393_v10 = vmax.f32 %v2377_v11, 0.0  ;;  %v2453_v58 = vrot.slane %v2390_v16, %v4232_v18  ;;  %v2457_v30 = vrot.slane %v2390_v16, %v4253_v28 }
 0x1a9   : > { %v2469_v59 = vrot.slane %v2392_v20, %v4232_v18  ;;  %v2473_v25 = vrot.slane %v2392_v20, %v4253_v28  ;;  %v2399_v1 = vmax.f32 %v2383_v42, 0.0  ;;  %v2401_v3 = vmax.f32 %v2385_v43, 0.0 }
 0x1aa   : > { %v2461_v5 = vrot.slane %v2391_v57, %v4232_v18  ;;  %v2465_v21 = vrot.slane %v2391_v57, %v4253_v28  ;;  %v2477_v56 = vrot.slane %v2393_v10, %v4232_v18  ;;  %v2481_v14 = vrot.slane %v2393_v10, %v4253_v28 }
 0x1ab   : > { %v2553_v37 = vsel %vm2552_vm9, %v2453_v58, %v4314_v31  ;;  %v2563_v6 = vsel %vm2552_vm9, %v2457_v30, %v4317_v40  ;;  %v2517_v34 = vrot.slane %v2398_v44, %v4232_v18  ;;  %v2521_v7 = vrot.slane %v2398_v44, %v4253_v28 }
 0x1ac   : > { %v2555_v23 = vsel %vm2554_vm10, %v2461_v5, %v2553_v37  ;;  %v2564_v36 = vsel %vm2554_vm10, %v2465_v21, %v2563_v6  ;;  %v2525_v45 = vrot.slane %v2399_v1, %v4232_v18  ;;  %v2529_v61 = vrot.slane %v2399_v1, %v4253_v28 }
 0x1ad   : > { %v2557_v31 = vsel %vm2556_vm11, %v2469_v59, %v2555_v23  ;;  %v2565_v40 = vsel %vm2556_vm11, %v2473_v25, %v2564_v36  ;;  %v2533_v17 = vrot.slane %v2400_v48, %v4232_v18  ;;  %v2537_v49 = vrot.slane %v2400_v48, %v4253_v28 }
 0x1ae   : > { %v2559_v4 = vsel %vm2558_vm12, %v2477_v56, %v2557_v31  ;;  %v2566_v51 = vsel %vm2558_vm12, %v2481_v14, %v2565_v40  ;;  %v2570_v54 = vsel %vm2552_vm9, %v2517_v34, %v4308_v39  ;;  %v2577_v27 = vsel %vm2552_vm9, %v2521_v7, %v4311_v60 }
 0x1af   : > { %2585 = vst [vmem:[%s208_s23] sm:$0xff] %v2559_v4  ;;  %2586 = vst [vmem:[%s208_s23 + $0x8] sm:$0xff] %v2566_v51  ;;  %v2541_v55 = vrot.slane %v2401_v3, %v4232_v18  ;;  %v2545_v9 = vrot.slane %v2401_v3, %v4253_v28  ;;  %v2571_v12 = vsel %vm2554_vm10, %v2525_v45, %v2570_v54 }
 0x1b0   : > { %v2578_v19 = vsel %vm2554_vm10, %v2529_v61, %v2577_v27  ;;  %v2572_v22 = vsel %vm2556_vm11, %v2533_v17, %v2571_v12 }
 0x1b1   : > { %v2579_v24 = vsel %vm2556_vm11, %v2537_v49, %v2578_v19  ;;  %v2573_v38 = vsel %vm2558_vm12, %v2541_v55, %v2572_v22 }
 0x1b2   : > { %v2580_v13 = vsel %vm2558_vm12, %v2545_v9, %v2579_v24  ;;  %2587 = vst [vmem:[%s208_s23 + $0x10] sm:$0xff] %v2573_v38 }
 0x1b3   : > { %2588 = vst [vmem:[%s208_s23 + $0x18] sm:$0xff] %v2580_v13 }
 0x1b4 PF: > { %s13_s14 = sadd.s32 1, %s3439_s14   ;;  %s4392_s12 = smov %s3435_s13 }
 0x1b5   : > { %p10_p5 = scmp.ge.s32.totalorder %s13_s14, 4   ;;  %s4393_s13 = smov %s4395_s15 }
 0x1b7   :  { %12 = sbr.rel (!%p10_p5) target bundleno = 2 (0x2), region = 70 }

</bundles_post_ra>
